<compile_context>
chip_gen: v7x
topology: tpu7x:2x2x1
jax: 0.10.0
libtpu: 0.0.40
codegen_flags: <defaults>
</compile_context>

<pallas_src>
import math

import jax
import jax.numpy as jnp
from jax import lax
from jax.experimental import pallas as pl
from jax.experimental.pallas import tpu as pltpu


# ------------------- Kernel A: attention + conv + adjacency -------------------

def fused_adjacency(src2, wqk, adj0, w2t, cw_all, head):
    """softmax attention maps -> 1x1-conv reduce -> new_adj -> asym_adj.

    src2   : (B*T*N, Din)   flattened `source`
    wqk    : (Din, 2C)      [(Wq@W1).T | (Wk@W1).T]  (linear1 folded into Q/K)
    adj0   : (N, N)
    w2t    : (N, N)         linear2 weight, transposed
    cw_all : (B*T*head+1,)  1x1-conv weights followed by its bias  (SMEM)
    """
    BTN, Din = src2.shape
    two_c = wqk.shape[1]
    C = two_c // 2
    dk = C // head
    N = adj0.shape[0]
    BT = BTN // N
    G = BT * head
    inv_sqrt_dk = 1.0 / math.sqrt(float(dk))

    # TODO(synk): MHAttention source not provided; reconstructed as bias-free
    # multi-head scaled-dot-product node-to-node similarity (softmax maps).
    def kernel(src_ref, wqk_ref, adj_ref, w2t_ref, cw_ref, out_ref):
        qk = jnp.dot(src_ref[...], wqk_ref[...],
                     preferred_element_type=jnp.float32)            # (BTN, 2C)
        acc = jnp.zeros((N, N), jnp.float32)
        for bt in range(BT):                                        # static, small
            rows = qk[bt * N:(bt + 1) * N, :]
            for hh in range(head):
                g = bt * head + hh
                q = rows[:, hh * dk:(hh + 1) * dk]
                k = rows[:, C + hh * dk:C + (hh + 1) * dk]
                s = lax.dot_general(q, k, (((1,), (1,)), ((), ())),
                                    preferred_element_type=jnp.float32)
                s = s * inv_sqrt_dk
                s = s - jnp.max(s, axis=-1, keepdims=True)
                e = jnp.exp(s)
                p = e * pl.reciprocal(jnp.sum(e, axis=-1, keepdims=True),
                                      approx=True)
                acc = acc + cw_ref[g] * p                           # conv weight
        adj_attn = acc + cw_ref[G]                                  # conv bias

        new_adj = adj_ref[...] * adj_attn + jnp.dot(
            adj_attn, w2t_ref[...], preferred_element_type=jnp.float32)
        row = lax.broadcasted_iota(jnp.int32, (N, N), 0)
        col = lax.broadcasted_iota(jnp.int32, (N, N), 1)
        diag = row == col
        new_adj = jnp.where(diag, 0.0, new_adj)                     # fill_diag(0)
        m = jnp.max(new_adj, axis=-1, keepdims=True)
        e = jnp.exp(new_adj - m)
        new_adj = e * pl.reciprocal(jnp.sum(e, axis=-1, keepdims=True),
                                    approx=True)                    # softmax(-1)
        new_adj = jnp.where(diag, 1.0, new_adj)                     # fill_diag(1)
        rowsum = jnp.sum(new_adj, axis=-1, keepdims=True)           # >= 1
        out_ref[...] = new_adj * pl.reciprocal(rowsum, approx=True)  # D^-1 A

    return pl.pallas_call(
        kernel,
        out_shape=jax.ShapeDtypeStruct((N, N), jnp.float32),
        grid=(1,),
        in_specs=[pl.BlockSpec((BTN, Din), lambda i: (0, 0)),
                  pl.BlockSpec((Din, two_c), lambda i: (0, 0)),
                  pl.BlockSpec((N, N), lambda i: (0, 0)),
                  pl.BlockSpec((N, N), lambda i: (0, 0)),
                  pl.BlockSpec(memory_space=pltpu.MemorySpace.SMEM)],
        out_specs=pl.BlockSpec((N, N), lambda i: (0, 0)),
        compiler_params=pltpu.CompilerParams(
            dimension_semantics=("arbitrary",),
            vmem_limit_bytes=32 * 1024 * 1024),
    )(src2, wqk, adj0, w2t, cw_all)


# --------------- Kernel B: estimation gate + both ST blocks ------------------

def fused_dual_stblock(src2, td2, dw2, einh, edif, sym_adj,
                       gw1t, gb1, gw2t, gb2,
                       wzr_s, bzr_s, wh_s, bh_s, woutT_s, bout_s, cfg):
    B = cfg['batch_size']
    T = cfg['horizon']
    N = cfg['num_nodes']
    Din = cfg['input_dim']
    C = cfg['rnn_units']
    Ei = einh.shape[1]
    Ed = edif.shape[1]
    BTN = B * T * N
    F1 = Din + C
    F2 = 2 * F1
    Fin = gw1t.shape[0]
    Tout = woutT_s.shape[-1]
    c_inh = float(cfg['adp_coefficient_inh'])
    c_dif = float(cfg['adp_coefficient_dif'])

    # TODO(synk): STBlock / EstimationGate sources not provided; reconstructed as
    # a DDGCRN-style dynamic-graph-conv GRU (adaptive adjacency blended with the
    # adp_coefficient) + linear head, and sigmoid(FC2(relu(FC1([T_D,D_W,E_inh,
    # E_dif])))) * signal for the gate.
    def kernel(src_ref, td_ref, dw_ref, einh_ref, edif_ref, adj_ref,
               gw1_ref, gb1_ref, gw2_ref, gb2_ref,
               wzr_ref, bzr_ref, wh_ref, bh_ref, wout_ref, bout_ref,
               out_ref, x_scr):
        br = pl.program_id(0)          # 0 = inherent branch, 1 = difference branch

        def row_softmax(a):
            a = a - jnp.max(a, axis=-1, keepdims=True)
            e = jnp.exp(a)
            return e * pl.reciprocal(jnp.sum(e, axis=-1, keepdims=True),
                                     approx=True)

        def sigmoid(x):
            return pl.reciprocal(1.0 + jnp.exp(-x), approx=True)

        # -------- branch support: sym_adj + coeff * softmax(relu(E E^T)) ------
        def adaptive(emb):
            a = lax.dot_general(emb, emb, (((1,), (1,)), ((), ())),
                                preferred_element_type=jnp.float32)
            return row_softmax(jnp.maximum(a, 0.0))

        support = adj_ref[...] + jnp.where(
            br == 0,
            c_inh * adaptive(einh_ref[...]),
            c_dif * adaptive(edif_ref[...]))

        # -------- estimation gate (kept in VMEM, no HBM round trip) -----------
        gw1 = gw1_ref[...]                                           # (Fin, C)
        node_part = (jnp.dot(einh_ref[...], gw1[2 * Ei:3 * Ei, :],
                             preferred_element_type=jnp.float32)
                     + jnp.dot(edif_ref[...], gw1[3 * Ei:3 * Ei + Ed, :],
                               preferred_element_type=jnp.float32))  # (N, C)
        node_bc = jnp.concatenate([node_part] * (B * T), axis=0)     # (BTN, C)
        h1 = (jnp.dot(td_ref[...], gw1[:Ei, :],
                      preferred_element_type=jnp.float32)
              + jnp.dot(dw_ref[...], gw1[Ei:2 * Ei, :],
                        preferred_element_type=jnp.float32)
              + node_bc + gb1_ref[...])
        h1 = jnp.maximum(h1, 0.0)
        glogit = jnp.dot(h1, gw2_ref[...],
                         preferred_element_type=jnp.float32) + gb2_ref[...]
        gate = sigmoid(glogit)                                       # (BTN, 1)

        src = src_ref[...]                                           # (BTN, Din)
        sig = src[:, 0:1]
        inh_sig = gate * sig
        x0 = jnp.where(br == 0, inh_sig, sig - inh_sig)              # (BTN, 1)
        # stage the branch GRU input (gated channel 0, passthrough rest) in VMEM
        x_scr[...] = jnp.concatenate([x0, src[:, 1:]], axis=-1)      # (BTN, Din)

        # -------- GRU over the horizon (state resident in vregs) --------------
        wzr = wzr_ref[...]
        bzr = bzr_ref[...]
        wh = wh_ref[...]
        bh = bh_ref[...]

        def graph_apply(x2d):          # per-batch support @ x, kept 2-D (B*N, F)
            return jnp.concatenate(
                [jnp.dot(support, x2d[b * N:(b + 1) * N, :],
                         preferred_element_type=jnp.float32)
                 for b in range(B)], axis=0)

        def gru_step(t, h):            # h: (B*N, C)
            xt = jnp.concatenate(
                [x_scr[pl.ds(pl.multiple_of(b * T * N + t * N, N), N), :]
                 for b in range(B)], axis=0)                         # (B*N, Din)
            xh = jnp.concatenate([xt, h], axis=-1)                   # (B*N, F1)
            axh = graph_apply(xh)                                    # A@[xt, h]
            zr_in = jnp.concatenate([xh, axh], axis=-1)              # (B*N, F2)
            zr = sigmoid(jnp.dot(zr_in, wzr,
                                 preferred_element_type=jnp.float32) + bzr)
            z = zr[:, :C]
            r = zr[:, C:]
            rh = r * h
            arh = graph_apply(rh)                                    # A@(r*h)
            h_in = jnp.concatenate([xt, rh, axh[:, :Din], arh], axis=-1)
            hc = jnp.tanh(jnp.dot(h_in, wh,
                                  preferred_element_type=jnp.float32) + bh)
            return z * h + (1.0 - z) * hc

        h_fin = lax.fori_loop(0, T, gru_step,
                              jnp.zeros((B * N, C), jnp.float32), unroll=True)
        out_ref[...] = (jnp.dot(h_fin, wout_ref[...],
                                preferred_element_type=jnp.float32)
                        + bout_ref[...])                             # (B*N, Tout)

    return pl.pallas_call(
        kernel,
        out_shape=jax.ShapeDtypeStruct((2, B * N, Tout), jnp.float32),
        grid=(2,),
        in_specs=[
            pl.BlockSpec((BTN, Din), lambda b: (0, 0)),
            pl.BlockSpec((BTN, Ei), lambda b: (0, 0)),
            pl.BlockSpec((BTN, Ei), lambda b: (0, 0)),
            pl.BlockSpec((N, Ei), lambda b: (0, 0)),
            pl.BlockSpec((N, Ed), lambda b: (0, 0)),
            pl.BlockSpec((N, N), lambda b: (0, 0)),
            pl.BlockSpec((Fin, C), lambda b: (0, 0)),
            pl.BlockSpec((1, C), lambda b: (0, 0)),
            pl.BlockSpec((C, 1), lambda b: (0, 0)),
            pl.BlockSpec((1, 1), lambda b: (0, 0)),
            pl.BlockSpec((None, F2, 2 * C), lambda b: (b, 0, 0)),
            pl.BlockSpec((None, 1, 2 * C), lambda b: (b, 0, 0)),
            pl.BlockSpec((None, F2, C), lambda b: (b, 0, 0)),
            pl.BlockSpec((None, 1, C), lambda b: (b, 0, 0)),
            pl.BlockSpec((None, C, Tout), lambda b: (b, 0, 0)),
            pl.BlockSpec((None, 1, Tout), lambda b: (b, 0, 0)),
        ],
        out_specs=pl.BlockSpec((None, B * N, Tout), lambda b: (b, 0, 0)),
        scratch_shapes=[pltpu.VMEM((BTN, Din), jnp.float32)],
        compiler_params=pltpu.CompilerParams(
            dimension_semantics=("parallel",),            # inh/dif on 2 TCs (v7x)
            vmem_limit_bytes=32 * 1024 * 1024),
    )(src2, td2, dw2, einh, edif, sym_adj, gw1t, gb1, gw2t, gb2,
      wzr_s, bzr_s, wh_s, bh_s, woutT_s, bout_s)


# --------------------------------- forward -----------------------------------

def model_forward(packed, cfg, source, adj, epoch_idx):
    # TODO(synk): epoch_idx is only consumed inside the unavailable STBlock; unused.
    B, T, N, Din = source.shape
    H = cfg['head']

    adj0 = adj[0].astype(jnp.float32)                    # adj = Tensor(adj[0])

    # time / day embedding gathers (glue, stays in JAX)
    t_idx = (source[..., 1] * 288.0).astype(jnp.int32)
    d_idx = source[..., 2].astype(jnp.int32)
    td2 = packed['T_i_D_emb'][t_idx].reshape(B * T * N, -1)
    dw2 = packed['D_i_W_emb'][d_idx].reshape(B * T * N, -1)

    src2 = source.reshape(B * T * N, Din)

    # Kernel A: attention + 1x1 conv + linear2 + softmax + asym_adj
    sym_adj = fused_adjacency(src2, packed['wqk'], adj0, packed['w2t'],
                              packed['cw_all'], H)

    # Kernel B: estimation gate + both ST blocks (grid axis = branch, parallel)
    out2 = fused_dual_stblock(src2, td2, dw2, packed['E_inh'], packed['E_dif'],
                              sym_adj, packed['gw1t'], packed['gb1'],
                              packed['gw2t'], packed['gb2'],
                              packed['wzr_s'], packed['bzr_s'],
                              packed['wh_s'], packed['bh_s'],
                              packed['woutT_s'], packed['bout_s'], cfg)
    summed = out2[0] + out2[1]                                     # (B*N, horizon)
    horizon = cfg['horizon']
    return summed.reshape(B, N, horizon).transpose(0, 2, 1)[..., None]


# ----------------------------- parameter handling ----------------------------

def init_params(key, cfg):
    """PyTorch-layout parameters (same structure as the nn.Module)."""
    N, Din, C = cfg['num_nodes'], cfg['input_dim'], cfg['rnn_units']
    Ei, Ed, H = cfg['embed_dim_inh'], cfg['embed_dim_dif'], cfg['head']
    B, T = cfg['batch_size'], cfg['horizon']
    ks = jax.random.split(key, 20)

    def rnd(k, shape, scale=0.1):
        return scale * jax.random.normal(k, shape, dtype=jnp.float32)

    def st_params(k):
        kk = jax.random.split(k, 8)
        F2 = 2 * (Din + C)
        return {'Wz': rnd(kk[0], (F2, C)), 'bz': rnd(kk[1], (C,)),
                'Wr': rnd(kk[2], (F2, C)), 'br': rnd(kk[3], (C,)),
                'Wh': rnd(kk[4], (F2, C)), 'bh': rnd(kk[5], (C,)),
                'Wout': rnd(kk[6], (T * 1, C)), 'bout': rnd(kk[7], (T * 1,))}

    return {
        'W1': rnd(ks[0], (C, Din)),              # Linear(input_dim, rnn_units, bias=False)
        'E_inh': rnd(ks[1], (N, Ei), 1.0),
        'E_dif': rnd(ks[2], (N, Ed), 1.0),
        'T_i_D_emb': rnd(ks[3], (288, Ei), 1.0),
        'D_i_W_emb': rnd(ks[4], (7, Ei), 1.0),
        'Wq': rnd(ks[5], (C, C)),
        'Wk': rnd(ks[6], (C, C)),
        'conv_w': rnd(ks[7], (B * T * H,)),      # Conv2d(B*horizon*head, 1, 1)
        'conv_b': rnd(ks[8], (1,)),
        'W2': rnd(ks[9], (N, N)),                # Linear(num_nodes, num_nodes, bias=False)
        'gate_W1': rnd(ks[10], (C, 2 * Ei + Ei + Ed)),
        'gate_b1': rnd(ks[11], (C,)),
        'gate_W2': rnd(ks[12], (1, C)),
        'gate_b2': rnd(ks[13], (1,)),
        'inh': st_params(ks[14]),
        'dif': st_params(ks[15]),
    }


def pack_params(p, cfg):
    """One-time host-side weight prep: fold linear1 into Q/K, fuse z|r gate
    weights, transpose to (in, out) layout and stack the two branches."""
    def branch(pb):
        wzr = jnp.concatenate([pb['Wz'], pb['Wr']], axis=1)        # (F2, 2C)
        bzr = jnp.concatenate([pb['bz'], pb['br']])[None, :]       # (1, 2C)
        return (wzr, bzr, pb['Wh'], pb['bh'][None, :],
                pb['Wout'].T, pb['bout'][None, :])

    inh_p = branch(p['inh'])
    dif_p = branch(p['dif'])
    stack = lambda i: jnp.stack([inh_p[i], dif_p[i]], axis=0)

    wq_eff = (p['Wq'] @ p['W1']).T                                 # (Din, C)
    wk_eff = (p['Wk'] @ p['W1']).T
    return {
        'wqk': jnp.concatenate([wq_eff, wk_eff], axis=1),          # (Din, 2C)
        'w2t': p['W2'].T,
        'cw_all': jnp.concatenate([p['conv_w'], p['conv_b']]),     # (G+1,)
        'E_inh': p['E_inh'], 'E_dif': p['E_dif'],
        'T_i_D_emb': p['T_i_D_emb'], 'D_i_W_emb': p['D_i_W_emb'],
        'gw1t': p['gate_W1'].T, 'gb1': p['gate_b1'][None, :],
        'gw2t': p['gate_W2'].T, 'gb2': p['gate_b2'][None, :],
        'wzr_s': stack(0), 'bzr_s': stack(1), 'wh_s': stack(2),
        'bh_s': stack(3), 'woutT_s': stack(4), 'bout_s': stack(5),
    }


# ----------------------------------- main -------------------------------------

if __name__ == "__main__":
    cfg = dict(batch_size=2, horizon=4, num_nodes=8, input_dim=3,
               rnn_units=32, head=2, embed_dim_inh=8, embed_dim_dif=8,
               adp_coefficient_inh=0.5, adp_coefficient_dif=0.5)

    key = jax.random.PRNGKey(0)
    kp, kd, kt, kw, ka = jax.random.split(key, 5)
    params = init_params(kp, cfg)
    packed = pack_params(params, cfg)

    B, T, N = cfg['batch_size'], cfg['horizon'], cfg['num_nodes']
    signal = jax.random.normal(kd, (B, T, N, 1), dtype=jnp.float32)
    t_in_day = jax.random.uniform(kt, (B, T, N, 1), minval=0.0, maxval=0.999)
    d_in_week = jax.random.randint(kw, (B, T, N, 1), 0, 7).astype(jnp.float32)
    source = jnp.concatenate([signal, t_in_day, d_in_week], axis=-1)   # (B,T,N,3)

    adj_raw = (jax.random.uniform(ka, (2, N, N)) > 0.5).astype(jnp.float32)

    fwd = jax.jit(lambda pk, src, a: model_forward(pk, cfg, src, a, 0))
    out = fwd(packed, source, adj_raw)
    out = jax.block_until_ready(out)

    assert out.shape == (B, cfg['horizon'], N, 1)
    assert bool(jnp.all(jnp.isfinite(out)))
    print("KERNEL_OK")
</pallas_src>

<mosaic_0001>
module attributes {stable_mosaic.version = 11 : i64} {
  func.func @kernel(%arg0: i32, %arg1: memref<64x3xf32, #tpu.memory_space<vmem>>, %arg2: memref<3x64xf32, #tpu.memory_space<vmem>>, %arg3: memref<8x8xf32, #tpu.memory_space<vmem>>, %arg4: memref<8x8xf32, #tpu.memory_space<vmem>>, %arg5: memref<17xf32, #tpu.memory_space<smem>>, %arg6: memref<8x8xf32, #tpu.memory_space<vmem>>) attributes {dimension_semantics = [#tpu.dimension_semantics<arbitrary>], iteration_bounds = array<i64: 1>, scalar_prefetch = 0 : i64, scratch_operands = 0 : i64, tpu.core_type = #tpu.core_type<tc>, window_params = [{pipeline_mode = #tpu.pipeline_mode<synchronous>, transform_indices = @transform_0, window_bounds = array<i64: 64, 3>}, {pipeline_mode = #tpu.pipeline_mode<synchronous>, transform_indices = @transform_1, window_bounds = array<i64: 3, 64>}, {pipeline_mode = #tpu.pipeline_mode<synchronous>, transform_indices = @transform_2, window_bounds = array<i64: 8, 8>}, {pipeline_mode = #tpu.pipeline_mode<synchronous>, transform_indices = @transform_3, window_bounds = array<i64: 8, 8>}, {transform_indices = @transform_4, window_bounds = array<i64: 17>}, {pipeline_mode = #tpu.pipeline_mode<synchronous>, transform_indices = @transform_5, window_bounds = array<i64: 8, 8>}]} {
    %c0 = arith.constant 0 : index
    %c0_0 = arith.constant 0 : index
    %0 = vector.load %arg1[%c0, %c0_0] : memref<64x3xf32, #tpu.memory_space<vmem>>, vector<64x3xf32>
    %c0_1 = arith.constant 0 : index
    %c0_2 = arith.constant 0 : index
    %1 = vector.load %arg2[%c0_1, %c0_2] : memref<3x64xf32, #tpu.memory_space<vmem>>, vector<3x64xf32>
    %cst = arith.constant dense<0.000000e+00> : vector<64x64xf32>
    %2 = tpu.matmul %0, %1, %cst {dimension_numbers = #tpu.dot_dimension_numbers<[1], [0], [0], [1], [0, 0, 1, 1], [], []>} : vector<64x3xf32>, vector<3x64xf32>, vector<64x64xf32> -> vector<64x64xf32>
    %cst_3 = arith.constant 0.000000e+00 : f32
    %3 = vector.broadcast %cst_3 : f32 to vector<8x8xf32>
    %4 = vector.extract_strided_slice %2 {offsets = [0, 0], sizes = [8, 64], strides = [1, 1]} : vector<64x64xf32> to vector<8x64xf32>
    %5 = vector.extract_strided_slice %4 {offsets = [0, 0], sizes = [8, 16], strides = [1, 1]} : vector<8x64xf32> to vector<8x16xf32>
    %6 = vector.extract_strided_slice %4 {offsets = [0, 32], sizes = [8, 16], strides = [1, 1]} : vector<8x64xf32> to vector<8x16xf32>
    %cst_4 = arith.constant dense<0.000000e+00> : vector<8x8xf32>
    %7 = tpu.matmul %5, %6, %cst_4 {dimension_numbers = #tpu.dot_dimension_numbers<[1], [1], [0], [0], [0, 0, 1, 0], [], []>} : vector<8x16xf32>, vector<8x16xf32>, vector<8x8xf32> -> vector<8x8xf32>
    %cst_5 = arith.constant 2.500000e-01 : f32
    %8 = vector.broadcast %cst_5 : f32 to vector<8x8xf32>
    %9 = arith.mulf %7, %8 : vector<8x8xf32>
    %cst_6 = arith.constant dense<0xFF800000> : vector<8xf32>
    %10 = vector.multi_reduction <maximumf>, %9, %cst_6 [1] : vector<8x8xf32> to vector<8xf32>
    %11 = vector.shape_cast %10 : vector<8xf32> to vector<8x1xf32>
    %12 = vector.broadcast %11 : vector<8x1xf32> to vector<8x8xf32>
    %13 = arith.subf %9, %12 : vector<8x8xf32>
    %14 = math.exp %13 : vector<8x8xf32>
    %cst_7 = arith.constant dense<0.000000e+00> : vector<8xf32>
    %15 = vector.multi_reduction <add>, %14, %cst_7 [1] : vector<8x8xf32> to vector<8xf32>
    %16 = vector.shape_cast %15 : vector<8xf32> to vector<8x1xf32>
    %17 = tpu.reciprocal %16 {approx = true} : vector<8x1xf32> -> vector<8x1xf32>
    %18 = vector.broadcast %17 : vector<8x1xf32> to vector<8x8xf32>
    %19 = arith.mulf %14, %18 : vector<8x8xf32>
    %c0_8 = arith.constant 0 : index
    %20 = memref.load %arg5[%c0_8] : memref<17xf32, #tpu.memory_space<smem>>
    %21 = vector.broadcast %20 : f32 to vector<8x8xf32>
    %22 = arith.mulf %21, %19 : vector<8x8xf32>
    %23 = arith.addf %3, %22 : vector<8x8xf32>
    %24 = vector.extract_strided_slice %4 {offsets = [0, 16], sizes = [8, 16], strides = [1, 1]} : vector<8x64xf32> to vector<8x16xf32>
    %25 = vector.extract_strided_slice %4 {offsets = [0, 48], sizes = [8, 16], strides = [1, 1]} : vector<8x64xf32> to vector<8x16xf32>
    %cst_9 = arith.constant dense<0.000000e+00> : vector<8x8xf32>
    %26 = tpu.matmul %24, %25, %cst_9 {dimension_numbers = #tpu.dot_dimension_numbers<[1], [1], [0], [0], [0, 0, 1, 0], [], []>} : vector<8x16xf32>, vector<8x16xf32>, vector<8x8xf32> -> vector<8x8xf32>
    %cst_10 = arith.constant 2.500000e-01 : f32
    %27 = vector.broadcast %cst_10 : f32 to vector<8x8xf32>
    %28 = arith.mulf %26, %27 : vector<8x8xf32>
    %cst_11 = arith.constant dense<0xFF800000> : vector<8xf32>
    %29 = vector.multi_reduction <maximumf>, %28, %cst_11 [1] : vector<8x8xf32> to vector<8xf32>
    %30 = vector.shape_cast %29 : vector<8xf32> to vector<8x1xf32>
    %31 = vector.broadcast %30 : vector<8x1xf32> to vector<8x8xf32>
    %32 = arith.subf %28, %31 : vector<8x8xf32>
    %33 = math.exp %32 : vector<8x8xf32>
    %cst_12 = arith.constant dense<0.000000e+00> : vector<8xf32>
    %34 = vector.multi_reduction <add>, %33, %cst_12 [1] : vector<8x8xf32> to vector<8xf32>
    %35 = vector.shape_cast %34 : vector<8xf32> to vector<8x1xf32>
    %36 = tpu.reciprocal %35 {approx = true} : vector<8x1xf32> -> vector<8x1xf32>
    %37 = vector.broadcast %36 : vector<8x1xf32> to vector<8x8xf32>
    %38 = arith.mulf %33, %37 : vector<8x8xf32>
    %c1 = arith.constant 1 : index
    %39 = memref.load %arg5[%c1] : memref<17xf32, #tpu.memory_space<smem>>
    %40 = vector.broadcast %39 : f32 to vector<8x8xf32>
    %41 = arith.mulf %40, %38 : vector<8x8xf32>
    %42 = arith.addf %23, %41 : vector<8x8xf32>
    %43 = vector.extract_strided_slice %2 {offsets = [8, 0], sizes = [8, 64], strides = [1, 1]} : vector<64x64xf32> to vector<8x64xf32>
    %44 = vector.extract_strided_slice %43 {offsets = [0, 0], sizes = [8, 16], strides = [1, 1]} : vector<8x64xf32> to vector<8x16xf32>
    %45 = vector.extract_strided_slice %43 {offsets = [0, 32], sizes = [8, 16], strides = [1, 1]} : vector<8x64xf32> to vector<8x16xf32>
    %cst_13 = arith.constant dense<0.000000e+00> : vector<8x8xf32>
    %46 = tpu.matmul %44, %45, %cst_13 {dimension_numbers = #tpu.dot_dimension_numbers<[1], [1], [0], [0], [0, 0, 1, 0], [], []>} : vector<8x16xf32>, vector<8x16xf32>, vector<8x8xf32> -> vector<8x8xf32>
    %cst_14 = arith.constant 2.500000e-01 : f32
    %47 = vector.broadcast %cst_14 : f32 to vector<8x8xf32>
    %48 = arith.mulf %46, %47 : vector<8x8xf32>
    %cst_15 = arith.constant dense<0xFF800000> : vector<8xf32>
    %49 = vector.multi_reduction <maximumf>, %48, %cst_15 [1] : vector<8x8xf32> to vector<8xf32>
    %50 = vector.shape_cast %49 : vector<8xf32> to vector<8x1xf32>
    %51 = vector.broadcast %50 : vector<8x1xf32> to vector<8x8xf32>
    %52 = arith.subf %48, %51 : vector<8x8xf32>
    %53 = math.exp %52 : vector<8x8xf32>
    %cst_16 = arith.constant dense<0.000000e+00> : vector<8xf32>
    %54 = vector.multi_reduction <add>, %53, %cst_16 [1] : vector<8x8xf32> to vector<8xf32>
    %55 = vector.shape_cast %54 : vector<8xf32> to vector<8x1xf32>
    %56 = tpu.reciprocal %55 {approx = true} : vector<8x1xf32> -> vector<8x1xf32>
    %57 = vector.broadcast %56 : vector<8x1xf32> to vector<8x8xf32>
    %58 = arith.mulf %53, %57 : vector<8x8xf32>
    %c2 = arith.constant 2 : index
    %59 = memref.load %arg5[%c2] : memref<17xf32, #tpu.memory_space<smem>>
    %60 = vector.broadcast %59 : f32 to vector<8x8xf32>
    %61 = arith.mulf %60, %58 : vector<8x8xf32>
    %62 = arith.addf %42, %61 : vector<8x8xf32>
    %63 = vector.extract_strided_slice %43 {offsets = [0, 16], sizes = [8, 16], strides = [1, 1]} : vector<8x64xf32> to vector<8x16xf32>
    %64 = vector.extract_strided_slice %43 {offsets = [0, 48], sizes = [8, 16], strides = [1, 1]} : vector<8x64xf32> to vector<8x16xf32>
    %cst_17 = arith.constant dense<0.000000e+00> : vector<8x8xf32>
    %65 = tpu.matmul %63, %64, %cst_17 {dimension_numbers = #tpu.dot_dimension_numbers<[1], [1], [0], [0], [0, 0, 1, 0], [], []>} : vector<8x16xf32>, vector<8x16xf32>, vector<8x8xf32> -> vector<8x8xf32>
    %cst_18 = arith.constant 2.500000e-01 : f32
    %66 = vector.broadcast %cst_18 : f32 to vector<8x8xf32>
    %67 = arith.mulf %65, %66 : vector<8x8xf32>
    %cst_19 = arith.constant dense<0xFF800000> : vector<8xf32>
    %68 = vector.multi_reduction <maximumf>, %67, %cst_19 [1] : vector<8x8xf32> to vector<8xf32>
    %69 = vector.shape_cast %68 : vector<8xf32> to vector<8x1xf32>
    %70 = vector.broadcast %69 : vector<8x1xf32> to vector<8x8xf32>
    %71 = arith.subf %67, %70 : vector<8x8xf32>
    %72 = math.exp %71 : vector<8x8xf32>
    %cst_20 = arith.constant dense<0.000000e+00> : vector<8xf32>
    %73 = vector.multi_reduction <add>, %72, %cst_20 [1] : vector<8x8xf32> to vector<8xf32>
    %74 = vector.shape_cast %73 : vector<8xf32> to vector<8x1xf32>
    %75 = tpu.reciprocal %74 {approx = true} : vector<8x1xf32> -> vector<8x1xf32>
    %76 = vector.broadcast %75 : vector<8x1xf32> to vector<8x8xf32>
    %77 = arith.mulf %72, %76 : vector<8x8xf32>
    %c3 = arith.constant 3 : index
    %78 = memref.load %arg5[%c3] : memref<17xf32, #tpu.memory_space<smem>>
    %79 = vector.broadcast %78 : f32 to vector<8x8xf32>
    %80 = arith.mulf %79, %77 : vector<8x8xf32>
    %81 = arith.addf %62, %80 : vector<8x8xf32>
    %82 = vector.extract_strided_slice %2 {offsets = [16, 0], sizes = [8, 64], strides = [1, 1]} : vector<64x64xf32> to vector<8x64xf32>
    %83 = vector.extract_strided_slice %82 {offsets = [0, 0], sizes = [8, 16], strides = [1, 1]} : vector<8x64xf32> to vector<8x16xf32>
    %84 = vector.extract_strided_slice %82 {offsets = [0, 32], sizes = [8, 16], strides = [1, 1]} : vector<8x64xf32> to vector<8x16xf32>
    %cst_21 = arith.constant dense<0.000000e+00> : vector<8x8xf32>
    %85 = tpu.matmul %83, %84, %cst_21 {dimension_numbers = #tpu.dot_dimension_numbers<[1], [1], [0], [0], [0, 0, 1, 0], [], []>} : vector<8x16xf32>, vector<8x16xf32>, vector<8x8xf32> -> vector<8x8xf32>
    %cst_22 = arith.constant 2.500000e-01 : f32
    %86 = vector.broadcast %cst_22 : f32 to vector<8x8xf32>
    %87 = arith.mulf %85, %86 : vector<8x8xf32>
    %cst_23 = arith.constant dense<0xFF800000> : vector<8xf32>
    %88 = vector.multi_reduction <maximumf>, %87, %cst_23 [1] : vector<8x8xf32> to vector<8xf32>
    %89 = vector.shape_cast %88 : vector<8xf32> to vector<8x1xf32>
    %90 = vector.broadcast %89 : vector<8x1xf32> to vector<8x8xf32>
    %91 = arith.subf %87, %90 : vector<8x8xf32>
    %92 = math.exp %91 : vector<8x8xf32>
    %cst_24 = arith.constant dense<0.000000e+00> : vector<8xf32>
    %93 = vector.multi_reduction <add>, %92, %cst_24 [1] : vector<8x8xf32> to vector<8xf32>
    %94 = vector.shape_cast %93 : vector<8xf32> to vector<8x1xf32>
    %95 = tpu.reciprocal %94 {approx = true} : vector<8x1xf32> -> vector<8x1xf32>
    %96 = vector.broadcast %95 : vector<8x1xf32> to vector<8x8xf32>
    %97 = arith.mulf %92, %96 : vector<8x8xf32>
    %c4 = arith.constant 4 : index
    %98 = memref.load %arg5[%c4] : memref<17xf32, #tpu.memory_space<smem>>
    %99 = vector.broadcast %98 : f32 to vector<8x8xf32>
    %100 = arith.mulf %99, %97 : vector<8x8xf32>
    %101 = arith.addf %81, %100 : vector<8x8xf32>
    %102 = vector.extract_strided_slice %82 {offsets = [0, 16], sizes = [8, 16], strides = [1, 1]} : vector<8x64xf32> to vector<8x16xf32>
    %103 = vector.extract_strided_slice %82 {offsets = [0, 48], sizes = [8, 16], strides = [1, 1]} : vector<8x64xf32> to vector<8x16xf32>
    %cst_25 = arith.constant dense<0.000000e+00> : vector<8x8xf32>
    %104 = tpu.matmul %102, %103, %cst_25 {dimension_numbers = #tpu.dot_dimension_numbers<[1], [1], [0], [0], [0, 0, 1, 0], [], []>} : vector<8x16xf32>, vector<8x16xf32>, vector<8x8xf32> -> vector<8x8xf32>
    %cst_26 = arith.constant 2.500000e-01 : f32
    %105 = vector.broadcast %cst_26 : f32 to vector<8x8xf32>
    %106 = arith.mulf %104, %105 : vector<8x8xf32>
    %cst_27 = arith.constant dense<0xFF800000> : vector<8xf32>
    %107 = vector.multi_reduction <maximumf>, %106, %cst_27 [1] : vector<8x8xf32> to vector<8xf32>
    %108 = vector.shape_cast %107 : vector<8xf32> to vector<8x1xf32>
    %109 = vector.broadcast %108 : vector<8x1xf32> to vector<8x8xf32>
    %110 = arith.subf %106, %109 : vector<8x8xf32>
    %111 = math.exp %110 : vector<8x8xf32>
    %cst_28 = arith.constant dense<0.000000e+00> : vector<8xf32>
    %112 = vector.multi_reduction <add>, %111, %cst_28 [1] : vector<8x8xf32> to vector<8xf32>
    %113 = vector.shape_cast %112 : vector<8xf32> to vector<8x1xf32>
    %114 = tpu.reciprocal %113 {approx = true} : vector<8x1xf32> -> vector<8x1xf32>
    %115 = vector.broadcast %114 : vector<8x1xf32> to vector<8x8xf32>
    %116 = arith.mulf %111, %115 : vector<8x8xf32>
    %c5 = arith.constant 5 : index
    %117 = memref.load %arg5[%c5] : memref<17xf32, #tpu.memory_space<smem>>
    %118 = vector.broadcast %117 : f32 to vector<8x8xf32>
    %119 = arith.mulf %118, %116 : vector<8x8xf32>
    %120 = arith.addf %101, %119 : vector<8x8xf32>
    %121 = vector.extract_strided_slice %2 {offsets = [24, 0], sizes = [8, 64], strides = [1, 1]} : vector<64x64xf32> to vector<8x64xf32>
    %122 = vector.extract_strided_slice %121 {offsets = [0, 0], sizes = [8, 16], strides = [1, 1]} : vector<8x64xf32> to vector<8x16xf32>
    %123 = vector.extract_strided_slice %121 {offsets = [0, 32], sizes = [8, 16], strides = [1, 1]} : vector<8x64xf32> to vector<8x16xf32>
    %cst_29 = arith.constant dense<0.000000e+00> : vector<8x8xf32>
    %124 = tpu.matmul %122, %123, %cst_29 {dimension_numbers = #tpu.dot_dimension_numbers<[1], [1], [0], [0], [0, 0, 1, 0], [], []>} : vector<8x16xf32>, vector<8x16xf32>, vector<8x8xf32> -> vector<8x8xf32>
    %cst_30 = arith.constant 2.500000e-01 : f32
    %125 = vector.broadcast %cst_30 : f32 to vector<8x8xf32>
    %126 = arith.mulf %124, %125 : vector<8x8xf32>
    %cst_31 = arith.constant dense<0xFF800000> : vector<8xf32>
    %127 = vector.multi_reduction <maximumf>, %126, %cst_31 [1] : vector<8x8xf32> to vector<8xf32>
    %128 = vector.shape_cast %127 : vector<8xf32> to vector<8x1xf32>
    %129 = vector.broadcast %128 : vector<8x1xf32> to vector<8x8xf32>
    %130 = arith.subf %126, %129 : vector<8x8xf32>
    %131 = math.exp %130 : vector<8x8xf32>
    %cst_32 = arith.constant dense<0.000000e+00> : vector<8xf32>
    %132 = vector.multi_reduction <add>, %131, %cst_32 [1] : vector<8x8xf32> to vector<8xf32>
    %133 = vector.shape_cast %132 : vector<8xf32> to vector<8x1xf32>
    %134 = tpu.reciprocal %133 {approx = true} : vector<8x1xf32> -> vector<8x1xf32>
    %135 = vector.broadcast %134 : vector<8x1xf32> to vector<8x8xf32>
    %136 = arith.mulf %131, %135 : vector<8x8xf32>
    %c6 = arith.constant 6 : index
    %137 = memref.load %arg5[%c6] : memref<17xf32, #tpu.memory_space<smem>>
    %138 = vector.broadcast %137 : f32 to vector<8x8xf32>
    %139 = arith.mulf %138, %136 : vector<8x8xf32>
    %140 = arith.addf %120, %139 : vector<8x8xf32>
    %141 = vector.extract_strided_slice %121 {offsets = [0, 16], sizes = [8, 16], strides = [1, 1]} : vector<8x64xf32> to vector<8x16xf32>
    %142 = vector.extract_strided_slice %121 {offsets = [0, 48], sizes = [8, 16], strides = [1, 1]} : vector<8x64xf32> to vector<8x16xf32>
    %cst_33 = arith.constant dense<0.000000e+00> : vector<8x8xf32>
    %143 = tpu.matmul %141, %142, %cst_33 {dimension_numbers = #tpu.dot_dimension_numbers<[1], [1], [0], [0], [0, 0, 1, 0], [], []>} : vector<8x16xf32>, vector<8x16xf32>, vector<8x8xf32> -> vector<8x8xf32>
    %cst_34 = arith.constant 2.500000e-01 : f32
    %144 = vector.broadcast %cst_34 : f32 to vector<8x8xf32>
    %145 = arith.mulf %143, %144 : vector<8x8xf32>
    %cst_35 = arith.constant dense<0xFF800000> : vector<8xf32>
    %146 = vector.multi_reduction <maximumf>, %145, %cst_35 [1] : vector<8x8xf32> to vector<8xf32>
    %147 = vector.shape_cast %146 : vector<8xf32> to vector<8x1xf32>
    %148 = vector.broadcast %147 : vector<8x1xf32> to vector<8x8xf32>
    %149 = arith.subf %145, %148 : vector<8x8xf32>
    %150 = math.exp %149 : vector<8x8xf32>
    %cst_36 = arith.constant dense<0.000000e+00> : vector<8xf32>
    %151 = vector.multi_reduction <add>, %150, %cst_36 [1] : vector<8x8xf32> to vector<8xf32>
    %152 = vector.shape_cast %151 : vector<8xf32> to vector<8x1xf32>
    %153 = tpu.reciprocal %152 {approx = true} : vector<8x1xf32> -> vector<8x1xf32>
    %154 = vector.broadcast %153 : vector<8x1xf32> to vector<8x8xf32>
    %155 = arith.mulf %150, %154 : vector<8x8xf32>
    %c7 = arith.constant 7 : index
    %156 = memref.load %arg5[%c7] : memref<17xf32, #tpu.memory_space<smem>>
    %157 = vector.broadcast %156 : f32 to vector<8x8xf32>
    %158 = arith.mulf %157, %155 : vector<8x8xf32>
    %159 = arith.addf %140, %158 : vector<8x8xf32>
    %160 = vector.extract_strided_slice %2 {offsets = [32, 0], sizes = [8, 64], strides = [1, 1]} : vector<64x64xf32> to vector<8x64xf32>
    %161 = vector.extract_strided_slice %160 {offsets = [0, 0], sizes = [8, 16], strides = [1, 1]} : vector<8x64xf32> to vector<8x16xf32>
    %162 = vector.extract_strided_slice %160 {offsets = [0, 32], sizes = [8, 16], strides = [1, 1]} : vector<8x64xf32> to vector<8x16xf32>
    %cst_37 = arith.constant dense<0.000000e+00> : vector<8x8xf32>
    %163 = tpu.matmul %161, %162, %cst_37 {dimension_numbers = #tpu.dot_dimension_numbers<[1], [1], [0], [0], [0, 0, 1, 0], [], []>} : vector<8x16xf32>, vector<8x16xf32>, vector<8x8xf32> -> vector<8x8xf32>
    %cst_38 = arith.constant 2.500000e-01 : f32
    %164 = vector.broadcast %cst_38 : f32 to vector<8x8xf32>
    %165 = arith.mulf %163, %164 : vector<8x8xf32>
    %cst_39 = arith.constant dense<0xFF800000> : vector<8xf32>
    %166 = vector.multi_reduction <maximumf>, %165, %cst_39 [1] : vector<8x8xf32> to vector<8xf32>
    %167 = vector.shape_cast %166 : vector<8xf32> to vector<8x1xf32>
    %168 = vector.broadcast %167 : vector<8x1xf32> to vector<8x8xf32>
    %169 = arith.subf %165, %168 : vector<8x8xf32>
    %170 = math.exp %169 : vector<8x8xf32>
    %cst_40 = arith.constant dense<0.000000e+00> : vector<8xf32>
    %171 = vector.multi_reduction <add>, %170, %cst_40 [1] : vector<8x8xf32> to vector<8xf32>
    %172 = vector.shape_cast %171 : vector<8xf32> to vector<8x1xf32>
    %173 = tpu.reciprocal %172 {approx = true} : vector<8x1xf32> -> vector<8x1xf32>
    %174 = vector.broadcast %173 : vector<8x1xf32> to vector<8x8xf32>
    %175 = arith.mulf %170, %174 : vector<8x8xf32>
    %c8 = arith.constant 8 : index
    %176 = memref.load %arg5[%c8] : memref<17xf32, #tpu.memory_space<smem>>
    %177 = vector.broadcast %176 : f32 to vector<8x8xf32>
    %178 = arith.mulf %177, %175 : vector<8x8xf32>
    %179 = arith.addf %159, %178 : vector<8x8xf32>
    %180 = vector.extract_strided_slice %160 {offsets = [0, 16], sizes = [8, 16], strides = [1, 1]} : vector<8x64xf32> to vector<8x16xf32>
    %181 = vector.extract_strided_slice %160 {offsets = [0, 48], sizes = [8, 16], strides = [1, 1]} : vector<8x64xf32> to vector<8x16xf32>
    %cst_41 = arith.constant dense<0.000000e+00> : vector<8x8xf32>
    %182 = tpu.matmul %180, %181, %cst_41 {dimension_numbers = #tpu.dot_dimension_numbers<[1], [1], [0], [0], [0, 0, 1, 0], [], []>} : vector<8x16xf32>, vector<8x16xf32>, vector<8x8xf32> -> vector<8x8xf32>
    %cst_42 = arith.constant 2.500000e-01 : f32
    %183 = vector.broadcast %cst_42 : f32 to vector<8x8xf32>
    %184 = arith.mulf %182, %183 : vector<8x8xf32>
    %cst_43 = arith.constant dense<0xFF800000> : vector<8xf32>
    %185 = vector.multi_reduction <maximumf>, %184, %cst_43 [1] : vector<8x8xf32> to vector<8xf32>
    %186 = vector.shape_cast %185 : vector<8xf32> to vector<8x1xf32>
    %187 = vector.broadcast %186 : vector<8x1xf32> to vector<8x8xf32>
    %188 = arith.subf %184, %187 : vector<8x8xf32>
    %189 = math.exp %188 : vector<8x8xf32>
    %cst_44 = arith.constant dense<0.000000e+00> : vector<8xf32>
    %190 = vector.multi_reduction <add>, %189, %cst_44 [1] : vector<8x8xf32> to vector<8xf32>
    %191 = vector.shape_cast %190 : vector<8xf32> to vector<8x1xf32>
    %192 = tpu.reciprocal %191 {approx = true} : vector<8x1xf32> -> vector<8x1xf32>
    %193 = vector.broadcast %192 : vector<8x1xf32> to vector<8x8xf32>
    %194 = arith.mulf %189, %193 : vector<8x8xf32>
    %c9 = arith.constant 9 : index
    %195 = memref.load %arg5[%c9] : memref<17xf32, #tpu.memory_space<smem>>
    %196 = vector.broadcast %195 : f32 to vector<8x8xf32>
    %197 = arith.mulf %196, %194 : vector<8x8xf32>
    %198 = arith.addf %179, %197 : vector<8x8xf32>
    %199 = vector.extract_strided_slice %2 {offsets = [40, 0], sizes = [8, 64], strides = [1, 1]} : vector<64x64xf32> to vector<8x64xf32>
    %200 = vector.extract_strided_slice %199 {offsets = [0, 0], sizes = [8, 16], strides = [1, 1]} : vector<8x64xf32> to vector<8x16xf32>
    %201 = vector.extract_strided_slice %199 {offsets = [0, 32], sizes = [8, 16], strides = [1, 1]} : vector<8x64xf32> to vector<8x16xf32>
    %cst_45 = arith.constant dense<0.000000e+00> : vector<8x8xf32>
    %202 = tpu.matmul %200, %201, %cst_45 {dimension_numbers = #tpu.dot_dimension_numbers<[1], [1], [0], [0], [0, 0, 1, 0], [], []>} : vector<8x16xf32>, vector<8x16xf32>, vector<8x8xf32> -> vector<8x8xf32>
    %cst_46 = arith.constant 2.500000e-01 : f32
    %203 = vector.broadcast %cst_46 : f32 to vector<8x8xf32>
    %204 = arith.mulf %202, %203 : vector<8x8xf32>
    %cst_47 = arith.constant dense<0xFF800000> : vector<8xf32>
    %205 = vector.multi_reduction <maximumf>, %204, %cst_47 [1] : vector<8x8xf32> to vector<8xf32>
    %206 = vector.shape_cast %205 : vector<8xf32> to vector<8x1xf32>
    %207 = vector.broadcast %206 : vector<8x1xf32> to vector<8x8xf32>
    %208 = arith.subf %204, %207 : vector<8x8xf32>
    %209 = math.exp %208 : vector<8x8xf32>
    %cst_48 = arith.constant dense<0.000000e+00> : vector<8xf32>
    %210 = vector.multi_reduction <add>, %209, %cst_48 [1] : vector<8x8xf32> to vector<8xf32>
    %211 = vector.shape_cast %210 : vector<8xf32> to vector<8x1xf32>
    %212 = tpu.reciprocal %211 {approx = true} : vector<8x1xf32> -> vector<8x1xf32>
    %213 = vector.broadcast %212 : vector<8x1xf32> to vector<8x8xf32>
    %214 = arith.mulf %209, %213 : vector<8x8xf32>
    %c10 = arith.constant 10 : index
    %215 = memref.load %arg5[%c10] : memref<17xf32, #tpu.memory_space<smem>>
    %216 = vector.broadcast %215 : f32 to vector<8x8xf32>
    %217 = arith.mulf %216, %214 : vector<8x8xf32>
    %218 = arith.addf %198, %217 : vector<8x8xf32>
    %219 = vector.extract_strided_slice %199 {offsets = [0, 16], sizes = [8, 16], strides = [1, 1]} : vector<8x64xf32> to vector<8x16xf32>
    %220 = vector.extract_strided_slice %199 {offsets = [0, 48], sizes = [8, 16], strides = [1, 1]} : vector<8x64xf32> to vector<8x16xf32>
    %cst_49 = arith.constant dense<0.000000e+00> : vector<8x8xf32>
    %221 = tpu.matmul %219, %220, %cst_49 {dimension_numbers = #tpu.dot_dimension_numbers<[1], [1], [0], [0], [0, 0, 1, 0], [], []>} : vector<8x16xf32>, vector<8x16xf32>, vector<8x8xf32> -> vector<8x8xf32>
    %cst_50 = arith.constant 2.500000e-01 : f32
    %222 = vector.broadcast %cst_50 : f32 to vector<8x8xf32>
    %223 = arith.mulf %221, %222 : vector<8x8xf32>
    %cst_51 = arith.constant dense<0xFF800000> : vector<8xf32>
    %224 = vector.multi_reduction <maximumf>, %223, %cst_51 [1] : vector<8x8xf32> to vector<8xf32>
    %225 = vector.shape_cast %224 : vector<8xf32> to vector<8x1xf32>
    %226 = vector.broadcast %225 : vector<8x1xf32> to vector<8x8xf32>
    %227 = arith.subf %223, %226 : vector<8x8xf32>
    %228 = math.exp %227 : vector<8x8xf32>
    %cst_52 = arith.constant dense<0.000000e+00> : vector<8xf32>
    %229 = vector.multi_reduction <add>, %228, %cst_52 [1] : vector<8x8xf32> to vector<8xf32>
    %230 = vector.shape_cast %229 : vector<8xf32> to vector<8x1xf32>
    %231 = tpu.reciprocal %230 {approx = true} : vector<8x1xf32> -> vector<8x1xf32>
    %232 = vector.broadcast %231 : vector<8x1xf32> to vector<8x8xf32>
    %233 = arith.mulf %228, %232 : vector<8x8xf32>
    %c11 = arith.constant 11 : index
    %234 = memref.load %arg5[%c11] : memref<17xf32, #tpu.memory_space<smem>>
    %235 = vector.broadcast %234 : f32 to vector<8x8xf32>
    %236 = arith.mulf %235, %233 : vector<8x8xf32>
    %237 = arith.addf %218, %236 : vector<8x8xf32>
    %238 = vector.extract_strided_slice %2 {offsets = [48, 0], sizes = [8, 64], strides = [1, 1]} : vector<64x64xf32> to vector<8x64xf32>
    %239 = vector.extract_strided_slice %238 {offsets = [0, 0], sizes = [8, 16], strides = [1, 1]} : vector<8x64xf32> to vector<8x16xf32>
    %240 = vector.extract_strided_slice %238 {offsets = [0, 32], sizes = [8, 16], strides = [1, 1]} : vector<8x64xf32> to vector<8x16xf32>
    %cst_53 = arith.constant dense<0.000000e+00> : vector<8x8xf32>
    %241 = tpu.matmul %239, %240, %cst_53 {dimension_numbers = #tpu.dot_dimension_numbers<[1], [1], [0], [0], [0, 0, 1, 0], [], []>} : vector<8x16xf32>, vector<8x16xf32>, vector<8x8xf32> -> vector<8x8xf32>
    %cst_54 = arith.constant 2.500000e-01 : f32
    %242 = vector.broadcast %cst_54 : f32 to vector<8x8xf32>
    %243 = arith.mulf %241, %242 : vector<8x8xf32>
    %cst_55 = arith.constant dense<0xFF800000> : vector<8xf32>
    %244 = vector.multi_reduction <maximumf>, %243, %cst_55 [1] : vector<8x8xf32> to vector<8xf32>
    %245 = vector.shape_cast %244 : vector<8xf32> to vector<8x1xf32>
    %246 = vector.broadcast %245 : vector<8x1xf32> to vector<8x8xf32>
    %247 = arith.subf %243, %246 : vector<8x8xf32>
    %248 = math.exp %247 : vector<8x8xf32>
    %cst_56 = arith.constant dense<0.000000e+00> : vector<8xf32>
    %249 = vector.multi_reduction <add>, %248, %cst_56 [1] : vector<8x8xf32> to vector<8xf32>
    %250 = vector.shape_cast %249 : vector<8xf32> to vector<8x1xf32>
    %251 = tpu.reciprocal %250 {approx = true} : vector<8x1xf32> -> vector<8x1xf32>
    %252 = vector.broadcast %251 : vector<8x1xf32> to vector<8x8xf32>
    %253 = arith.mulf %248, %252 : vector<8x8xf32>
    %c12 = arith.constant 12 : index
    %254 = memref.load %arg5[%c12] : memref<17xf32, #tpu.memory_space<smem>>
    %255 = vector.broadcast %254 : f32 to vector<8x8xf32>
    %256 = arith.mulf %255, %253 : vector<8x8xf32>
    %257 = arith.addf %237, %256 : vector<8x8xf32>
    %258 = vector.extract_strided_slice %238 {offsets = [0, 16], sizes = [8, 16], strides = [1, 1]} : vector<8x64xf32> to vector<8x16xf32>
    %259 = vector.extract_strided_slice %238 {offsets = [0, 48], sizes = [8, 16], strides = [1, 1]} : vector<8x64xf32> to vector<8x16xf32>
    %cst_57 = arith.constant dense<0.000000e+00> : vector<8x8xf32>
    %260 = tpu.matmul %258, %259, %cst_57 {dimension_numbers = #tpu.dot_dimension_numbers<[1], [1], [0], [0], [0, 0, 1, 0], [], []>} : vector<8x16xf32>, vector<8x16xf32>, vector<8x8xf32> -> vector<8x8xf32>
    %cst_58 = arith.constant 2.500000e-01 : f32
    %261 = vector.broadcast %cst_58 : f32 to vector<8x8xf32>
    %262 = arith.mulf %260, %261 : vector<8x8xf32>
    %cst_59 = arith.constant dense<0xFF800000> : vector<8xf32>
    %263 = vector.multi_reduction <maximumf>, %262, %cst_59 [1] : vector<8x8xf32> to vector<8xf32>
    %264 = vector.shape_cast %263 : vector<8xf32> to vector<8x1xf32>
    %265 = vector.broadcast %264 : vector<8x1xf32> to vector<8x8xf32>
    %266 = arith.subf %262, %265 : vector<8x8xf32>
    %267 = math.exp %266 : vector<8x8xf32>
    %cst_60 = arith.constant dense<0.000000e+00> : vector<8xf32>
    %268 = vector.multi_reduction <add>, %267, %cst_60 [1] : vector<8x8xf32> to vector<8xf32>
    %269 = vector.shape_cast %268 : vector<8xf32> to vector<8x1xf32>
    %270 = tpu.reciprocal %269 {approx = true} : vector<8x1xf32> -> vector<8x1xf32>
    %271 = vector.broadcast %270 : vector<8x1xf32> to vector<8x8xf32>
    %272 = arith.mulf %267, %271 : vector<8x8xf32>
    %c13 = arith.constant 13 : index
    %273 = memref.load %arg5[%c13] : memref<17xf32, #tpu.memory_space<smem>>
    %274 = vector.broadcast %273 : f32 to vector<8x8xf32>
    %275 = arith.mulf %274, %272 : vector<8x8xf32>
    %276 = arith.addf %257, %275 : vector<8x8xf32>
    %277 = vector.extract_strided_slice %2 {offsets = [56, 0], sizes = [8, 64], strides = [1, 1]} : vector<64x64xf32> to vector<8x64xf32>
    %278 = vector.extract_strided_slice %277 {offsets = [0, 0], sizes = [8, 16], strides = [1, 1]} : vector<8x64xf32> to vector<8x16xf32>
    %279 = vector.extract_strided_slice %277 {offsets = [0, 32], sizes = [8, 16], strides = [1, 1]} : vector<8x64xf32> to vector<8x16xf32>
    %cst_61 = arith.constant dense<0.000000e+00> : vector<8x8xf32>
    %280 = tpu.matmul %278, %279, %cst_61 {dimension_numbers = #tpu.dot_dimension_numbers<[1], [1], [0], [0], [0, 0, 1, 0], [], []>} : vector<8x16xf32>, vector<8x16xf32>, vector<8x8xf32> -> vector<8x8xf32>
    %cst_62 = arith.constant 2.500000e-01 : f32
    %281 = vector.broadcast %cst_62 : f32 to vector<8x8xf32>
    %282 = arith.mulf %280, %281 : vector<8x8xf32>
    %cst_63 = arith.constant dense<0xFF800000> : vector<8xf32>
    %283 = vector.multi_reduction <maximumf>, %282, %cst_63 [1] : vector<8x8xf32> to vector<8xf32>
    %284 = vector.shape_cast %283 : vector<8xf32> to vector<8x1xf32>
    %285 = vector.broadcast %284 : vector<8x1xf32> to vector<8x8xf32>
    %286 = arith.subf %282, %285 : vector<8x8xf32>
    %287 = math.exp %286 : vector<8x8xf32>
    %cst_64 = arith.constant dense<0.000000e+00> : vector<8xf32>
    %288 = vector.multi_reduction <add>, %287, %cst_64 [1] : vector<8x8xf32> to vector<8xf32>
    %289 = vector.shape_cast %288 : vector<8xf32> to vector<8x1xf32>
    %290 = tpu.reciprocal %289 {approx = true} : vector<8x1xf32> -> vector<8x1xf32>
    %291 = vector.broadcast %290 : vector<8x1xf32> to vector<8x8xf32>
    %292 = arith.mulf %287, %291 : vector<8x8xf32>
    %c14 = arith.constant 14 : index
    %293 = memref.load %arg5[%c14] : memref<17xf32, #tpu.memory_space<smem>>
    %294 = vector.broadcast %293 : f32 to vector<8x8xf32>
    %295 = arith.mulf %294, %292 : vector<8x8xf32>
    %296 = arith.addf %276, %295 : vector<8x8xf32>
    %297 = vector.extract_strided_slice %277 {offsets = [0, 16], sizes = [8, 16], strides = [1, 1]} : vector<8x64xf32> to vector<8x16xf32>
    %298 = vector.extract_strided_slice %277 {offsets = [0, 48], sizes = [8, 16], strides = [1, 1]} : vector<8x64xf32> to vector<8x16xf32>
    %cst_65 = arith.constant dense<0.000000e+00> : vector<8x8xf32>
    %299 = tpu.matmul %297, %298, %cst_65 {dimension_numbers = #tpu.dot_dimension_numbers<[1], [1], [0], [0], [0, 0, 1, 0], [], []>} : vector<8x16xf32>, vector<8x16xf32>, vector<8x8xf32> -> vector<8x8xf32>
    %cst_66 = arith.constant 2.500000e-01 : f32
    %300 = vector.broadcast %cst_66 : f32 to vector<8x8xf32>
    %301 = arith.mulf %299, %300 : vector<8x8xf32>
    %cst_67 = arith.constant dense<0xFF800000> : vector<8xf32>
    %302 = vector.multi_reduction <maximumf>, %301, %cst_67 [1] : vector<8x8xf32> to vector<8xf32>
    %303 = vector.shape_cast %302 : vector<8xf32> to vector<8x1xf32>
    %304 = vector.broadcast %303 : vector<8x1xf32> to vector<8x8xf32>
    %305 = arith.subf %301, %304 : vector<8x8xf32>
    %306 = math.exp %305 : vector<8x8xf32>
    %cst_68 = arith.constant dense<0.000000e+00> : vector<8xf32>
    %307 = vector.multi_reduction <add>, %306, %cst_68 [1] : vector<8x8xf32> to vector<8xf32>
    %308 = vector.shape_cast %307 : vector<8xf32> to vector<8x1xf32>
    %309 = tpu.reciprocal %308 {approx = true} : vector<8x1xf32> -> vector<8x1xf32>
    %310 = vector.broadcast %309 : vector<8x1xf32> to vector<8x8xf32>
    %311 = arith.mulf %306, %310 : vector<8x8xf32>
    %c15 = arith.constant 15 : index
    %312 = memref.load %arg5[%c15] : memref<17xf32, #tpu.memory_space<smem>>
    %313 = vector.broadcast %312 : f32 to vector<8x8xf32>
    %314 = arith.mulf %313, %311 : vector<8x8xf32>
    %315 = arith.addf %296, %314 : vector<8x8xf32>
    %c16 = arith.constant 16 : index
    %316 = memref.load %arg5[%c16] : memref<17xf32, #tpu.memory_space<smem>>
    %317 = vector.broadcast %316 : f32 to vector<8x8xf32>
    %318 = arith.addf %315, %317 : vector<8x8xf32>
    %c0_69 = arith.constant 0 : index
    %c0_70 = arith.constant 0 : index
    %319 = vector.load %arg3[%c0_69, %c0_70] : memref<8x8xf32, #tpu.memory_space<vmem>>, vector<8x8xf32>
    %320 = arith.mulf %319, %318 : vector<8x8xf32>
    %c0_71 = arith.constant 0 : index
    %c0_72 = arith.constant 0 : index
    %321 = vector.load %arg4[%c0_71, %c0_72] : memref<8x8xf32, #tpu.memory_space<vmem>>, vector<8x8xf32>
    %cst_73 = arith.constant dense<0.000000e+00> : vector<8x8xf32>
    %322 = tpu.matmul %318, %321, %cst_73 {dimension_numbers = #tpu.dot_dimension_numbers<[1], [0], [0], [1], [0, 0, 1, 1], [], []>} : vector<8x8xf32>, vector<8x8xf32>, vector<8x8xf32> -> vector<8x8xf32>
    %323 = arith.addf %320, %322 : vector<8x8xf32>
    %324 = tpu.iota {dimensions = array<i32: 0>} : vector<8x8xi32>
    %325 = tpu.iota {dimensions = array<i32: 1>} : vector<8x8xi32>
    %326 = arith.cmpi eq, %324, %325 : vector<8x8xi32>
    %cst_74 = arith.constant 0.000000e+00 : f32
    %327 = vector.broadcast %cst_74 : f32 to vector<8x8xf32>
    %328 = arith.select %326, %327, %323 : vector<8x8xi1>, vector<8x8xf32>
    %cst_75 = arith.constant dense<0xFF800000> : vector<8xf32>
    %329 = vector.multi_reduction <maximumf>, %328, %cst_75 [1] : vector<8x8xf32> to vector<8xf32>
    %330 = vector.shape_cast %329 : vector<8xf32> to vector<8x1xf32>
    %331 = vector.broadcast %330 : vector<8x1xf32> to vector<8x8xf32>
    %332 = arith.subf %328, %331 : vector<8x8xf32>
    %333 = math.exp %332 : vector<8x8xf32>
    %cst_76 = arith.constant dense<0.000000e+00> : vector<8xf32>
    %334 = vector.multi_reduction <add>, %333, %cst_76 [1] : vector<8x8xf32> to vector<8xf32>
    %335 = vector.shape_cast %334 : vector<8xf32> to vector<8x1xf32>
    %336 = tpu.reciprocal %335 {approx = true} : vector<8x1xf32> -> vector<8x1xf32>
    %337 = vector.broadcast %336 : vector<8x1xf32> to vector<8x8xf32>
    %338 = arith.mulf %333, %337 : vector<8x8xf32>
    %cst_77 = arith.constant 1.000000e+00 : f32
    %339 = vector.broadcast %cst_77 : f32 to vector<8x8xf32>
    %340 = arith.select %326, %339, %338 : vector<8x8xi1>, vector<8x8xf32>
    %cst_78 = arith.constant dense<0.000000e+00> : vector<8xf32>
    %341 = vector.multi_reduction <add>, %340, %cst_78 [1] : vector<8x8xf32> to vector<8xf32>
    %342 = vector.shape_cast %341 : vector<8xf32> to vector<8x1xf32>
    %343 = tpu.reciprocal %342 {approx = true} : vector<8x1xf32> -> vector<8x1xf32>
    %344 = vector.broadcast %343 : vector<8x1xf32> to vector<8x8xf32>
    %345 = arith.mulf %340, %344 : vector<8x8xf32>
    %c0_79 = arith.constant 0 : index
    %c0_80 = arith.constant 0 : index
    %346 = vector.load %arg6[%c0_79, %c0_80] : memref<8x8xf32, #tpu.memory_space<vmem>>, vector<8x8xf32>
    tpu.vector_store %arg6[%c0_79, %c0_80], %345 {strides = array<i32>} : memref<8x8xf32, #tpu.memory_space<vmem>>, vector<8x8xf32>,
    return
  }
  func.func @transform_0(%arg0: i32) -> (i32, i32) {
    %c0_i32 = arith.constant 0 : i32
    %c0_i32_0 = arith.constant 0 : i32
    %c0_i32_1 = arith.constant 0 : i32
    return %c0_i32, %c0_i32_0 : i32, i32
  }
  func.func @transform_1(%arg0: i32) -> (i32, i32) {
    %c0_i32 = arith.constant 0 : i32
    %c0_i32_0 = arith.constant 0 : i32
    %c0_i32_1 = arith.constant 0 : i32
    return %c0_i32, %c0_i32_0 : i32, i32
  }
  func.func @transform_2(%arg0: i32) -> (i32, i32) {
    %c0_i32 = arith.constant 0 : i32
    %c0_i32_0 = arith.constant 0 : i32
    %c0_i32_1 = arith.constant 0 : i32
    return %c0_i32, %c0_i32_0 : i32, i32
  }
  func.func @transform_3(%arg0: i32) -> (i32, i32) {
    %c0_i32 = arith.constant 0 : i32
    %c0_i32_0 = arith.constant 0 : i32
    %c0_i32_1 = arith.constant 0 : i32
    return %c0_i32, %c0_i32_0 : i32, i32
  }
  func.func @transform_4(%arg0: i32) -> i32 {
    %c0_i32 = arith.constant 0 : i32
    %c0_i32_0 = arith.constant 0 : i32
    return %c0_i32 : i32
  }
  func.func @transform_5(%arg0: i32) -> (i32, i32) {
    %c0_i32 = arith.constant 0 : i32
    %c0_i32_0 = arith.constant 0 : i32
    %c0_i32_1 = arith.constant 0 : i32
    return %c0_i32, %c0_i32_0 : i32, i32
  }
}

module attributes {stable_mosaic.version = 11 : i64} {
  func.func @kernel(%arg0: i32, %arg1: memref<64x3xf32, #tpu.memory_space<vmem>>, %arg2: memref<64x8xf32, #tpu.memory_space<vmem>>, %arg3: memref<64x8xf32, #tpu.memory_space<vmem>>, %arg4: memref<8x8xf32, #tpu.memory_space<vmem>>, %arg5: memref<8x8xf32, #tpu.memory_space<vmem>>, %arg6: memref<8x8xf32, #tpu.memory_space<vmem>>, %arg7: memref<32x32xf32, #tpu.memory_space<vmem>>, %arg8: memref<1x32xf32, #tpu.memory_space<vmem>>, %arg9: memref<32x1xf32, #tpu.memory_space<vmem>>, %arg10: memref<1x1xf32, #tpu.memory_space<vmem>>, %arg11: memref<1x70x64xf32, #tpu.memory_space<vmem>>, %arg12: memref<1x1x64xf32, #tpu.memory_space<vmem>>, %arg13: memref<1x70x32xf32, #tpu.memory_space<vmem>>, %arg14: memref<1x1x32xf32, #tpu.memory_space<vmem>>, %arg15: memref<1x32x4xf32, #tpu.memory_space<vmem>>, %arg16: memref<1x1x4xf32, #tpu.memory_space<vmem>>, %arg17: memref<1x16x4xf32, #tpu.memory_space<vmem>>, %arg18: memref<64x3xf32, #tpu.memory_space<vmem>>) attributes {dimension_semantics = [#tpu.dimension_semantics<parallel>], iteration_bounds = array<i64: 2>, scalar_prefetch = 0 : i64, scratch_operands = 1 : i64, tpu.core_type = #tpu.core_type<tc>, window_params = [{pipeline_mode = #tpu.pipeline_mode<synchronous>, transform_indices = @transform_0, window_bounds = array<i64: 64, 3>}, {pipeline_mode = #tpu.pipeline_mode<synchronous>, transform_indices = @transform_1, window_bounds = array<i64: 64, 8>}, {pipeline_mode = #tpu.pipeline_mode<synchronous>, transform_indices = @transform_2, window_bounds = array<i64: 64, 8>}, {pipeline_mode = #tpu.pipeline_mode<synchronous>, transform_indices = @transform_3, window_bounds = array<i64: 8, 8>}, {pipeline_mode = #tpu.pipeline_mode<synchronous>, transform_indices = @transform_4, window_bounds = array<i64: 8, 8>}, {pipeline_mode = #tpu.pipeline_mode<synchronous>, transform_indices = @transform_5, window_bounds = array<i64: 8, 8>}, {pipeline_mode = #tpu.pipeline_mode<synchronous>, transform_indices = @transform_6, window_bounds = array<i64: 32, 32>}, {pipeline_mode = #tpu.pipeline_mode<synchronous>, transform_indices = @transform_7, window_bounds = array<i64: 1, 32>}, {pipeline_mode = #tpu.pipeline_mode<synchronous>, transform_indices = @transform_8, window_bounds = array<i64: 32, 1>}, {pipeline_mode = #tpu.pipeline_mode<synchronous>, transform_indices = @transform_9, window_bounds = array<i64: 1, 1>}, {transform_indices = @transform_10, window_bounds = array<i64: 1, 70, 64>}, {transform_indices = @transform_11, window_bounds = array<i64: 1, 1, 64>}, {transform_indices = @transform_12, window_bounds = array<i64: 1, 70, 32>}, {transform_indices = @transform_13, window_bounds = array<i64: 1, 1, 32>}, {transform_indices = @transform_14, window_bounds = array<i64: 1, 32, 4>}, {transform_indices = @transform_15, window_bounds = array<i64: 1, 1, 4>}, {transform_indices = @transform_16, window_bounds = array<i64: 1, 16, 4>}]} {
    %c0 = arith.constant 0 : index
    %c0_0 = arith.constant 0 : index
    %0 = vector.load %arg6[%c0, %c0_0] : memref<8x8xf32, #tpu.memory_space<vmem>>, vector<8x8xf32>
    %c0_i32 = arith.constant 0 : i32
    %1 = arith.cmpi eq, %arg0, %c0_i32 : i32
    %c0_1 = arith.constant 0 : index
    %c0_2 = arith.constant 0 : index
    %2 = vector.load %arg4[%c0_1, %c0_2] : memref<8x8xf32, #tpu.memory_space<vmem>>, vector<8x8xf32>
    %cst = arith.constant dense<0.000000e+00> : vector<8x8xf32>
    %3 = tpu.matmul %2, %2, %cst {dimension_numbers = #tpu.dot_dimension_numbers<[1], [1], [0], [0], [0, 0, 1, 0], [], []>} : vector<8x8xf32>, vector<8x8xf32>, vector<8x8xf32> -> vector<8x8xf32>
    %cst_3 = arith.constant 0.000000e+00 : f32
    %4 = vector.broadcast %cst_3 : f32 to vector<8x8xf32>
    %5 = arith.maximumf %3, %4 : vector<8x8xf32>
    %cst_4 = arith.constant dense<0xFF800000> : vector<8xf32>
    %6 = vector.multi_reduction <maximumf>, %5, %cst_4 [1] : vector<8x8xf32> to vector<8xf32>
    %7 = vector.shape_cast %6 : vector<8xf32> to vector<8x1xf32>
    %8 = vector.broadcast %7 : vector<8x1xf32> to vector<8x8xf32>
    %9 = arith.subf %5, %8 : vector<8x8xf32>
    %10 = math.exp %9 : vector<8x8xf32>
    %cst_5 = arith.constant dense<0.000000e+00> : vector<8xf32>
    %11 = vector.multi_reduction <add>, %10, %cst_5 [1] : vector<8x8xf32> to vector<8xf32>
    %12 = vector.shape_cast %11 : vector<8xf32> to vector<8x1xf32>
    %13 = tpu.reciprocal %12 {approx = true} : vector<8x1xf32> -> vector<8x1xf32>
    %14 = vector.broadcast %13 : vector<8x1xf32> to vector<8x8xf32>
    %15 = arith.mulf %10, %14 : vector<8x8xf32>
    %cst_6 = arith.constant 5.000000e-01 : f32
    %16 = vector.broadcast %cst_6 : f32 to vector<8x8xf32>
    %17 = arith.mulf %16, %15 : vector<8x8xf32>
    %c0_7 = arith.constant 0 : index
    %c0_8 = arith.constant 0 : index
    %18 = vector.load %arg5[%c0_7, %c0_8] : memref<8x8xf32, #tpu.memory_space<vmem>>, vector<8x8xf32>
    %cst_9 = arith.constant dense<0.000000e+00> : vector<8x8xf32>
    %19 = tpu.matmul %18, %18, %cst_9 {dimension_numbers = #tpu.dot_dimension_numbers<[1], [1], [0], [0], [0, 0, 1, 0], [], []>} : vector<8x8xf32>, vector<8x8xf32>, vector<8x8xf32> -> vector<8x8xf32>
    %cst_10 = arith.constant 0.000000e+00 : f32
    %20 = vector.broadcast %cst_10 : f32 to vector<8x8xf32>
    %21 = arith.maximumf %19, %20 : vector<8x8xf32>
    %cst_11 = arith.constant dense<0xFF800000> : vector<8xf32>
    %22 = vector.multi_reduction <maximumf>, %21, %cst_11 [1] : vector<8x8xf32> to vector<8xf32>
    %23 = vector.shape_cast %22 : vector<8xf32> to vector<8x1xf32>
    %24 = vector.broadcast %23 : vector<8x1xf32> to vector<8x8xf32>
    %25 = arith.subf %21, %24 : vector<8x8xf32>
    %26 = math.exp %25 : vector<8x8xf32>
    %cst_12 = arith.constant dense<0.000000e+00> : vector<8xf32>
    %27 = vector.multi_reduction <add>, %26, %cst_12 [1] : vector<8x8xf32> to vector<8xf32>
    %28 = vector.shape_cast %27 : vector<8xf32> to vector<8x1xf32>
    %29 = tpu.reciprocal %28 {approx = true} : vector<8x1xf32> -> vector<8x1xf32>
    %30 = vector.broadcast %29 : vector<8x1xf32> to vector<8x8xf32>
    %31 = arith.mulf %26, %30 : vector<8x8xf32>
    %cst_13 = arith.constant 5.000000e-01 : f32
    %32 = vector.broadcast %cst_13 : f32 to vector<8x8xf32>
    %33 = arith.mulf %32, %31 : vector<8x8xf32>
    %34 = arith.select %1, %17, %33 : vector<8x8xf32>
    %35 = arith.addf %0, %34 : vector<8x8xf32>
    %c0_14 = arith.constant 0 : index
    %c0_15 = arith.constant 0 : index
    %36 = vector.load %arg7[%c0_14, %c0_15] : memref<32x32xf32, #tpu.memory_space<vmem>>, vector<32x32xf32>
    %c0_16 = arith.constant 0 : index
    %c0_17 = arith.constant 0 : index
    %37 = vector.load %arg4[%c0_16, %c0_17] : memref<8x8xf32, #tpu.memory_space<vmem>>, vector<8x8xf32>
    %38 = vector.extract_strided_slice %36 {offsets = [16, 0], sizes = [8, 32], strides = [1, 1]} : vector<32x32xf32> to vector<8x32xf32>
    %cst_18 = arith.constant dense<0.000000e+00> : vector<8x32xf32>
    %39 = tpu.matmul %37, %38, %cst_18 {dimension_numbers = #tpu.dot_dimension_numbers<[1], [0], [0], [1], [0, 0, 1, 1], [], []>} : vector<8x8xf32>, vector<8x32xf32>, vector<8x32xf32> -> vector<8x32xf32>
    %c0_19 = arith.constant 0 : index
    %c0_20 = arith.constant 0 : index
    %40 = vector.load %arg5[%c0_19, %c0_20] : memref<8x8xf32, #tpu.memory_space<vmem>>, vector<8x8xf32>
    %41 = vector.extract_strided_slice %36 {offsets = [24, 0], sizes = [8, 32], strides = [1, 1]} : vector<32x32xf32> to vector<8x32xf32>
    %cst_21 = arith.constant dense<0.000000e+00> : vector<8x32xf32>
    %42 = tpu.matmul %40, %41, %cst_21 {dimension_numbers = #tpu.dot_dimension_numbers<[1], [0], [0], [1], [0, 0, 1, 1], [], []>} : vector<8x8xf32>, vector<8x32xf32>, vector<8x32xf32> -> vector<8x32xf32>
    %43 = arith.addf %39, %42 : vector<8x32xf32>
    %44 = tpu.concatenate %43, %43, %43, %43, %43, %43, %43, %43 in 0 : vector<8x32xf32>, vector<8x32xf32>, vector<8x32xf32>, vector<8x32xf32>, vector<8x32xf32>, vector<8x32xf32>, vector<8x32xf32>, vector<8x32xf32> -> vector<64x32xf32>
    %c0_22 = arith.constant 0 : index
    %c0_23 = arith.constant 0 : index
    %45 = vector.load %arg2[%c0_22, %c0_23] : memref<64x8xf32, #tpu.memory_space<vmem>>, vector<64x8xf32>
    %46 = vector.extract_strided_slice %36 {offsets = [0, 0], sizes = [8, 32], strides = [1, 1]} : vector<32x32xf32> to vector<8x32xf32>
    %cst_24 = arith.constant dense<0.000000e+00> : vector<64x32xf32>
    %47 = tpu.matmul %45, %46, %cst_24 {dimension_numbers = #tpu.dot_dimension_numbers<[1], [0], [0], [1], [0, 0, 1, 1], [], []>} : vector<64x8xf32>, vector<8x32xf32>, vector<64x32xf32> -> vector<64x32xf32>
    %c0_25 = arith.constant 0 : index
    %c0_26 = arith.constant 0 : index
    %48 = vector.load %arg3[%c0_25, %c0_26] : memref<64x8xf32, #tpu.memory_space<vmem>>, vector<64x8xf32>
    %49 = vector.extract_strided_slice %36 {offsets = [8, 0], sizes = [8, 32], strides = [1, 1]} : vector<32x32xf32> to vector<8x32xf32>
    %cst_27 = arith.constant dense<0.000000e+00> : vector<64x32xf32>
    %50 = tpu.matmul %48, %49, %cst_27 {dimension_numbers = #tpu.dot_dimension_numbers<[1], [0], [0], [1], [0, 0, 1, 1], [], []>} : vector<64x8xf32>, vector<8x32xf32>, vector<64x32xf32> -> vector<64x32xf32>
    %51 = arith.addf %47, %50 : vector<64x32xf32>
    %52 = arith.addf %51, %44 : vector<64x32xf32>
    %c0_28 = arith.constant 0 : index
    %c0_29 = arith.constant 0 : index
    %53 = vector.load %arg8[%c0_28, %c0_29] : memref<1x32xf32, #tpu.memory_space<vmem>>, vector<1x32xf32>
    %54 = vector.broadcast %53 : vector<1x32xf32> to vector<64x32xf32>
    %55 = arith.addf %52, %54 : vector<64x32xf32>
    %cst_30 = arith.constant 0.000000e+00 : f32
    %56 = vector.broadcast %cst_30 : f32 to vector<64x32xf32>
    %57 = arith.maximumf %55, %56 : vector<64x32xf32>
    %c0_31 = arith.constant 0 : index
    %c0_32 = arith.constant 0 : index
    %58 = vector.load %arg9[%c0_31, %c0_32] : memref<32x1xf32, #tpu.memory_space<vmem>>, vector<32x1xf32>
    %cst_33 = arith.constant dense<0.000000e+00> : vector<64x1xf32>
    %59 = tpu.matmul %57, %58, %cst_33 {dimension_numbers = #tpu.dot_dimension_numbers<[1], [0], [0], [1], [0, 0, 1, 1], [], []>} : vector<64x32xf32>, vector<32x1xf32>, vector<64x1xf32> -> vector<64x1xf32>
    %c0_34 = arith.constant 0 : index
    %c0_35 = arith.constant 0 : index
    %60 = vector.load %arg10[%c0_34, %c0_35] : memref<1x1xf32, #tpu.memory_space<vmem>>, vector<1x1xf32>
    %61 = vector.broadcast %60 : vector<1x1xf32> to vector<64x1xf32>
    %62 = arith.addf %59, %61 : vector<64x1xf32>
    %cst_36 = arith.constant 0.000000e+00 : f32
    %63 = vector.broadcast %cst_36 : f32 to vector<64x1xf32>
    %64 = arith.subf %63, %62 : vector<64x1xf32>
    %65 = math.exp %64 : vector<64x1xf32>
    %cst_37 = arith.constant 1.000000e+00 : f32
    %66 = vector.broadcast %cst_37 : f32 to vector<64x1xf32>
    %67 = arith.addf %66, %65 : vector<64x1xf32>
    %68 = tpu.reciprocal %67 {approx = true} : vector<64x1xf32> -> vector<64x1xf32>
    %c0_38 = arith.constant 0 : index
    %c0_39 = arith.constant 0 : index
    %69 = vector.load %arg1[%c0_38, %c0_39] : memref<64x3xf32, #tpu.memory_space<vmem>>, vector<64x3xf32>
    %70 = vector.extract_strided_slice %69 {offsets = [0, 0], sizes = [64, 1], strides = [1, 1]} : vector<64x3xf32> to vector<64x1xf32>
    %71 = arith.mulf %68, %70 : vector<64x1xf32>
    %c0_i32_40 = arith.constant 0 : i32
    %72 = arith.cmpi eq, %arg0, %c0_i32_40 : i32
    %73 = arith.subf %70, %71 : vector<64x1xf32>
    %74 = arith.select %72, %71, %73 : vector<64x1xf32>
    %75 = vector.extract_strided_slice %69 {offsets = [0, 1], sizes = [64, 2], strides = [1, 1]} : vector<64x3xf32> to vector<64x2xf32>
    %76 = tpu.concatenate %74, %75 in 1 : vector<64x1xf32>, vector<64x2xf32> -> vector<64x3xf32>
    %c0_41 = arith.constant 0 : index
    %c0_42 = arith.constant 0 : index
    %77 = vector.load %arg18[%c0_41, %c0_42] : memref<64x3xf32, #tpu.memory_space<vmem>>, vector<64x3xf32>
    tpu.vector_store %arg18[%c0_41, %c0_42], %76 {strides = array<i32>} : memref<64x3xf32, #tpu.memory_space<vmem>>, vector<64x3xf32>,
    %c0_43 = arith.constant 0 : index
    %c0_44 = arith.constant 0 : index
    %c0_45 = arith.constant 0 : index
    %78 = vector.load %arg11[%c0_43, %c0_44, %c0_45] : memref<1x70x64xf32, #tpu.memory_space<vmem>>, vector<1x70x64xf32>
    %79 = vector.shape_cast %78 : vector<1x70x64xf32> to vector<70x64xf32>
    %c0_46 = arith.constant 0 : index
    %c0_47 = arith.constant 0 : index
    %c0_48 = arith.constant 0 : index
    %80 = vector.load %arg12[%c0_46, %c0_47, %c0_48] : memref<1x1x64xf32, #tpu.memory_space<vmem>>, vector<1x1x64xf32>
    %81 = vector.shape_cast %80 : vector<1x1x64xf32> to vector<1x64xf32>
    %c0_49 = arith.constant 0 : index
    %c0_50 = arith.constant 0 : index
    %c0_51 = arith.constant 0 : index
    %82 = vector.load %arg13[%c0_49, %c0_50, %c0_51] : memref<1x70x32xf32, #tpu.memory_space<vmem>>, vector<1x70x32xf32>
    %83 = vector.shape_cast %82 : vector<1x70x32xf32> to vector<70x32xf32>
    %c0_52 = arith.constant 0 : index
    %c0_53 = arith.constant 0 : index
    %c0_54 = arith.constant 0 : index
    %84 = vector.load %arg14[%c0_52, %c0_53, %c0_54] : memref<1x1x32xf32, #tpu.memory_space<vmem>>, vector<1x1x32xf32>
    %85 = vector.shape_cast %84 : vector<1x1x32xf32> to vector<1x32xf32>
    %cst_55 = arith.constant 0.000000e+00 : f32
    %86 = vector.broadcast %cst_55 : f32 to vector<16x32xf32>
    %c0_i32_56 = arith.constant 0 : i32
    %c8_i32 = arith.constant 8 : i32
    %87 = arith.muli %c0_i32_56, %c8_i32 : i32
    %c0_i32_57 = arith.constant 0 : i32
    %88 = arith.addi %c0_i32_57, %87 : i32
    %89 = tpu.assume_multiple %88, 8 : i32
    %90 = arith.index_cast %89 : i32 to index
    %c0_58 = arith.constant 0 : index
    %91 = vector.load %arg18[%90, %c0_58] : memref<64x3xf32, #tpu.memory_space<vmem>>, vector<8x3xf32>
    %c8_i32_59 = arith.constant 8 : i32
    %92 = arith.muli %c0_i32_56, %c8_i32_59 : i32
    %c32_i32 = arith.constant 32 : i32
    %93 = arith.addi %c32_i32, %92 : i32
    %94 = tpu.assume_multiple %93, 8 : i32
    %95 = arith.index_cast %94 : i32 to index
    %c0_60 = arith.constant 0 : index
    %96 = vector.load %arg18[%95, %c0_60] : memref<64x3xf32, #tpu.memory_space<vmem>>, vector<8x3xf32>
    %97 = tpu.concatenate %91, %96 in 0 : vector<8x3xf32>, vector<8x3xf32> -> vector<16x3xf32>
    %98 = tpu.concatenate %97, %86 in 1 : vector<16x3xf32>, vector<16x32xf32> -> vector<16x35xf32>
    %99 = vector.extract_strided_slice %98 {offsets = [0, 0], sizes = [8, 35], strides = [1, 1]} : vector<16x35xf32> to vector<8x35xf32>
    %cst_61 = arith.constant dense<0.000000e+00> : vector<8x35xf32>
    %100 = tpu.matmul %35, %99, %cst_61 {dimension_numbers = #tpu.dot_dimension_numbers<[1], [0], [0], [1], [0, 0, 1, 1], [], []>} : vector<8x8xf32>, vector<8x35xf32>, vector<8x35xf32> -> vector<8x35xf32>
    %101 = vector.extract_strided_slice %98 {offsets = [8, 0], sizes = [8, 35], strides = [1, 1]} : vector<16x35xf32> to vector<8x35xf32>
    %cst_62 = arith.constant dense<0.000000e+00> : vector<8x35xf32>
    %102 = tpu.matmul %35, %101, %cst_62 {dimension_numbers = #tpu.dot_dimension_numbers<[1], [0], [0], [1], [0, 0, 1, 1], [], []>} : vector<8x8xf32>, vector<8x35xf32>, vector<8x35xf32> -> vector<8x35xf32>
    %103 = tpu.concatenate %100, %102 in 0 : vector<8x35xf32>, vector<8x35xf32> -> vector<16x35xf32>
    %104 = tpu.concatenate %98, %103 in 1 : vector<16x35xf32>, vector<16x35xf32> -> vector<16x70xf32>
    %cst_63 = arith.constant dense<0.000000e+00> : vector<16x64xf32>
    %105 = tpu.matmul %104, %79, %cst_63 {dimension_numbers = #tpu.dot_dimension_numbers<[1], [0], [0], [1], [0, 0, 1, 1], [], []>} : vector<16x70xf32>, vector<70x64xf32>, vector<16x64xf32> -> vector<16x64xf32>
    %106 = vector.broadcast %81 : vector<1x64xf32> to vector<16x64xf32>
    %107 = arith.addf %105, %106 : vector<16x64xf32>
    %cst_64 = arith.constant 0.000000e+00 : f32
    %108 = vector.broadcast %cst_64 : f32 to vector<16x64xf32>
    %109 = arith.subf %108, %107 : vector<16x64xf32>
    %110 = math.exp %109 : vector<16x64xf32>
    %cst_65 = arith.constant 1.000000e+00 : f32
    %111 = vector.broadcast %cst_65 : f32 to vector<16x64xf32>
    %112 = arith.addf %111, %110 : vector<16x64xf32>
    %113 = tpu.reciprocal %112 {approx = true} : vector<16x64xf32> -> vector<16x64xf32>
    %114 = vector.extract_strided_slice %113 {offsets = [0, 0], sizes = [16, 32], strides = [1, 1]} : vector<16x64xf32> to vector<16x32xf32>
    %115 = vector.extract_strided_slice %113 {offsets = [0, 32], sizes = [16, 32], strides = [1, 1]} : vector<16x64xf32> to vector<16x32xf32>
    %116 = arith.mulf %115, %86 : vector<16x32xf32>
    %117 = vector.extract_strided_slice %116 {offsets = [0, 0], sizes = [8, 32], strides = [1, 1]} : vector<16x32xf32> to vector<8x32xf32>
    %cst_66 = arith.constant dense<0.000000e+00> : vector<8x32xf32>
    %118 = tpu.matmul %35, %117, %cst_66 {dimension_numbers = #tpu.dot_dimension_numbers<[1], [0], [0], [1], [0, 0, 1, 1], [], []>} : vector<8x8xf32>, vector<8x32xf32>, vector<8x32xf32> -> vector<8x32xf32>
    %119 = vector.extract_strided_slice %116 {offsets = [8, 0], sizes = [8, 32], strides = [1, 1]} : vector<16x32xf32> to vector<8x32xf32>
    %cst_67 = arith.constant dense<0.000000e+00> : vector<8x32xf32>
    %120 = tpu.matmul %35, %119, %cst_67 {dimension_numbers = #tpu.dot_dimension_numbers<[1], [0], [0], [1], [0, 0, 1, 1], [], []>} : vector<8x8xf32>, vector<8x32xf32>, vector<8x32xf32> -> vector<8x32xf32>
    %121 = tpu.concatenate %118, %120 in 0 : vector<8x32xf32>, vector<8x32xf32> -> vector<16x32xf32>
    %122 = vector.extract_strided_slice %103 {offsets = [0, 0], sizes = [16, 3], strides = [1, 1]} : vector<16x35xf32> to vector<16x3xf32>
    %123 = tpu.concatenate %97, %116, %122, %121 in 1 : vector<16x3xf32>, vector<16x32xf32>, vector<16x3xf32>, vector<16x32xf32> -> vector<16x70xf32>
    %cst_68 = arith.constant dense<0.000000e+00> : vector<16x32xf32>
    %124 = tpu.matmul %123, %83, %cst_68 {dimension_numbers = #tpu.dot_dimension_numbers<[1], [0], [0], [1], [0, 0, 1, 1], [], []>} : vector<16x70xf32>, vector<70x32xf32>, vector<16x32xf32> -> vector<16x32xf32>
    %125 = vector.broadcast %85 : vector<1x32xf32> to vector<16x32xf32>
    %126 = arith.addf %124, %125 : vector<16x32xf32>
    %127 = math.tanh %126 : vector<16x32xf32>
    %128 = arith.mulf %114, %86 : vector<16x32xf32>
    %cst_69 = arith.constant 1.000000e+00 : f32
    %129 = vector.broadcast %cst_69 : f32 to vector<16x32xf32>
    %130 = arith.subf %129, %114 : vector<16x32xf32>
    %131 = arith.mulf %130, %127 : vector<16x32xf32>
    %132 = arith.addf %128, %131 : vector<16x32xf32>
    %c1_i32 = arith.constant 1 : i32
    %c8_i32_70 = arith.constant 8 : i32
    %133 = arith.muli %c1_i32, %c8_i32_70 : i32
    %c0_i32_71 = arith.constant 0 : i32
    %134 = arith.addi %c0_i32_71, %133 : i32
    %135 = tpu.assume_multiple %134, 8 : i32
    %136 = arith.index_cast %135 : i32 to index
    %c0_72 = arith.constant 0 : index
    %137 = vector.load %arg18[%136, %c0_72] : memref<64x3xf32, #tpu.memory_space<vmem>>, vector<8x3xf32>
    %c8_i32_73 = arith.constant 8 : i32
    %138 = arith.muli %c1_i32, %c8_i32_73 : i32
    %c32_i32_74 = arith.constant 32 : i32
    %139 = arith.addi %c32_i32_74, %138 : i32
    %140 = tpu.assume_multiple %139, 8 : i32
    %141 = arith.index_cast %140 : i32 to index
    %c0_75 = arith.constant 0 : index
    %142 = vector.load %arg18[%141, %c0_75] : memref<64x3xf32, #tpu.memory_space<vmem>>, vector<8x3xf32>
    %143 = tpu.concatenate %137, %142 in 0 : vector<8x3xf32>, vector<8x3xf32> -> vector<16x3xf32>
    %144 = tpu.concatenate %143, %132 in 1 : vector<16x3xf32>, vector<16x32xf32> -> vector<16x35xf32>
    %145 = vector.extract_strided_slice %144 {offsets = [0, 0], sizes = [8, 35], strides = [1, 1]} : vector<16x35xf32> to vector<8x35xf32>
    %cst_76 = arith.constant dense<0.000000e+00> : vector<8x35xf32>
    %146 = tpu.matmul %35, %145, %cst_76 {dimension_numbers = #tpu.dot_dimension_numbers<[1], [0], [0], [1], [0, 0, 1, 1], [], []>} : vector<8x8xf32>, vector<8x35xf32>, vector<8x35xf32> -> vector<8x35xf32>
    %147 = vector.extract_strided_slice %144 {offsets = [8, 0], sizes = [8, 35], strides = [1, 1]} : vector<16x35xf32> to vector<8x35xf32>
    %cst_77 = arith.constant dense<0.000000e+00> : vector<8x35xf32>
    %148 = tpu.matmul %35, %147, %cst_77 {dimension_numbers = #tpu.dot_dimension_numbers<[1], [0], [0], [1], [0, 0, 1, 1], [], []>} : vector<8x8xf32>, vector<8x35xf32>, vector<8x35xf32> -> vector<8x35xf32>
    %149 = tpu.concatenate %146, %148 in 0 : vector<8x35xf32>, vector<8x35xf32> -> vector<16x35xf32>
    %150 = tpu.concatenate %144, %149 in 1 : vector<16x35xf32>, vector<16x35xf32> -> vector<16x70xf32>
    %cst_78 = arith.constant dense<0.000000e+00> : vector<16x64xf32>
    %151 = tpu.matmul %150, %79, %cst_78 {dimension_numbers = #tpu.dot_dimension_numbers<[1], [0], [0], [1], [0, 0, 1, 1], [], []>} : vector<16x70xf32>, vector<70x64xf32>, vector<16x64xf32> -> vector<16x64xf32>
    %152 = vector.broadcast %81 : vector<1x64xf32> to vector<16x64xf32>
    %153 = arith.addf %151, %152 : vector<16x64xf32>
    %cst_79 = arith.constant 0.000000e+00 : f32
    %154 = vector.broadcast %cst_79 : f32 to vector<16x64xf32>
    %155 = arith.subf %154, %153 : vector<16x64xf32>
    %156 = math.exp %155 : vector<16x64xf32>
    %cst_80 = arith.constant 1.000000e+00 : f32
    %157 = vector.broadcast %cst_80 : f32 to vector<16x64xf32>
    %158 = arith.addf %157, %156 : vector<16x64xf32>
    %159 = tpu.reciprocal %158 {approx = true} : vector<16x64xf32> -> vector<16x64xf32>
    %160 = vector.extract_strided_slice %159 {offsets = [0, 0], sizes = [16, 32], strides = [1, 1]} : vector<16x64xf32> to vector<16x32xf32>
    %161 = vector.extract_strided_slice %159 {offsets = [0, 32], sizes = [16, 32], strides = [1, 1]} : vector<16x64xf32> to vector<16x32xf32>
    %162 = arith.mulf %161, %132 : vector<16x32xf32>
    %163 = vector.extract_strided_slice %162 {offsets = [0, 0], sizes = [8, 32], strides = [1, 1]} : vector<16x32xf32> to vector<8x32xf32>
    %cst_81 = arith.constant dense<0.000000e+00> : vector<8x32xf32>
    %164 = tpu.matmul %35, %163, %cst_81 {dimension_numbers = #tpu.dot_dimension_numbers<[1], [0], [0], [1], [0, 0, 1, 1], [], []>} : vector<8x8xf32>, vector<8x32xf32>, vector<8x32xf32> -> vector<8x32xf32>
    %165 = vector.extract_strided_slice %162 {offsets = [8, 0], sizes = [8, 32], strides = [1, 1]} : vector<16x32xf32> to vector<8x32xf32>
    %cst_82 = arith.constant dense<0.000000e+00> : vector<8x32xf32>
    %166 = tpu.matmul %35, %165, %cst_82 {dimension_numbers = #tpu.dot_dimension_numbers<[1], [0], [0], [1], [0, 0, 1, 1], [], []>} : vector<8x8xf32>, vector<8x32xf32>, vector<8x32xf32> -> vector<8x32xf32>
    %167 = tpu.concatenate %164, %166 in 0 : vector<8x32xf32>, vector<8x32xf32> -> vector<16x32xf32>
    %168 = vector.extract_strided_slice %149 {offsets = [0, 0], sizes = [16, 3], strides = [1, 1]} : vector<16x35xf32> to vector<16x3xf32>
    %169 = tpu.concatenate %143, %162, %168, %167 in 1 : vector<16x3xf32>, vector<16x32xf32>, vector<16x3xf32>, vector<16x32xf32> -> vector<16x70xf32>
    %cst_83 = arith.constant dense<0.000000e+00> : vector<16x32xf32>
    %170 = tpu.matmul %169, %83, %cst_83 {dimension_numbers = #tpu.dot_dimension_numbers<[1], [0], [0], [1], [0, 0, 1, 1], [], []>} : vector<16x70xf32>, vector<70x32xf32>, vector<16x32xf32> -> vector<16x32xf32>
    %171 = vector.broadcast %85 : vector<1x32xf32> to vector<16x32xf32>
    %172 = arith.addf %170, %171 : vector<16x32xf32>
    %173 = math.tanh %172 : vector<16x32xf32>
    %174 = arith.mulf %160, %132 : vector<16x32xf32>
    %cst_84 = arith.constant 1.000000e+00 : f32
    %175 = vector.broadcast %cst_84 : f32 to vector<16x32xf32>
    %176 = arith.subf %175, %160 : vector<16x32xf32>
    %177 = arith.mulf %176, %173 : vector<16x32xf32>
    %178 = arith.addf %174, %177 : vector<16x32xf32>
    %c2_i32 = arith.constant 2 : i32
    %c8_i32_85 = arith.constant 8 : i32
    %179 = arith.muli %c2_i32, %c8_i32_85 : i32
    %c0_i32_86 = arith.constant 0 : i32
    %180 = arith.addi %c0_i32_86, %179 : i32
    %181 = tpu.assume_multiple %180, 8 : i32
    %182 = arith.index_cast %181 : i32 to index
    %c0_87 = arith.constant 0 : index
    %183 = vector.load %arg18[%182, %c0_87] : memref<64x3xf32, #tpu.memory_space<vmem>>, vector<8x3xf32>
    %c8_i32_88 = arith.constant 8 : i32
    %184 = arith.muli %c2_i32, %c8_i32_88 : i32
    %c32_i32_89 = arith.constant 32 : i32
    %185 = arith.addi %c32_i32_89, %184 : i32
    %186 = tpu.assume_multiple %185, 8 : i32
    %187 = arith.index_cast %186 : i32 to index
    %c0_90 = arith.constant 0 : index
    %188 = vector.load %arg18[%187, %c0_90] : memref<64x3xf32, #tpu.memory_space<vmem>>, vector<8x3xf32>
    %189 = tpu.concatenate %183, %188 in 0 : vector<8x3xf32>, vector<8x3xf32> -> vector<16x3xf32>
    %190 = tpu.concatenate %189, %178 in 1 : vector<16x3xf32>, vector<16x32xf32> -> vector<16x35xf32>
    %191 = vector.extract_strided_slice %190 {offsets = [0, 0], sizes = [8, 35], strides = [1, 1]} : vector<16x35xf32> to vector<8x35xf32>
    %cst_91 = arith.constant dense<0.000000e+00> : vector<8x35xf32>
    %192 = tpu.matmul %35, %191, %cst_91 {dimension_numbers = #tpu.dot_dimension_numbers<[1], [0], [0], [1], [0, 0, 1, 1], [], []>} : vector<8x8xf32>, vector<8x35xf32>, vector<8x35xf32> -> vector<8x35xf32>
    %193 = vector.extract_strided_slice %190 {offsets = [8, 0], sizes = [8, 35], strides = [1, 1]} : vector<16x35xf32> to vector<8x35xf32>
    %cst_92 = arith.constant dense<0.000000e+00> : vector<8x35xf32>
    %194 = tpu.matmul %35, %193, %cst_92 {dimension_numbers = #tpu.dot_dimension_numbers<[1], [0], [0], [1], [0, 0, 1, 1], [], []>} : vector<8x8xf32>, vector<8x35xf32>, vector<8x35xf32> -> vector<8x35xf32>
    %195 = tpu.concatenate %192, %194 in 0 : vector<8x35xf32>, vector<8x35xf32> -> vector<16x35xf32>
    %196 = tpu.concatenate %190, %195 in 1 : vector<16x35xf32>, vector<16x35xf32> -> vector<16x70xf32>
    %cst_93 = arith.constant dense<0.000000e+00> : vector<16x64xf32>
    %197 = tpu.matmul %196, %79, %cst_93 {dimension_numbers = #tpu.dot_dimension_numbers<[1], [0], [0], [1], [0, 0, 1, 1], [], []>} : vector<16x70xf32>, vector<70x64xf32>, vector<16x64xf32> -> vector<16x64xf32>
    %198 = vector.broadcast %81 : vector<1x64xf32> to vector<16x64xf32>
    %199 = arith.addf %197, %198 : vector<16x64xf32>
    %cst_94 = arith.constant 0.000000e+00 : f32
    %200 = vector.broadcast %cst_94 : f32 to vector<16x64xf32>
    %201 = arith.subf %200, %199 : vector<16x64xf32>
    %202 = math.exp %201 : vector<16x64xf32>
    %cst_95 = arith.constant 1.000000e+00 : f32
    %203 = vector.broadcast %cst_95 : f32 to vector<16x64xf32>
    %204 = arith.addf %203, %202 : vector<16x64xf32>
    %205 = tpu.reciprocal %204 {approx = true} : vector<16x64xf32> -> vector<16x64xf32>
    %206 = vector.extract_strided_slice %205 {offsets = [0, 0], sizes = [16, 32], strides = [1, 1]} : vector<16x64xf32> to vector<16x32xf32>
    %207 = vector.extract_strided_slice %205 {offsets = [0, 32], sizes = [16, 32], strides = [1, 1]} : vector<16x64xf32> to vector<16x32xf32>
    %208 = arith.mulf %207, %178 : vector<16x32xf32>
    %209 = vector.extract_strided_slice %208 {offsets = [0, 0], sizes = [8, 32], strides = [1, 1]} : vector<16x32xf32> to vector<8x32xf32>
    %cst_96 = arith.constant dense<0.000000e+00> : vector<8x32xf32>
    %210 = tpu.matmul %35, %209, %cst_96 {dimension_numbers = #tpu.dot_dimension_numbers<[1], [0], [0], [1], [0, 0, 1, 1], [], []>} : vector<8x8xf32>, vector<8x32xf32>, vector<8x32xf32> -> vector<8x32xf32>
    %211 = vector.extract_strided_slice %208 {offsets = [8, 0], sizes = [8, 32], strides = [1, 1]} : vector<16x32xf32> to vector<8x32xf32>
    %cst_97 = arith.constant dense<0.000000e+00> : vector<8x32xf32>
    %212 = tpu.matmul %35, %211, %cst_97 {dimension_numbers = #tpu.dot_dimension_numbers<[1], [0], [0], [1], [0, 0, 1, 1], [], []>} : vector<8x8xf32>, vector<8x32xf32>, vector<8x32xf32> -> vector<8x32xf32>
    %213 = tpu.concatenate %210, %212 in 0 : vector<8x32xf32>, vector<8x32xf32> -> vector<16x32xf32>
    %214 = vector.extract_strided_slice %195 {offsets = [0, 0], sizes = [16, 3], strides = [1, 1]} : vector<16x35xf32> to vector<16x3xf32>
    %215 = tpu.concatenate %189, %208, %214, %213 in 1 : vector<16x3xf32>, vector<16x32xf32>, vector<16x3xf32>, vector<16x32xf32> -> vector<16x70xf32>
    %cst_98 = arith.constant dense<0.000000e+00> : vector<16x32xf32>
    %216 = tpu.matmul %215, %83, %cst_98 {dimension_numbers = #tpu.dot_dimension_numbers<[1], [0], [0], [1], [0, 0, 1, 1], [], []>} : vector<16x70xf32>, vector<70x32xf32>, vector<16x32xf32> -> vector<16x32xf32>
    %217 = vector.broadcast %85 : vector<1x32xf32> to vector<16x32xf32>
    %218 = arith.addf %216, %217 : vector<16x32xf32>
    %219 = math.tanh %218 : vector<16x32xf32>
    %220 = arith.mulf %206, %178 : vector<16x32xf32>
    %cst_99 = arith.constant 1.000000e+00 : f32
    %221 = vector.broadcast %cst_99 : f32 to vector<16x32xf32>
    %222 = arith.subf %221, %206 : vector<16x32xf32>
    %223 = arith.mulf %222, %219 : vector<16x32xf32>
    %224 = arith.addf %220, %223 : vector<16x32xf32>
    %c3_i32 = arith.constant 3 : i32
    %c8_i32_100 = arith.constant 8 : i32
    %225 = arith.muli %c3_i32, %c8_i32_100 : i32
    %c0_i32_101 = arith.constant 0 : i32
    %226 = arith.addi %c0_i32_101, %225 : i32
    %227 = tpu.assume_multiple %226, 8 : i32
    %228 = arith.index_cast %227 : i32 to index
    %c0_102 = arith.constant 0 : index
    %229 = vector.load %arg18[%228, %c0_102] : memref<64x3xf32, #tpu.memory_space<vmem>>, vector<8x3xf32>
    %c8_i32_103 = arith.constant 8 : i32
    %230 = arith.muli %c3_i32, %c8_i32_103 : i32
    %c32_i32_104 = arith.constant 32 : i32
    %231 = arith.addi %c32_i32_104, %230 : i32
    %232 = tpu.assume_multiple %231, 8 : i32
    %233 = arith.index_cast %232 : i32 to index
    %c0_105 = arith.constant 0 : index
    %234 = vector.load %arg18[%233, %c0_105] : memref<64x3xf32, #tpu.memory_space<vmem>>, vector<8x3xf32>
    %235 = tpu.concatenate %229, %234 in 0 : vector<8x3xf32>, vector<8x3xf32> -> vector<16x3xf32>
    %236 = tpu.concatenate %235, %224 in 1 : vector<16x3xf32>, vector<16x32xf32> -> vector<16x35xf32>
    %237 = vector.extract_strided_slice %236 {offsets = [0, 0], sizes = [8, 35], strides = [1, 1]} : vector<16x35xf32> to vector<8x35xf32>
    %cst_106 = arith.constant dense<0.000000e+00> : vector<8x35xf32>
    %238 = tpu.matmul %35, %237, %cst_106 {dimension_numbers = #tpu.dot_dimension_numbers<[1], [0], [0], [1], [0, 0, 1, 1], [], []>} : vector<8x8xf32>, vector<8x35xf32>, vector<8x35xf32> -> vector<8x35xf32>
    %239 = vector.extract_strided_slice %236 {offsets = [8, 0], sizes = [8, 35], strides = [1, 1]} : vector<16x35xf32> to vector<8x35xf32>
    %cst_107 = arith.constant dense<0.000000e+00> : vector<8x35xf32>
    %240 = tpu.matmul %35, %239, %cst_107 {dimension_numbers = #tpu.dot_dimension_numbers<[1], [0], [0], [1], [0, 0, 1, 1], [], []>} : vector<8x8xf32>, vector<8x35xf32>, vector<8x35xf32> -> vector<8x35xf32>
    %241 = tpu.concatenate %238, %240 in 0 : vector<8x35xf32>, vector<8x35xf32> -> vector<16x35xf32>
    %242 = tpu.concatenate %236, %241 in 1 : vector<16x35xf32>, vector<16x35xf32> -> vector<16x70xf32>
    %cst_108 = arith.constant dense<0.000000e+00> : vector<16x64xf32>
    %243 = tpu.matmul %242, %79, %cst_108 {dimension_numbers = #tpu.dot_dimension_numbers<[1], [0], [0], [1], [0, 0, 1, 1], [], []>} : vector<16x70xf32>, vector<70x64xf32>, vector<16x64xf32> -> vector<16x64xf32>
    %244 = vector.broadcast %81 : vector<1x64xf32> to vector<16x64xf32>
    %245 = arith.addf %243, %244 : vector<16x64xf32>
    %cst_109 = arith.constant 0.000000e+00 : f32
    %246 = vector.broadcast %cst_109 : f32 to vector<16x64xf32>
    %247 = arith.subf %246, %245 : vector<16x64xf32>
    %248 = math.exp %247 : vector<16x64xf32>
    %cst_110 = arith.constant 1.000000e+00 : f32
    %249 = vector.broadcast %cst_110 : f32 to vector<16x64xf32>
    %250 = arith.addf %249, %248 : vector<16x64xf32>
    %251 = tpu.reciprocal %250 {approx = true} : vector<16x64xf32> -> vector<16x64xf32>
    %252 = vector.extract_strided_slice %251 {offsets = [0, 0], sizes = [16, 32], strides = [1, 1]} : vector<16x64xf32> to vector<16x32xf32>
    %253 = vector.extract_strided_slice %251 {offsets = [0, 32], sizes = [16, 32], strides = [1, 1]} : vector<16x64xf32> to vector<16x32xf32>
    %254 = arith.mulf %253, %224 : vector<16x32xf32>
    %255 = vector.extract_strided_slice %254 {offsets = [0, 0], sizes = [8, 32], strides = [1, 1]} : vector<16x32xf32> to vector<8x32xf32>
    %cst_111 = arith.constant dense<0.000000e+00> : vector<8x32xf32>
    %256 = tpu.matmul %35, %255, %cst_111 {dimension_numbers = #tpu.dot_dimension_numbers<[1], [0], [0], [1], [0, 0, 1, 1], [], []>} : vector<8x8xf32>, vector<8x32xf32>, vector<8x32xf32> -> vector<8x32xf32>
    %257 = vector.extract_strided_slice %254 {offsets = [8, 0], sizes = [8, 32], strides = [1, 1]} : vector<16x32xf32> to vector<8x32xf32>
    %cst_112 = arith.constant dense<0.000000e+00> : vector<8x32xf32>
    %258 = tpu.matmul %35, %257, %cst_112 {dimension_numbers = #tpu.dot_dimension_numbers<[1], [0], [0], [1], [0, 0, 1, 1], [], []>} : vector<8x8xf32>, vector<8x32xf32>, vector<8x32xf32> -> vector<8x32xf32>
    %259 = tpu.concatenate %256, %258 in 0 : vector<8x32xf32>, vector<8x32xf32> -> vector<16x32xf32>
    %260 = vector.extract_strided_slice %241 {offsets = [0, 0], sizes = [16, 3], strides = [1, 1]} : vector<16x35xf32> to vector<16x3xf32>
    %261 = tpu.concatenate %235, %254, %260, %259 in 1 : vector<16x3xf32>, vector<16x32xf32>, vector<16x3xf32>, vector<16x32xf32> -> vector<16x70xf32>
    %cst_113 = arith.constant dense<0.000000e+00> : vector<16x32xf32>
    %262 = tpu.matmul %261, %83, %cst_113 {dimension_numbers = #tpu.dot_dimension_numbers<[1], [0], [0], [1], [0, 0, 1, 1], [], []>} : vector<16x70xf32>, vector<70x32xf32>, vector<16x32xf32> -> vector<16x32xf32>
    %263 = vector.broadcast %85 : vector<1x32xf32> to vector<16x32xf32>
    %264 = arith.addf %262, %263 : vector<16x32xf32>
    %265 = math.tanh %264 : vector<16x32xf32>
    %266 = arith.mulf %252, %224 : vector<16x32xf32>
    %cst_114 = arith.constant 1.000000e+00 : f32
    %267 = vector.broadcast %cst_114 : f32 to vector<16x32xf32>
    %268 = arith.subf %267, %252 : vector<16x32xf32>
    %269 = arith.mulf %268, %265 : vector<16x32xf32>
    %270 = arith.addf %266, %269 : vector<16x32xf32>
    %c4_i32 = arith.constant 4 : i32
    %c0_115 = arith.constant 0 : index
    %c0_116 = arith.constant 0 : index
    %c0_117 = arith.constant 0 : index
    %271 = vector.load %arg15[%c0_115, %c0_116, %c0_117] : memref<1x32x4xf32, #tpu.memory_space<vmem>>, vector<1x32x4xf32>
    %272 = vector.shape_cast %271 : vector<1x32x4xf32> to vector<32x4xf32>
    %cst_118 = arith.constant dense<0.000000e+00> : vector<16x4xf32>
    %273 = tpu.matmul %270, %272, %cst_118 {dimension_numbers = #tpu.dot_dimension_numbers<[1], [0], [0], [1], [0, 0, 1, 1], [], []>} : vector<16x32xf32>, vector<32x4xf32>, vector<16x4xf32> -> vector<16x4xf32>
    %c0_119 = arith.constant 0 : index
    %c0_120 = arith.constant 0 : index
    %c0_121 = arith.constant 0 : index
    %274 = vector.load %arg16[%c0_119, %c0_120, %c0_121] : memref<1x1x4xf32, #tpu.memory_space<vmem>>, vector<1x1x4xf32>
    %275 = vector.shape_cast %274 : vector<1x1x4xf32> to vector<1x4xf32>
    %276 = vector.broadcast %275 : vector<1x4xf32> to vector<16x4xf32>
    %277 = arith.addf %273, %276 : vector<16x4xf32>
    %c0_122 = arith.constant 0 : index
    %c0_123 = arith.constant 0 : index
    %c0_124 = arith.constant 0 : index
    %278 = vector.load %arg17[%c0_122, %c0_123, %c0_124] : memref<1x16x4xf32, #tpu.memory_space<vmem>>, vector<1x16x4xf32>
    %279 = vector.shape_cast %278 : vector<1x16x4xf32> to vector<16x4xf32>
    %280 = vector.shape_cast %277 : vector<16x4xf32> to vector<1x16x4xf32>
    tpu.vector_store %arg17[%c0_122, %c0_123, %c0_124], %280 {strides = array<i32>} : memref<1x16x4xf32, #tpu.memory_space<vmem>>, vector<1x16x4xf32>,
    return
  }
  func.func @transform_0(%arg0: i32) -> (i32, i32) {
    %c0_i32 = arith.constant 0 : i32
    %c0_i32_0 = arith.constant 0 : i32
    %c0_i32_1 = arith.constant 0 : i32
    return %c0_i32, %c0_i32_0 : i32, i32
  }
  func.func @transform_1(%arg0: i32) -> (i32, i32) {
    %c0_i32 = arith.constant 0 : i32
    %c0_i32_0 = arith.constant 0 : i32
    %c0_i32_1 = arith.constant 0 : i32
    return %c0_i32, %c0_i32_0 : i32, i32
  }
  func.func @transform_2(%arg0: i32) -> (i32, i32) {
    %c0_i32 = arith.constant 0 : i32
    %c0_i32_0 = arith.constant 0 : i32
    %c0_i32_1 = arith.constant 0 : i32
    return %c0_i32, %c0_i32_0 : i32, i32
  }
  func.func @transform_3(%arg0: i32) -> (i32, i32) {
    %c0_i32 = arith.constant 0 : i32
    %c0_i32_0 = arith.constant 0 : i32
    %c0_i32_1 = arith.constant 0 : i32
    return %c0_i32, %c0_i32_0 : i32, i32
  }
  func.func @transform_4(%arg0: i32) -> (i32, i32) {
    %c0_i32 = arith.constant 0 : i32
    %c0_i32_0 = arith.constant 0 : i32
    %c0_i32_1 = arith.constant 0 : i32
    return %c0_i32, %c0_i32_0 : i32, i32
  }
  func.func @transform_5(%arg0: i32) -> (i32, i32) {
    %c0_i32 = arith.constant 0 : i32
    %c0_i32_0 = arith.constant 0 : i32
    %c0_i32_1 = arith.constant 0 : i32
    return %c0_i32, %c0_i32_0 : i32, i32
  }
  func.func @transform_6(%arg0: i32) -> (i32, i32) {
    %c0_i32 = arith.constant 0 : i32
    %c0_i32_0 = arith.constant 0 : i32
    %c0_i32_1 = arith.constant 0 : i32
    return %c0_i32, %c0_i32_0 : i32, i32
  }
  func.func @transform_7(%arg0: i32) -> (i32, i32) {
    %c0_i32 = arith.constant 0 : i32
    %c0_i32_0 = arith.constant 0 : i32
    %c0_i32_1 = arith.constant 0 : i32
    return %c0_i32, %c0_i32_0 : i32, i32
  }
  func.func @transform_8(%arg0: i32) -> (i32, i32) {
    %c0_i32 = arith.constant 0 : i32
    %c0_i32_0 = arith.constant 0 : i32
    %c0_i32_1 = arith.constant 0 : i32
    return %c0_i32, %c0_i32_0 : i32, i32
  }
  func.func @transform_9(%arg0: i32) -> (i32, i32) {
    %c0_i32 = arith.constant 0 : i32
    %c0_i32_0 = arith.constant 0 : i32
    %c0_i32_1 = arith.constant 0 : i32
    return %c0_i32, %c0_i32_0 : i32, i32
  }
  func.func @transform_10(%arg0: i32) -> (i32, i32, i32) {
    %c0_i32 = arith.constant 0 : i32
    %c0_i32_0 = arith.constant 0 : i32
    %c0_i32_1 = arith.constant 0 : i32
    return %arg0, %c0_i32, %c0_i32_0 : i32, i32, i32
  }
  func.func @transform_11(%arg0: i32) -> (i32, i32, i32) {
    %c0_i32 = arith.constant 0 : i32
    %c0_i32_0 = arith.constant 0 : i32
    %c0_i32_1 = arith.constant 0 : i32
    return %arg0, %c0_i32, %c0_i32_0 : i32, i32, i32
  }
  func.func @transform_12(%arg0: i32) -> (i32, i32, i32) {
    %c0_i32 = arith.constant 0 : i32
    %c0_i32_0 = arith.constant 0 : i32
    %c0_i32_1 = arith.constant 0 : i32
    return %arg0, %c0_i32, %c0_i32_0 : i32, i32, i32
  }
  func.func @transform_13(%arg0: i32) -> (i32, i32, i32) {
    %c0_i32 = arith.constant 0 : i32
    %c0_i32_0 = arith.constant 0 : i32
    %c0_i32_1 = arith.constant 0 : i32
    return %arg0, %c0_i32, %c0_i32_0 : i32, i32, i32
  }
  func.func @transform_14(%arg0: i32) -> (i32, i32, i32) {
    %c0_i32 = arith.constant 0 : i32
    %c0_i32_0 = arith.constant 0 : i32
    %c0_i32_1 = arith.constant 0 : i32
    return %arg0, %c0_i32, %c0_i32_0 : i32, i32, i32
  }
  func.func @transform_15(%arg0: i32) -> (i32, i32, i32) {
    %c0_i32 = arith.constant 0 : i32
    %c0_i32_0 = arith.constant 0 : i32
    %c0_i32_1 = arith.constant 0 : i32
    return %arg0, %c0_i32, %c0_i32_0 : i32, i32, i32
  }
  func.func @transform_16(%arg0: i32) -> (i32, i32, i32) {
    %c0_i32 = arith.constant 0 : i32
    %c0_i32_0 = arith.constant 0 : i32
    %c0_i32_1 = arith.constant 0 : i32
    return %arg0, %c0_i32, %c0_i32_0 : i32, i32, i32
  }
}

</mosaic_0001>

<bundles_post_ra>
// kernel: _lambda_.2
= control target key start
LH: loop header
LB: loop body
LE: loop exit
PB: predicated region body
PF: predicated region fallthrough
CT: control target
= control target key end

     0   :  { %10 = vsyncpa [#allocation3], 0  ;;  %s2465_s0 = inlined_call_operand.vmem [shape: f32[64,3], index: 0, kind: input, shape index: {}]   ;;  %s2466_s1 = inlined_call_operand.vmem [shape: f32[3,64], index: 1, kind: input, shape index: {}]   ;;  %s2467_s2 = inlined_call_operand.vmem [shape: f32[8,8], index: 2, kind: input, shape index: {}]   ;;  %s2468_s3 = inlined_call_operand.vmem [shape: f32[8,8], index: 3, kind: input, shape index: {}]   ;;  %s2469_s4 = inlined_call_operand.vmem [shape: f32[17], index: 4, kind: input, shape index: {}]   ;;  %s2470_s5 = inlined_call_operand.vmem [shape: f32[8,8], index: 5, kind: output, shape index: {}]  }
   0x1   :  { %s25_s20 = sshll.u32 %s2469_s4, 4  ;;  %s26_s20 = int_to_ptr.vmem [resolvable:$true] %s25_s20 }
   0x2   :  { %s2059_s21 = scalar_lea.vmem %s26_s20, 16  ;;  %p2064_p1 = scmp.lt.s32.totalorder %s26_s20, %s26_s20 }
   0x3   :  { %p2060_p0 = scmp.ne.s32.totalorder %s26_s20, %s2059_s21  ;;  %p2065_p2 = scmp.lt.s32.totalorder %s2059_s21, %s2059_s21 }
   0x5   :  { %p2066_p3 = por %p2065_p2, %p2064_p1 }
   0x7   :  { %p2067_p4 = pnand %p2066_p3, %p2060_p0 }
   0x9   :  { %2070 = shalt.err (!%p2067_p4)
}
   0xa   :  { %s2073_s22 = smov [#allocation2]  }
   0xb   :  { %28 = dma.vmem_to_smem %s26_s20, 16, %s2073_s22, [#allocation3]  }
   0xc   :  { %2071 = dma.done.wait [#allocation3], 16  }
   0xd   :  { %2072 = vsyncadd [#allocation3], 4294967280 }
   0xe   :  { %32 = sfence }
   0xf   :  { %v41_v0 = vld [vmem:[%s2466_s1] sm:$0x7]  ;;  %vm67_vm0 = vcmask 1042432   ;;  %vm42_vm1 = vcmask 23552   ;;  %v34_v2 = vld [vmem:[%s2465_s0 + $0x8] sm:$0xff]  ;;  %v35_v3 = vld [vmem:[%s2465_s0 + $0x10] sm:$0xff] }
  0x10   :  { %v33_v1 = vld [vmem:[%s2465_s0] sm:$0xff]  ;;  %1884 = vmatprep.subr.msk.mxu0 %vm67_vm0, %v41_v0  ;;  %v36_v4 = vld [vmem:[%s2465_s0 + $0x18] sm:$0xff]  ;;  %v38_v6 = vld [vmem:[%s2465_s0 + $0x28] sm:$0xff]  ;;  %v2074_v9 = vmov 0.0   ;;  %vm2075_vm2 = vmmov 0   ;;  %s2076_s14 = smov 80  }
  0x11   :  { %1886 = vmatprep.mubr.msk.f32.mxu0 %vm42_vm1, %v33_v1  ;;  %1885 = vmatpush3.msk.msra.mxu0 %vm67_vm0, %v41_v0  ;;  %v37_v5 = vld [vmem:[%s2465_s0 + $0x20] sm:$0xff]  ;;  %v39_v7 = vld [vmem:[%s2465_s0 + $0x30] sm:$0xff]  ;;  %v40_v8 = vld [vmem:[%s2465_s0 + $0x38] sm:$0xff]  ;;  %s2077_s15 = smov 96   ;;  %s2078_s0 = smov 112   ;;  %vm179_vm3 = vcmask 130048  }
  0x12   :  { %1887 = vmatmul.mubr.msk.f32.vlgmr.msra.gmra.mrb[0].mxu0 %vm42_vm1, %v34_v2  ;;  %1898 = vmatprep.subr.mxu1 %v2074_v9  ;;  %vm255_vm4 = vcmask 64512   ;;  %s1796_s18 = sld [smem:[#allocation2 + $0x1]]  ;;  %s267_s19 = sld [smem:[#allocation2]] }
  0x13   :  { %1889 = vmatprep.mubr.msk.f32.mxu0 %vm42_vm1, %v35_v3  ;;  %1918 = vmatprep.subr.mxu0 %v2074_v9  ;;  %s1799_s20 = sld [smem:[#allocation2 + $0x2]]  ;;  %s2403_s21 = sld [smem:[#allocation2 + $0x3]] }
  0x14   :  { %1900 = vmatprep.mubr.msk.f32.mxu1 %vm2075_vm2, %v2074_v9  ;;  %s2409_s22 = sld [smem:[#allocation2 + $0x5]]  ;;  %s2412_s23 = sld [smem:[#allocation2 + $0x6]] }
  0x15   :  { %s2415_s24 = sld [smem:[#allocation2 + $0x7]]  ;;  %s2420_s25 = sld [smem:[#allocation2 + $0x8]] }
  0x16   :  { %1890 = vmatmul.mubr.msk.f32.gmra.mrb[2].mxu0 %vm42_vm1, %v36_v4  ;;  %s2423_s4 = sld [smem:[#allocation2 + $0x9]]  ;;  %s2428_s26 = sld [smem:[#allocation2 + $0xa]] }
  0x17   :  { %1892 = vmatprep.mubr.msk.f32.mxu0 %vm42_vm1, %v37_v5  ;;  %s2431_s27 = sld [smem:[#allocation2 + $0xb]]  ;;  %s2436_s28 = sld [smem:[#allocation2 + $0xc]] }
  0x18   :  { %s2439_s29 = sld [smem:[#allocation2 + $0xd]]  ;;  %s1835_s1 = sld [smem:[#allocation2 + $0xe]] }
  0x19   :  { %s1838_s30 = sld [smem:[#allocation2 + $0xf]]  ;;  %s1839_s6 = sld [smem:[#allocation2 + $0x10]] }
  0x1a   :  { %1893 = vmatmul.mubr.msk.f32.gmra.mrb[4].mxu0 %vm42_vm1, %v38_v6 }
  0x1b   :  { %1895 = vmatprep.mubr.msk.f32.mxu0 %vm42_vm1, %v39_v7 }
  0x1e   :  { %1896 = vmatmul.mubr.msk.f32.gmra.mrb[6].mxu0 %vm42_vm1, %v40_v8 }
  0x1f   :  { %1920 = vmatprep.mubr.msk.f32.mxu0 %vm2075_vm2, %v2074_v9 }
  0xe5   :  { %v1888_v10 = vpop.f32.mrb[0].mxu0 }
  0xe6   :  { %460 = vrot.lane.b32.xlu0 %v1888_v10, %s2076_s14  ;;  %366 = vrot.lane.b32.xlu1 %v1888_v10, %s2077_s15  ;;  %v137_v11 = vpop.f32.mrb[1].mxu0 }
  0xe9   :  { %v1891_v12 = vpop.f32.mrb[2].mxu0 }
  0xea   :  { %458 = vrot.lane.b32.xlu0 %v1888_v10, %s2078_s0  ;;  %271 = vrot.lane.b32.xlu1 %v137_v11, %s2078_s0  ;;  %v147_v13 = vpop.f32.mrb[3].mxu0 }
  0xed   :  { %v2154_v14 = vpop.f32.mrb[4].mxu0 }
  0xee   :  { %177 = vrot.lane.b32.xlu0 %v137_v11, %s2077_s15  ;;  %553 = vrot.lane.b32.xlu1 %v147_v13, %s2077_s15  ;;  %v157_v15 = vpop.f32.mrb[5].mxu0 }
  0xf1   :  { %v2156_v16 = vpop.f32.mrb[6].mxu0 }
  0xf2   :  { %273 = vrot.lane.b32.xlu0 %v137_v11, %s2076_s14  ;;  %647 = vrot.lane.b32.xlu1 %v147_v13, %s2076_s14  ;;  %v2160_v17 = vpop.f32.mrb[7].mxu0 }
  0xf6   :  { %740 = vrot.lane.b32.xlu0 %v1891_v12, %s2077_s15  ;;  %645 = vrot.lane.b32.xlu1 %v147_v13, %s2078_s0 }
  0xfa   :  { %834 = vrot.lane.b32.xlu0 %v1891_v12, %s2076_s14  ;;  %927 = vrot.lane.b32.xlu1 %v157_v15, %s2077_s15 }
  0xfe   :  { %832 = vrot.lane.b32.xlu0 %v1891_v12, %s2078_s0  ;;  %1021 = vrot.lane.b32.xlu1 %v157_v15, %s2076_s14 }
 0x102   :  { %1114 = vrot.lane.b32.xlu0 %v2154_v14, %s2077_s15  ;;  %1019 = vrot.lane.b32.xlu1 %v157_v15, %s2078_s0 }
 0x106   :  { %1208 = vrot.lane.b32.xlu0 %v2154_v14, %s2076_s14  ;;  %1301 = vrot.lane.b32.xlu1 %v2160_v17, %s2077_s15 }
 0x10a   :  { %1206 = vrot.lane.b32.xlu0 %v2154_v14, %s2078_s0  ;;  %1395 = vrot.lane.b32.xlu1 %v2160_v17, %s2076_s14 }
 0x10e   :  { %1488 = vrot.lane.b32.xlu0 %v2156_v16, %s2077_s15  ;;  %1393 = vrot.lane.b32.xlu1 %v2160_v17, %s2078_s0 }
 0x112   :  { %1582 = vrot.lane.b32.xlu0 %v2156_v16, %s2076_s14  ;;  %1580 = vrot.lane.b32.xlu1 %v2156_v16, %s2078_s0 }
 0x158   :  { %v461_v18 = vpop.permute.xlu0 %460  ;;  %v367_v19 = vpop.permute.xlu1 %366 }
 0x15c   :  { %v459_v20 = vpop.permute.xlu0 %458  ;;  %v272_v21 = vpop.permute.xlu1 %271 }
 0x160   :  { %v178_v22 = vpop.permute.xlu0 %177  ;;  %v554_v23 = vpop.permute.xlu1 %553 }
 0x161   :  { %1899 = vmatpush3.xpose.msk.msra.mxu1 %vm179_vm3, %v178_v22  ;;  %1919 = vmatpush3.xpose.msk.msra.mxu0 %vm179_vm3, %v554_v23 }
 0x162   :  { %1903 = vmatprep.subr.mxu1 %v2074_v9  ;;  %1928 = vmatprep.subr.mxu0 %v2074_v9 }
 0x164   :  { %1901 = vmatmul.mubr.msk.f32.vlgmr.msra.gmra.mrb[0].mxu1 %vm179_vm3, %v137_v11  ;;  %v274_v24 = vpop.permute.xlu0 %273  ;;  %1921 = vmatmul.mubr.msk.f32.vlgmr.msra.gmra.mrb[8].mxu0 %vm179_vm3, %v147_v13  ;;  %v648_v25 = vpop.permute.xlu1 %647 }
 0x165   :  { %1904 = vmatpush3.xpose.msk.msra.mxu1 %vm179_vm3, %v274_v24  ;;  %1905 = vmatprep.mubr.msk.f32.mxu1 %vm2075_vm2, %v2074_v9 }
 0x166   :  { %1908 = vmatprep.subr.mxu1 %v2074_v9  ;;  %1930 = vmatprep.mubr.msk.f32.mxu0 %vm2075_vm2, %v2074_v9 }
 0x168   :  { %1906 = vmatmul.mubr.msk.f32.vlgmr.msra.gmra.mrb[2].mxu1 %vm179_vm3, %v272_v21  ;;  %v741_v26 = vpop.permute.xlu0 %740  ;;  %v646_v27 = vpop.permute.xlu1 %645 }
 0x169   :  { %1909 = vmatpush3.xpose.msk.msra.mxu1 %vm179_vm3, %v367_v19  ;;  %1929 = vmatpush3.xpose.msk.msra.mxu0 %vm179_vm3, %v741_v26 }
 0x16a   :  { %1910 = vmatprep.mubr.msk.f32.mxu1 %vm2075_vm2, %v2074_v9  ;;  %1913 = vmatprep.subr.mxu1 %v2074_v9 }
 0x16b   :  { %1938 = vmatprep.subr.mxu0 %v2074_v9 }
 0x16c   :  { %1911 = vmatmul.mubr.msk.f32.vlgmr.msra.gmra.mrb[4].mxu1 %vm179_vm3, %v1888_v10  ;;  %v835_v28 = vpop.permute.xlu0 %834  ;;  %1931 = vmatmul.mubr.msk.f32.vlgmr.msra.gmra.mrb[10].mxu0 %vm179_vm3, %v1891_v12  ;;  %v928_v29 = vpop.permute.xlu1 %927 }
 0x16d   :  { %1914 = vmatpush3.xpose.msk.msra.mxu1 %vm179_vm3, %v461_v18  ;;  %1939 = vmatpush3.xpose.msk.msra.mxu0 %vm179_vm3, %v928_v29 }
 0x16e   :  { %1915 = vmatprep.mubr.msk.f32.mxu1 %vm2075_vm2, %v2074_v9  ;;  %1940 = vmatprep.mubr.msk.f32.mxu0 %vm2075_vm2, %v2074_v9 }
 0x16f   :  { %1923 = vmatprep.subr.mxu1 %v2074_v9  ;;  %1948 = vmatprep.subr.mxu0 %v2074_v9 }
 0x170   :  { %1916 = vmatmul.mubr.msk.f32.vlgmr.msra.gmra.mrb[6].mxu1 %vm179_vm3, %v459_v20  ;;  %v833_v30 = vpop.permute.xlu0 %832  ;;  %1941 = vmatmul.mubr.msk.f32.vlgmr.msra.gmra.mrb[12].mxu0 %vm179_vm3, %v157_v15  ;;  %v1022_v31 = vpop.permute.xlu1 %1021 }
 0x171   :  { %1924 = vmatpush3.xpose.msk.msra.mxu1 %vm179_vm3, %v648_v25  ;;  %1925 = vmatprep.mubr.msk.f32.mxu1 %vm2075_vm2, %v2074_v9 }
 0x172   :  { %1933 = vmatprep.subr.mxu1 %v2074_v9  ;;  %1950 = vmatprep.mubr.msk.f32.mxu0 %vm2075_vm2, %v2074_v9 }
 0x174   :  { %1926 = vmatmul.mubr.msk.f32.vlgmr.msra.gmra.mrb[8].mxu1 %vm179_vm3, %v646_v27  ;;  %v1115_v32 = vpop.permute.xlu0 %1114  ;;  %v1020_v33 = vpop.permute.xlu1 %1019 }
 0x175   :  { %1934 = vmatpush3.xpose.msk.msra.mxu1 %vm179_vm3, %v835_v28  ;;  %1949 = vmatpush3.xpose.msk.msra.mxu0 %vm179_vm3, %v1115_v32 }
 0x176   :  { %1935 = vmatprep.mubr.msk.f32.mxu1 %vm2075_vm2, %v2074_v9  ;;  %1943 = vmatprep.subr.mxu1 %v2074_v9 }
 0x177   :  { %1958 = vmatprep.subr.mxu0 %v2074_v9 }
 0x178   :  { %1936 = vmatmul.mubr.msk.f32.vlgmr.msra.gmra.mrb[10].mxu1 %vm179_vm3, %v833_v30  ;;  %v1209_v34 = vpop.permute.xlu0 %1208  ;;  %1951 = vmatmul.mubr.msk.f32.vlgmr.msra.gmra.mrb[14].mxu0 %vm179_vm3, %v2154_v14  ;;  %v1302_v35 = vpop.permute.xlu1 %1301 }
 0x179   :  { %1944 = vmatpush3.xpose.msk.msra.mxu1 %vm179_vm3, %v1022_v31  ;;  %1959 = vmatpush3.xpose.msk.msra.mxu0 %vm179_vm3, %v1302_v35 }
 0x17a   :  { %1945 = vmatprep.mubr.msk.f32.mxu1 %vm2075_vm2, %v2074_v9  ;;  %1960 = vmatprep.mubr.msk.f32.mxu0 %vm2075_vm2, %v2074_v9 }
 0x17b   :  { %1953 = vmatprep.subr.mxu1 %v2074_v9  ;;  %1968 = vmatprep.subr.mxu0 %v2074_v9 }
 0x17c   :  { %v1207_v36 = vpop.permute.xlu0 %1206  ;;  %1946 = vmatmul.mubr.msk.f32.vlgmr.msra.gmra.mrb[12].mxu1 %vm179_vm3, %v1020_v33  ;;  %1961 = vmatmul.mubr.msk.f32.vlgmr.msra.gmra.mrb[16].mxu0 %vm179_vm3, %v2160_v17  ;;  %v1396_v37 = vpop.permute.xlu1 %1395 }
 0x17d   :  { %1954 = vmatpush3.xpose.msk.msra.mxu1 %vm179_vm3, %v1209_v34  ;;  %1955 = vmatprep.mubr.msk.f32.mxu1 %vm2075_vm2, %v2074_v9 }
 0x17e   :  { %1963 = vmatprep.subr.mxu1 %v2074_v9  ;;  %1970 = vmatprep.mubr.msk.f32.mxu0 %vm2075_vm2, %v2074_v9 }
 0x180   :  { %1956 = vmatmul.mubr.msk.f32.vlgmr.msra.gmra.mrb[14].mxu1 %vm179_vm3, %v1207_v36  ;;  %v1489_v38 = vpop.permute.xlu0 %1488  ;;  %v1394_v39 = vpop.permute.xlu1 %1393 }
 0x181   :  { %1964 = vmatpush3.xpose.msk.msra.mxu1 %vm179_vm3, %v1396_v37  ;;  %1969 = vmatpush3.xpose.msk.msra.mxu0 %vm179_vm3, %v1489_v38 }
 0x182   :  { %1965 = vmatprep.mubr.msk.f32.mxu1 %vm2075_vm2, %v2074_v9  ;;  %1973 = vmatprep.subr.mxu1 %v2074_v9 }
 0x183   :  { %1978 = vmatprep.subr.mxu0 %v2074_v9 }
 0x184   :  { %v1583_v40 = vpop.permute.xlu0 %1582  ;;  %1966 = vmatmul.mubr.msk.f32.vlgmr.msra.gmra.mrb[16].mxu1 %vm179_vm3, %v1394_v39  ;;  %1971 = vmatmul.mubr.msk.f32.vlgmr.msra.gmra.mrb[18].mxu0 %vm179_vm3, %v2156_v16  ;;  %v1581_v41 = vpop.permute.xlu1 %1580 }
 0x185   :  { %1974 = vmatpush3.xpose.msk.msra.mxu1 %vm179_vm3, %v1583_v40  ;;  %1975 = vmatprep.mubr.msk.f32.mxu1 %vm2075_vm2, %v2074_v9 }
 0x186   :  { %1980 = vmatprep.mubr.msk.f32.mxu0 %vm2075_vm2, %v2074_v9 }
 0x188   :  { %1976 = vmatmul.mubr.msk.f32.vlgmr.msra.gmra.mrb[18].mxu1 %vm179_vm3, %v1581_v41 }
 0x237   :  { %v250_v42 = vpop.f32.mrb[0].mxu1  ;;  %v625_v43 = vpop.f32.mrb[8].mxu0 }
 0x238   :  { %v2256_v44 = vmul.f32 0.25, %v250_v42  ;;  %v1902_v45 = vpop.f32.mrb[1].mxu1  ;;  %v1922_v46 = vpop.f32.mrb[9].mxu0  ;;  %v2262_v51 = vmul.f32 0.25, %v625_v43 }
 0x23a   :  { %v256_v47 = vsel %vm255_vm4, %v2256_v44, -inf  ;;  %v630_v60 = vsel %vm255_vm4, %v2262_v51, -inf }
 0x23b   :  { %v345_v48 = vpop.f32.mrb[2].mxu1  ;;  %257 = vmax.xlane.f32.xlu0 %v256_v47 }
 0x23c   :  { %v2260_v49 = vmul.f32 0.25, %v345_v48  ;;  %v1907_v50 = vpop.f32.mrb[3].mxu1 }
 0x23e   :  { %v350_v52 = vsel %vm255_vm4, %v2260_v49, -inf }
 0x23f   :  { %v438_v53 = vpop.f32.mrb[4].mxu1  ;;  %351 = vmax.xlane.f32.xlu1 %v350_v52  ;;  %v812_v54 = vpop.f32.mrb[10].mxu0 }
 0x240   :  { %v2266_v55 = vmul.f32 0.25, %v438_v53  ;;  %v1912_v56 = vpop.f32.mrb[5].mxu1  ;;  %v1932_v57 = vpop.f32.mrb[11].mxu0  ;;  %v2268_v58 = vmul.f32 0.25, %v812_v54 }
 0x242   :  { %v443_v59 = vsel %vm255_vm4, %v2266_v55, -inf  ;;  %v817_v4 = vsel %vm255_vm4, %v2268_v58, -inf }
 0x243   :  { %v532_v61 = vpop.f32.mrb[6].mxu1  ;;  %444 = vmax.xlane.f32.xlu0 %v443_v59  ;;  %631 = vmax.xlane.f32.xlu1 %v630_v60  ;;  %v999_v62 = vpop.f32.mrb[12].mxu0 }
 0x244   :  { %v2274_v63 = vmul.f32 0.25, %v532_v61  ;;  %v1917_v0 = vpop.f32.mrb[7].mxu1  ;;  %v1942_v1 = vpop.f32.mrb[13].mxu0  ;;  %v2276_v2 = vmul.f32 0.25, %v999_v62 }
 0x246   :  { %v537_v3 = vsel %vm255_vm4, %v2274_v63, -inf  ;;  %v1004_v9 = vsel %vm255_vm4, %v2276_v2, -inf }
 0x247   :  { %v719_v5 = vpop.f32.mrb[8].mxu1  ;;  %538 = vmax.xlane.f32.xlu0 %v537_v3  ;;  %818 = vmax.xlane.f32.xlu1 %v817_v4 }
 0x248   :  { %v2282_v6 = vmul.f32 0.25, %v719_v5  ;;  %v1927_v7 = vpop.f32.mrb[9].mxu1 }
 0x24a   :  { %v724_v8 = vsel %vm255_vm4, %v2282_v6, -inf }
 0x24b   :  { %v906_v10 = vpop.f32.mrb[10].mxu1  ;;  %725 = vmax.xlane.f32.xlu0 %v724_v8  ;;  %1005 = vmax.xlane.f32.xlu1 %v1004_v9  ;;  %v1186_v11 = vpop.f32.mrb[14].mxu0 }
 0x24c   :  { %v2288_v12 = vmul.f32 0.25, %v906_v10  ;;  %v2290_v13 = vmul.f32 0.25, %v1186_v11  ;;  %v1937_v14 = vpop.f32.mrb[11].mxu1  ;;  %v1952_v15 = vpop.f32.mrb[15].mxu0 }
 0x24e   :  { %v911_v16 = vsel %vm255_vm4, %v2288_v12, -inf  ;;  %v1191_v17 = vsel %vm255_vm4, %v2290_v13, -inf }
 0x24f   :  { %v1093_v18 = vpop.f32.mrb[12].mxu1  ;;  %912 = vmax.xlane.f32.xlu0 %v911_v16  ;;  %1192 = vmax.xlane.f32.xlu1 %v1191_v17  ;;  %v1373_v19 = vpop.f32.mrb[16].mxu0 }
 0x250   :  { %v2296_v20 = vmul.f32 0.25, %v1093_v18  ;;  %v2298_v21 = vmul.f32 0.25, %v1373_v19  ;;  %v1947_v22 = vpop.f32.mrb[13].mxu1  ;;  %v1962_v23 = vpop.f32.mrb[17].mxu0 }
 0x252   :  { %v1098_v24 = vsel %vm255_vm4, %v2296_v20, -inf  ;;  %v1378_v25 = vsel %vm255_vm4, %v2298_v21, -inf }
 0x253   :  { %v1280_v26 = vpop.f32.mrb[14].mxu1  ;;  %1099 = vmax.xlane.f32.xlu0 %v1098_v24  ;;  %1379 = vmax.xlane.f32.xlu1 %v1378_v25 }
 0x254   :  { %v2304_v27 = vmul.f32 0.25, %v1280_v26  ;;  %v1957_v28 = vpop.f32.mrb[15].mxu1 }
 0x256   :  { %v1285_v29 = vsel %vm255_vm4, %v2304_v27, -inf }
 0x257   :  { %1286 = vmax.xlane.f32.xlu0 %v1285_v29  ;;  %v1467_v30 = vpop.f32.mrb[16].mxu1  ;;  %v1560_v31 = vpop.f32.mrb[18].mxu0 }
 0x258   :  { %v2308_v32 = vmul.f32 0.25, %v1467_v30  ;;  %v2310_v33 = vmul.f32 0.25, %v1560_v31  ;;  %v1967_v34 = vpop.f32.mrb[17].mxu1  ;;  %v1972_v35 = vpop.f32.mrb[19].mxu0 }
 0x25a   :  { %v1472_v36 = vsel %vm255_vm4, %v2308_v32, -inf  ;;  %v1565_v37 = vsel %vm255_vm4, %v2310_v33, -inf }
 0x25b   :  { %1473 = vmax.xlane.f32.xlu0 %v1472_v36  ;;  %v1654_v38 = vpop.f32.mrb[18].mxu1  ;;  %1566 = vmax.xlane.f32.xlu1 %v1565_v37 }
 0x25c   :  { %v2316_v39 = vmul.f32 0.25, %v1654_v38  ;;  %v1977_v40 = vpop.f32.mrb[19].mxu1 }
 0x25e   :  { %v1659_v41 = vsel %vm255_vm4, %v2316_v39, -inf }
 0x25f   :  { %1660 = vmax.xlane.f32.xlu0 %v1659_v41 }
 0x2c8   :  { %v258_v42 = vpop.xlane.xlu0 %257 }
 0x2c9   :  { %v259_v43 = vsub.f32 %v2256_v44, %v258_v42 }
 0x2cb   :  { %v260_v45 = vmul.f32 1.442695, %v259_v43 }
 0x2cc   :  { %v352_v46 = vpop.xlane.xlu1 %351 }
 0x2cd   :  { %1989 = vpow2.f32 %v260_v45  ;;  %v353_v47 = vsub.f32 %v2260_v49, %v352_v46 }
 0x2cf   :  { %v354_v48 = vmul.f32 1.442695, %v353_v47 }
 0x2d0   :  { %v445_v50 = vpop.xlane.xlu0 %444  ;;  %v632_v52 = vpop.xlane.xlu1 %631 }
 0x2d1   :  { %1991 = vpow2.f32 %v354_v48  ;;  %v446_v53 = vsub.f32 %v2266_v55, %v445_v50  ;;  %v633_v54 = vsub.f32 %v2262_v51, %v632_v52 }
 0x2d3   :  { %v447_v56 = vmul.f32 1.442695, %v446_v53  ;;  %v634_v57 = vmul.f32 1.442695, %v633_v54 }
 0x2d4   :  { %v539_v59 = vpop.xlane.xlu0 %538  ;;  %v819_v60 = vpop.xlane.xlu1 %818 }
 0x2d5   :  { %1993 = vpow2.f32 %v447_v56  ;;  %v540_v44 = vsub.f32 %v2274_v63, %v539_v59  ;;  %v820_v61 = vsub.f32 %v2268_v58, %v819_v60 }
 0x2d6   :  { %1995 = vpow2.f32 %v634_v57 }
 0x2d7   :  { %v2326_v62 = vpop.eup %1989  ;;  %v541_v49 = vmul.f32 1.442695, %v540_v44  ;;  %v821_v0 = vmul.f32 1.442695, %v820_v61 }
 0x2d8   :  { %v726_v1 = vpop.xlane.xlu0 %725  ;;  %v1006_v3 = vpop.xlane.xlu1 %1005  ;;  %v262_v55 = vsel %vm255_vm4, %v2326_v62, 0.0 }
 0x2d9   :  { %1997 = vpow2.f32 %v541_v49  ;;  %v727_v51 = vsub.f32 %v2282_v6, %v726_v1  ;;  %v1007_v4 = vsub.f32 %v2276_v2, %v1006_v3  ;;  %263 = vadd.xlane.f32.xlu1 %v262_v55  ;;  %v1679_v49 = vld [vmem:[%s2468_s3] sm:$0xff]  ;;  %s2406_s3 = sld [smem:[#allocation2 + $0x4]] }
 0x2da   :  { %1999 = vpow2.f32 %v821_v0  ;;  %1979 = vmatpush3.msra.mxu0 %v1679_v49 }
 0x2db   :  { %v2332_v5 = vpop.eup %1991  ;;  %v728_v58 = vmul.f32 1.442695, %v727_v51  ;;  %v1008_v63 = vmul.f32 1.442695, %v1007_v4 }
 0x2dc   :  { %v913_v7 = vpop.xlane.xlu0 %912  ;;  %v1193_v8 = vpop.xlane.xlu1 %1192  ;;  %v356_v9 = vsel %vm255_vm4, %v2332_v5, 0.0 }
 0x2dd   :  { %2001 = vpow2.f32 %v728_v58  ;;  %v914_v10 = vsub.f32 %v2288_v12, %v913_v7  ;;  %v1194_v11 = vsub.f32 %v2290_v13, %v1193_v8  ;;  %357 = vadd.xlane.f32.xlu0 %v356_v9  ;;  %v362_v9 = vstv %s1796_s18 }
 0x2de   :  { %2003 = vpow2.f32 %v1008_v63 }
 0x2df   :  { %v2338_v6 = vpop.eup %1993  ;;  %v915_v2 = vmul.f32 1.442695, %v914_v10  ;;  %v1195_v14 = vmul.f32 1.442695, %v1194_v11 }
 0x2e0   :  { %v1100_v15 = vpop.xlane.xlu0 %1099  ;;  %v1380_v16 = vpop.xlane.xlu1 %1379  ;;  %v449_v17 = vsel %vm255_vm4, %v2338_v6, 0.0 }
 0x2e1   :  { %v2342_v18 = vpop.eup %1995  ;;  %2005 = vpow2.f32 %v915_v2  ;;  %v1101_v19 = vsub.f32 %v2296_v20, %v1100_v15  ;;  %v1381_v12 = vsub.f32 %v2298_v21, %v1380_v16  ;;  %450 = vadd.xlane.f32.xlu1 %v449_v17  ;;  %v268_v2 = vstv %s267_s19 }
 0x2e2   :  { %2007 = vpow2.f32 %v1195_v14  ;;  %v636_v26 = vsel %vm255_vm4, %v2342_v18, 0.0  ;;  %v455_v14 = vstv %s1799_s20 }
 0x2e3   :  { %v2346_v13 = vpop.eup %1997  ;;  %v1102_v22 = vmul.f32 1.442695, %v1101_v19  ;;  %v1382_v23 = vmul.f32 1.442695, %v1381_v12 }
 0x2e4   :  { %v1287_v24 = vpop.xlane.xlu0 %1286  ;;  %v543_v25 = vsel %vm255_vm4, %v2346_v13, 0.0  ;;  %v2352_v28 = vpop.eup %1999 }
 0x2e5   :  { %2009 = vpow2.f32 %v1102_v22  ;;  %v1288_v20 = vsub.f32 %v2304_v27, %v1287_v24  ;;  %544 = vadd.xlane.f32.xlu0 %v543_v25  ;;  %637 = vadd.xlane.f32.xlu1 %v636_v26  ;;  %v823_v35 = vsel %vm255_vm4, %v2352_v28, 0.0  ;;  %v549_v22 = vstv %s2403_s21 }
 0x2e6   :  { %2011 = vpow2.f32 %v1382_v23 }
 0x2e7   :  { %v2355_v21 = vpop.eup %2001  ;;  %v1289_v29 = vmul.f32 1.442695, %v1288_v20  ;;  %v642_v20 = vstv %s2406_s3 }
 0x2e8   :  { %v1474_v30 = vpop.xlane.xlu0 %1473  ;;  %v1567_v31 = vpop.xlane.xlu1 %1566  ;;  %v730_v34 = vsel %vm255_vm4, %v2355_v21, 0.0 }
 0x2e9   :  { %v2361_v36 = vpop.eup %2003  ;;  %2013 = vpow2.f32 %v1289_v29  ;;  %v1475_v37 = vsub.f32 %v2308_v32, %v1474_v30  ;;  %v1568_v27 = vsub.f32 %v2310_v33, %v1567_v31  ;;  %731 = vadd.xlane.f32.xlu0 %v730_v34  ;;  %824 = vadd.xlane.f32.xlu1 %v823_v35  ;;  %v736_v35 = vstv %s2409_s22 }
 0x2ea   :  { %v1010_v45 = vsel %vm255_vm4, %v2361_v36, 0.0 }
 0x2eb   :  { %v2365_v38 = vpop.eup %2005  ;;  %v1476_v40 = vmul.f32 1.442695, %v1475_v37  ;;  %v1569_v41 = vmul.f32 1.442695, %v1568_v27 }
 0x2ec   :  { %v1661_v42 = vpop.xlane.xlu0 %1660  ;;  %v917_v43 = vsel %vm255_vm4, %v2365_v38, 0.0  ;;  %v2371_v46 = vpop.eup %2007 }
 0x2ed   :  { %2015 = vpow2.f32 %v1476_v40  ;;  %v1662_v32 = vsub.f32 %v2316_v39, %v1661_v42  ;;  %918 = vadd.xlane.f32.xlu0 %v917_v43  ;;  %1011 = vadd.xlane.f32.xlu1 %v1010_v45  ;;  %v1197_v50 = vsel %vm255_vm4, %v2371_v46, 0.0 }
 0x2ee   :  { %2017 = vpow2.f32 %v1569_v41 }
 0x2ef   :  { %v2374_v33 = vpop.eup %2009  ;;  %v1663_v47 = vmul.f32 1.442695, %v1662_v32 }
 0x2f0   :  { %v1104_v48 = vsel %vm255_vm4, %v2374_v33, 0.0  ;;  %v2380_v52 = vpop.eup %2011 }
 0x2f1   :  { %2019 = vpow2.f32 %v1663_v47  ;;  %1105 = vadd.xlane.f32.xlu0 %v1104_v48  ;;  %1198 = vadd.xlane.f32.xlu1 %v1197_v50  ;;  %v1384_v54 = vsel %vm255_vm4, %v2380_v52, 0.0  ;;  %v923_v48 = vstv %s2415_s24 }
 0x2f3   :  { %v2382_v53 = vpop.eup %2013 }
 0x2f4   :  { %v1291_v39 = vsel %vm255_vm4, %v2382_v53, 0.0 }
 0x2f5   :  { %1292 = vadd.xlane.f32.xlu0 %v1291_v39  ;;  %1385 = vadd.xlane.f32.xlu1 %v1384_v54 }
 0x2f7   :  { %v2388_v56 = vpop.eup %2015 }
 0x2f8   :  { %v2390_v57 = vpop.eup %2017  ;;  %v1478_v59 = vsel %vm255_vm4, %v2388_v56, 0.0 }
 0x2f9   :  { %1479 = vadd.xlane.f32.xlu0 %v1478_v59  ;;  %v1571_v60 = vsel %vm255_vm4, %v2390_v57, 0.0 }
 0x2fa   :  { %1572 = vadd.xlane.f32.xlu1 %v1571_v60  ;;  %v1016_v60 = vstv %s2420_s25 }
 0x2fb   :  { %v2396_v44 = vpop.eup %2019 }
 0x2fc   :  { %v1665_v61 = vsel %vm255_vm4, %v2396_v44, 0.0 }
 0x2fd   :  { %1666 = vadd.xlane.f32.xlu0 %v1665_v61 }
 0x366   :  { %v264_v0 = vpop.xlane.xlu1 %263 }
 0x367   :  { %2021 = vrcp.f32 %v264_v0 }
 0x36a   :  { %v358_v1 = vpop.xlane.xlu0 %357 }
 0x36b   :  { %2023 = vrcp.f32 %v358_v1 }
 0x36e   :  { %v451_v3 = vpop.xlane.xlu1 %450 }
 0x36f   :  { %2025 = vrcp.f32 %v451_v3  ;;  %v1110_v3 = vstv %s2423_s4 }
 0x371   :  { %v2022_v4 = vpop.eup %2021 }
 0x372   :  { %v545_v55 = vpop.xlane.xlu0 %544  ;;  %v638_v51 = vpop.xlane.xlu1 %637  ;;  %v266_v10 = vmul.f32 %v2022_v4, %v2326_v62 }
 0x373   :  { %2027 = vrcp.f32 %v545_v55 }
 0x374   :  { %2029 = vrcp.f32 %v638_v51  ;;  %v269_v19 = vmul.f32 %v268_v2, %v266_v10  ;;  %v1297_v10 = vstv %s2431_s27 }
 0x375   :  { %v2024_v58 = vpop.eup %2023 }
 0x376   :  { %v360_v63 = vmul.f32 %v2024_v58, %v2332_v5  ;;  %v732_v7 = vpop.xlane.xlu0 %731  ;;  %v825_v8 = vpop.xlane.xlu1 %824 }
 0x377   :  { %2031 = vrcp.f32 %v732_v7 }
 0x378   :  { %2033 = vrcp.f32 %v825_v8  ;;  %v363_v15 = vmul.f32 %v362_v9, %v360_v63 }
 0x379   :  { %v2026_v11 = vpop.eup %2025 }
 0x37a   :  { %v453_v16 = vmul.f32 %v2026_v11, %v2338_v6  ;;  %v919_v5 = vpop.xlane.xlu0 %918  ;;  %v1012_v17 = vpop.xlane.xlu1 %1011  ;;  %v364_v24 = vadd.f32 %v363_v15, %v269_v19 }
 0x37b   :  { %2035 = vrcp.f32 %v919_v5 }
 0x37c   :  { %v456_v12 = vmul.f32 %v455_v14, %v453_v16  ;;  %2037 = vrcp.f32 %v1012_v17  ;;  %v1390_v16 = vstv %s2436_s28 }
 0x37d   :  { %v2028_v62 = vpop.eup %2027 }
 0x37e   :  { %v2030_v23 = vpop.eup %2029  ;;  %v547_v25 = vmul.f32 %v2028_v62, %v2346_v13  ;;  %v1106_v26 = vpop.xlane.xlu0 %1105  ;;  %v457_v30 = vadd.f32 %v456_v12, %v364_v24  ;;  %v1577_v24 = vstv %s1835_s1 }
 0x37f   :  { %v1199_v6 = vpop.xlane.xlu1 %1198  ;;  %v640_v29 = vmul.f32 %v2030_v23, %v2342_v18  ;;  %2039 = vrcp.f32 %v1106_v26  ;;  %v829_v18 = vstv %s2412_s23 }
 0x380   :  { %v550_v31 = vmul.f32 %v549_v22, %v547_v25  ;;  %2041 = vrcp.f32 %v1199_v6 }
 0x381   :  { %v2032_v34 = vpop.eup %2031  ;;  %v643_v13 = vmul.f32 %v642_v20, %v640_v29 }
 0x382   :  { %v2034_v37 = vpop.eup %2033  ;;  %v551_v27 = vadd.f32 %v550_v31, %v457_v30  ;;  %v734_v40 = vmul.f32 %v2032_v34, %v2355_v21  ;;  %v1293_v41 = vpop.xlane.xlu0 %1292 }
 0x383   :  { %v1386_v42 = vpop.xlane.xlu1 %1385  ;;  %v827_v43 = vmul.f32 %v2034_v37, %v2352_v28  ;;  %2043 = vrcp.f32 %v1293_v41 }
 0x384   :  { %v644_v45 = vadd.f32 %v643_v13, %v551_v27  ;;  %v737_v32 = vmul.f32 %v736_v35, %v734_v40  ;;  %2045 = vrcp.f32 %v1386_v42  ;;  %v1675_v35 = vstv %s1839_s6 }
 0x385   :  { %v2036_v47 = vpop.eup %2035  ;;  %v830_v21 = vmul.f32 %v829_v18, %v827_v43  ;;  %v1754_v13 = vlaneseq }
 0x386   :  { %v2038_v50 = vpop.eup %2037  ;;  %v738_v39 = vadd.f32 %v737_v32, %v644_v45  ;;  %v921_v54 = vmul.f32 %v2036_v47, %v2365_v38  ;;  %v1480_v59 = vpop.xlane.xlu0 %1479 }
 0x387   :  { %v1014_v28 = vmul.f32 %v2038_v50, %v2361_v36  ;;  %2047 = vrcp.f32 %v1480_v59  ;;  %v1573_v61 = vpop.xlane.xlu1 %1572  ;;  %v1203_v36 = vstv %s2428_s26  ;;  %v1757_v40 = vand.u32 127, %v1754_v13 }
 0x388   :  { %v831_v49 = vadd.f32 %v830_v21, %v738_v39  ;;  %v924_v0 = vmul.f32 %v923_v48, %v921_v54  ;;  %2049 = vrcp.f32 %v1573_v61 }
 0x389   :  { %v2040_v1 = vpop.eup %2039  ;;  %v1017_v38 = vmul.f32 %v1016_v60, %v1014_v28 }
 0x38a   :  { %v2042_v55 = vpop.eup %2041  ;;  %v925_v51 = vadd.f32 %v924_v0, %v831_v49  ;;  %v1108_v4 = vmul.f32 %v2040_v1, %v2374_v33  ;;  %v1667_v58 = vpop.xlane.xlu0 %1666 }
 0x38b   :  { %v1201_v63 = vmul.f32 %v2042_v55, %v2371_v46  ;;  %2051 = vrcp.f32 %v1667_v58  ;;  %v1484_v46 = vstv %s2439_s29 }
 0x38c   :  { %v1018_v7 = vadd.f32 %v1017_v38, %v925_v51  ;;  %v1111_v8 = vmul.f32 %v1110_v3, %v1108_v4 }
 0x38d   :  { %v2044_v9 = vpop.eup %2043  ;;  %v1204_v14 = vmul.f32 %v1203_v36, %v1201_v63 }
 0x38e   :  { %v2046_v11 = vpop.eup %2045  ;;  %v1112_v2 = vadd.f32 %v1111_v8, %v1018_v7  ;;  %v1295_v15 = vmul.f32 %v2044_v9, %v2382_v53  ;;  %v1671_v53 = vstv %s1838_s30 }
 0x38f   :  { %v1388_v33 = vmul.f32 %v2046_v11, %v2380_v52 }
 0x390   :  { %v1205_v5 = vadd.f32 %v1204_v14, %v1112_v2  ;;  %v1298_v17 = vmul.f32 %v1297_v10, %v1295_v15 }
 0x391   :  { %v2048_v19 = vpop.eup %2047  ;;  %v1391_v22 = vmul.f32 %v1390_v16, %v1388_v33 }
 0x392   :  { %v2050_v12 = vpop.eup %2049  ;;  %v1299_v62 = vadd.f32 %v1298_v17, %v1205_v5  ;;  %v1482_v23 = vmul.f32 %v2048_v19, %v2388_v56  ;;  %v1677_v56 = vld [vmem:[%s2467_s2] sm:$0xff] }
 0x393   :  { %v1575_v25 = vmul.f32 %v2050_v12, %v2390_v57  ;;  %v1755_v57 = vshrl.u32 %v1754_v13, 7 }
 0x394   :  { %v1392_v26 = vadd.f32 %v1391_v22, %v1299_v62  ;;  %v1485_v6 = vmul.f32 %v1484_v46, %v1482_v23 }
 0x395   :  { %v2052_v20 = vpop.eup %2051  ;;  %v1578_v30 = vmul.f32 %v1577_v24, %v1575_v25  ;;  %vm1758_vm5 = vcmp.eq.s32.totalorder %v1755_v57, %v1757_v40 }
 0x396   :  { %v1486_v29 = vadd.f32 %v1485_v6, %v1392_v26  ;;  %v1669_v52 = vmul.f32 %v2052_v20, %v2396_v44 }
 0x398   :  { %v1579_v31 = vadd.f32 %v1578_v30, %v1486_v29  ;;  %v1672_v34 = vmul.f32 %v1671_v53, %v1669_v52 }
 0x39a   :  { %v1673_v37 = vadd.f32 %v1672_v34, %v1579_v31 }
 0x39c   :  { %v1676_v27 = vadd.f32 %v1675_v35, %v1673_v37 }
 0x39e   :  { %1981 = vmatmul.mubr.msk.f32.vlgmr.msra.gmra.mrb[20].mxu0 %vm255_vm4, %v1676_v27  ;;  %v1678_v41 = vmul.f32 %v1677_v56, %v1676_v27 }
 0x471   :  { %v1749_v42 = vpop.f32.mrb[20].mxu0 }
 0x472   :  { %v1753_v18 = vadd.f32 %v1749_v42, %v1678_v41  ;;  %v1982_v43 = vpop.f32.mrb[21].mxu0 }
 0x474   :  { %v1759_v44 = vsel %vm1758_vm5, 0.0, %v1753_v18 }
 0x475   :  { %v1760_v45 = vsel %vm255_vm4, %v1759_v44, -inf }
 0x476   :  { %1761 = vmax.xlane.f32.xlu1 %v1760_v45 }
 0x503   :  { %v1762_v32 = vpop.xlane.xlu1 %1761 }
 0x504   :  { %v1763_v47 = vsub.f32 %v1759_v44, %v1762_v32 }
 0x506   :  { %v1764_v48 = vmul.f32 1.442695, %v1763_v47 }
 0x508   :  { %2053 = vpow2.f32 %v1764_v48 }
 0x512   :  { %v2054_v50 = vpop.eup %2053 }
 0x513   :  { %v1766_v39 = vsel %vm255_vm4, %v2054_v50, 0.0 }
 0x514   :  { %1767 = vadd.xlane.f32.xlu0 %v1766_v39 }
 0x5a1   :  { %v1768_v21 = vpop.xlane.xlu0 %1767 }
 0x5a2   :  { %2055 = vrcp.f32 %v1768_v21 }
 0x5ac   :  { %v2056_v54 = vpop.eup %2055 }
 0x5ad   :  { %v1770_v59 = vmul.f32 %v2056_v54, %v2054_v50 }
 0x5af   :  { %v1771_v60 = vsel %vm1758_vm5, 1.0, %v1770_v59 }
 0x5b0   :  { %v1772_v28 = vsel %vm255_vm4, %v1771_v60, 0.0 }
 0x5b1   :  { %1773 = vadd.xlane.f32.xlu1 %v1772_v28 }
 0x63e   :  { %v1774_v61 = vpop.xlane.xlu1 %1773 }
 0x63f   :  { %2057 = vrcp.f32 %v1774_v61 }
 0x649   :  { %v2058_v49 = vpop.eup %2057 }
 0x64a   :  { %v1776_v0 = vmul.f32 %v2058_v49, %v1771_v60 }
 0x64c   :  { %1777 = vst.msk [vmem:[%s2470_s5] sm:$0xff] %vm255_vm4, %v1776_v0 }
 0x64d   :  { %1782 = vsyncpa [#allocation3], 1 }

// kernel: _lambda_.3
= control target key start
LH: loop header
LB: loop body
LE: loop exit
PB: predicated region body
PF: predicated region fallthrough
CT: control target
= control target key end

     0   :  { %s4733_s23 = smov 0   ;;  %s5412_s0 = inlined_call_operand.vmem [shape: f32[64,3], index: 0, kind: input, shape index: {}]   ;;  %s5413_s1 = inlined_call_operand.vmem [shape: f32[64,8], index: 1, kind: input, shape index: {}]   ;;  %s5414_s2 = inlined_call_operand.vmem [shape: f32[64,8], index: 2, kind: input, shape index: {}]   ;;  %s5415_s3 = inlined_call_operand.vmem [shape: f32[8,8], index: 3, kind: input, shape index: {}]   ;;  %s5416_s4 = inlined_call_operand.vmem [shape: f32[8,8], index: 4, kind: input, shape index: {}]   ;;  %s5417_s5 = inlined_call_operand.vmem [shape: f32[8,8], index: 5, kind: input, shape index: {}]   ;;  %s5418_s6 = inlined_call_operand.vmem [shape: f32[32,32], index: 6, kind: input, shape index: {}]   ;;  %s5419_s7 = inlined_call_operand.vmem [shape: f32[1,32], index: 7, kind: input, shape index: {}]   ;;  %s5420_s8 = inlined_call_operand.vmem [shape: f32[32,1], index: 8, kind: input, shape index: {}]   ;;  %s5421_s9 = inlined_call_operand.<no memory space> [shape: f32[1,1], index: 9, kind: input, shape index: {}]   ;;  %s5422_s10 = inlined_call_operand.vmem [shape: f32[2,70,64], index: 10, kind: input, shape index: {}]   ;;  %s5423_s11 = inlined_call_operand.vmem [shape: f32[2,1,64], index: 11, kind: input, shape index: {}]   ;;  %s5424_s12 = inlined_call_operand.vmem [shape: f32[2,70,32], index: 12, kind: input, shape index: {}]   ;;  %s5425_s13 = inlined_call_operand.vmem [shape: f32[2,1,32], index: 13, kind: input, shape index: {}]   ;;  %s5426_s14 = inlined_call_operand.vmem [shape: f32[2,32,4], index: 14, kind: input, shape index: {}]   ;;  %s5427_s15 = inlined_call_operand.vmem [shape: f32[2,1,4], index: 15, kind: input, shape index: {}]   ;;  %s5428_s16 = inlined_call_operand.vmem [shape: f32[2,16,4], index: 16, kind: output, shape index: {}]  }
   0x1   :  { %5430 = sst [smem:[#allocation4_spill]] %s5412_s0  ;;  %v21_v0 = vstv %s5421_s9 }
   0x2   :  { %22 = vst [vmem:[#allocation3] sm:$0x1] %v21_v0 }
   0x3 LB: > { %s4739_s24 = sadd.s32 4294967295, %s4635_s23   ;;  %p3789_p0 = scmp.ge.s32.totalorder %s4635_s23, 1  ;;  %s4635_s23 = sphi %s4733_s23, %s28_s23  }
   0x4   : > { %p508_p1 = scmp.lt.s32.totalorder %s4635_s23, 3 }
   0x6   : > { %p509_p2 = pnand %p3789_p0, %p508_p1 }
   0x7   : > { %v608_v1 = vld [vmem:[%s5415_s3] sm:$0xff] (!%p509_p2)  ;;  %vm609_vm0 = vcmask (!%p509_p2), 64512   ;;  %v4637_v2 = vmov (!%p509_p2), 0.0   ;;  %vm4638_vm1 = vmmov (!%p509_p2), 0   ;;  %v791_v3 = vld [vmem:[%s5418_s6 + $0x18] sm:$0xff] (!%p509_p2)  ;;  %v789_v5 = vld [vmem:[%s5418_s6 + $0x8] sm:$0xff] (!%p509_p2) }
   0x8   : > { %512 = sbr.rel (%p509_p2) target bundleno = 6137 (0x17f9), region = 84  ;;  %4043 = vmatprep.subr.mxu1 (!%p509_p2), %v4637_v2  ;;  %4045 = vmatprep.mubr.msk.f32.mxu1 (!%p509_p2), %vm4638_vm1, %v4637_v2  ;;  %v696_v4 = vld [vmem:[%s5416_s4] sm:$0xff] (!%p509_p2)  ;;  %v790_v6 = vld [vmem:[%s5418_s6 + $0x10] sm:$0xff] (!%p509_p2)  ;;  %v941_v9 = vld [vmem:[%s5414_s2 + $0x8] sm:$0xff] (!%p509_p2)  ;;  %vm1248_vm2 = vcmask (!%p509_p2), 261120   ;;  %p607_p3 = scmp.eq.s32.totalorder (!%p509_p2), %s4739_s24, 0 }
   0x9   : > { %4044 = vmatpush3.xpose.msk.msra.mxu1 (!%p509_p2), %vm609_vm0, %v608_v1  ;;  %4053 = vmatprep.subr.mxu0 (!%p509_p2), %v4637_v2  ;;  %v940_v7 = vld [vmem:[%s5414_s2] sm:$0xff] (!%p509_p2)  ;;  %v942_v10 = vld [vmem:[%s5414_s2 + $0x10] sm:$0xff] (!%p509_p2)  ;;  %v943_v11 = vld [vmem:[%s5414_s2 + $0x18] sm:$0xff] (!%p509_p2)  ;;  %s5431_s26 = sld [smem:[#allocation4_spill]] (!%p509_p2)  ;;  %vm1450_vm4 = vcmask (!%p509_p2), 7168   ;;  %vm1459_vm5 = vcmask (!%p509_p2), 23552  }
   0xa   : > { %4048 = vmatprep.subr.mxu1 (!%p509_p2), %v4637_v2  ;;  %4054 = vmatpush3.msra.mxu0 (!%p509_p2), %v791_v3  ;;  %v788_v8 = vld [vmem:[%s5418_s6] sm:$0xff] (!%p509_p2)  ;;  %v945_v13 = vld [vmem:[%s5414_s2 + $0x28] sm:$0xff] (!%p509_p2)  ;;  %v946_v14 = vld [vmem:[%s5414_s2 + $0x30] sm:$0xff] (!%p509_p2)  ;;  %p577_p4 = scmp.lt.s32.totalorder (!%p509_p2), %s4739_s24, 1  ;;  %vm1660_vm6 = vcmask (!%p509_p2), 1045504   ;;  %s4639_s18 = smov (!%p509_p2), 35  }
   0xb   : > { %4055 = vmatprep.mubr.msk.f32.mxu0 (!%p509_p2), %vm4638_vm1, %v4637_v2  ;;  %4058 = vmatprep.subr.mxu0 (!%p509_p2), %v4637_v2  ;;  %v944_v12 = vld [vmem:[%s5414_s2 + $0x20] sm:$0xff] (!%p509_p2)  ;;  %v947_v15 = vld [vmem:[%s5414_s2 + $0x38] sm:$0xff] (!%p509_p2)  ;;  %v933_v17 = vld [vmem:[%s5413_s1 + $0x8] sm:$0xff] (!%p509_p2)  ;;  %vm1644_vm7 = vcmask (!%p509_p2), 285696   ;;  %vm1653_vm8 = vcmask (!%p509_p2), 572416   ;;  %s4640_s22 = smov (!%p509_p2), 99  }
   0xc   : > { %4046 = vmatmul.mubr.msk.f32.vlgmr.msra.gmra.mrb[0].mxu1 (!%p509_p2), %vm609_vm0, %v608_v1  ;;  %4056 = vmatmul.mubr.msk.f32.vlgmr.msra.gmra.mrb[0].mxu0 (!%p509_p2), %vm609_vm0, %v696_v4  ;;  %v932_v16 = vld [vmem:[%s5413_s1] sm:$0xff] (!%p509_p2)  ;;  %v934_v18 = vld [vmem:[%s5413_s1 + $0x10] sm:$0xff] (!%p509_p2)  ;;  %v935_v19 = vld [vmem:[%s5413_s1 + $0x18] sm:$0xff] (!%p509_p2)  ;;  %s4641_s25 = smov (!%p509_p2), 96   ;;  %vm1917_vm9 = vcmask (!%p509_p2), 310272   ;;  %s4643_s19 = smov (!%p509_p2), 3  }
   0xd   : > { %4049 = vmatpush3.xpose.msk.msra.mxu1 (!%p509_p2), %vm609_vm0, %v696_v4  ;;  %4050 = vmatprep.mubr.msk.f32.mxu1 (!%p509_p2), %vm4638_vm1, %v4637_v2  ;;  %v936_v20 = vld [vmem:[%s5413_s1 + $0x20] sm:$0xff] (!%p509_p2)  ;;  %v937_v21 = vld [vmem:[%s5413_s1 + $0x28] sm:$0xff] (!%p509_p2)  ;;  %v938_v22 = vld [vmem:[%s5413_s1 + $0x30] sm:$0xff] (!%p509_p2)  ;;  %s4644_s20 = smov (!%p509_p2), 32   ;;  %vm3676_vm10 = vcmask (!%p509_p2), 31744  }
   0xe   : > { %4063 = vmatprep.subr.mxu1 (!%p509_p2), %v789_v5  ;;  %4059 = vmatpush3.msra.mxu0 (!%p509_p2), %v790_v6  ;;  %v939_v23 = vld [vmem:[%s5413_s1 + $0x38] sm:$0xff] (!%p509_p2)  ;;  %v1237_v24 = vld [vmem:[%s5420_s8] sm:$0xff] (!%p509_p2)  ;;  %v1238_v25 = vld [vmem:[%s5420_s8 + $0x8] sm:$0xff] (!%p509_p2) }
   0xf   : > { %4060 = vmatprep.mubr.msk.f32.mxu0 %vm4638_vm1, %v4637_v2  ;;  %v4370_v26 = vpack.c.bf16 %v1238_v25, %v1237_v24  ;;  %v1239_v27 = vld [vmem:[%s5420_s8 + $0x10] sm:$0xff]  ;;  %v1240_v28 = vld [vmem:[%s5420_s8 + $0x18] sm:$0xff]  ;;  %v3818_v41 = vld [vmem:[%s5419_s7] ss:$0 sm:$0xff]  ;;  %s783_s21 = scalar_select %p607_p3, 1, 0 }
  0x10   : > { %4051 = vmatmul.mubr.msk.f32.vlgmr.msra.gmra.mrb[2].mxu1 %vm609_vm0, %v696_v4  ;;  %v4374_v29 = vpack.c.bf16 %v1240_v28, %v1239_v27  ;;  %s5435_s24 = smov (!%p577_p4, %s4739_s24), 1 }
  0x11   : > { %4064 = vmatpush3.msra.mxu1 %v789_v5  ;;  %4065 = vmatprep.mubr.msk.f32.mxu1 %vm609_vm0, %v940_v7  ;;  %s4524_s29 = smul.u32 72, %s5435_s24 }
  0x12   : > { %4077 = vmatprep.subr.mxu1 %v788_v8  ;;  %4371 = vmatprep.subr.bf16.mxu0 %v4370_v26 }
  0x13   : > { %s581_s17 = scalar_lea.vmem %s5422_s10, %s4524_s29  ;;  %s589_s28 = scalar_lea.vmem %s5424_s12, %s4524_s29 }
  0x14   : > { %4066 = vmatmul.mubr.msk.f32.vlgmr.msra.gmra.mrb[4].mxu1 %vm609_vm0, %v941_v9  ;;  %4061 = vmatmul.mubr.msk.f32.vlgmr.msra.gmra.mrb[0].mxu0 %vm609_vm0, %v608_v1  ;;  %s4642_s29 = smov 38  }
  0x15   : > { %4068 = vmatprep.mubr.msk.f32.mxu1 %vm609_vm0, %v942_v10  ;;  %4078 = vmatpush3.msra.mxu1 %v788_v8 }
  0x16   : > { %4373 = vmatpush3.bf16.msra.mxu0 %v4370_v26 }
  0x17   : > { %4375 = vmatprep.subr.bf16.mxu0 %v4374_v29 }
  0x18   : > { %4069 = vmatmul.mubr.msk.f32.gmra.mrb[6].mxu1 %vm609_vm0, %v943_v11 }
  0x19   : > { %4071 = vmatprep.mubr.msk.f32.mxu1 %vm609_vm0, %v944_v12 }
  0x1a   : > { %4377 = vmatpush3.bf16.msra.mxu0 %v4374_v29 }
  0x1b   : > { %4111 = vmatprep.subr.mxu0 %v4637_v2 }
  0x1c   : > { %4072 = vmatmul.mubr.msk.f32.gmra.mrb[8].mxu1 %vm609_vm0, %v945_v13 }
  0x1d   : > { %4074 = vmatprep.mubr.msk.f32.mxu1 %vm609_vm0, %v946_v14 }
  0x20   : > { %4075 = vmatmul.mubr.msk.f32.gmra.mrb[10].mxu1 %vm609_vm0, %v947_v15 }
  0x21   : > { %4079 = vmatprep.mubr.msk.f32.mxu1 %vm609_vm0, %v932_v16 }
  0x24   : > { %4080 = vmatmul.mubr.msk.f32.vlgmr.msra.gmra.mrb[4].mxu1 %vm609_vm0, %v933_v17 }
  0x25   : > { %4082 = vmatprep.mubr.msk.f32.mxu1 %vm609_vm0, %v934_v18 }
  0x28   : > { %4083 = vmatmul.mubr.msk.f32.gmra.mrb[6].mxu1 %vm609_vm0, %v935_v19 }
  0x29   : > { %4085 = vmatprep.mubr.msk.f32.mxu1 %vm609_vm0, %v936_v20  ;;  %v3819_v20 = vld [vmem:[#allocation3] ss:$0 sm:$0xff] }
  0x2c   : > { %4086 = vmatmul.mubr.msk.f32.gmra.mrb[8].mxu1 %vm609_vm0, %v937_v21 }
  0x2d   : > { %4088 = vmatprep.mubr.msk.f32.mxu1 %vm609_vm0, %v938_v22 }
  0x30   : > { %4089 = vmatmul.mubr.msk.f32.gmra.mrb[10].mxu1 %vm609_vm0, %v939_v23 }
  0xdf   : > { %v679_v30 = vpop.f32.mrb[0].mxu1 }
  0xe0   : > { %v683_v31 = vmax.f32 %v679_v30, 0.0  ;;  %v4047_v32 = vpop.f32.mrb[1].mxu1 }
  0xe2   : > { %v684_v33 = vsel %vm609_vm0, %v683_v31, -inf }
  0xe3   : > { %685 = vmax.xlane.f32.xlu0 %v684_v33  ;;  %v766_v34 = vpop.f32.mrb[2].mxu1 }
  0xe4   : > { %v770_v35 = vmax.f32 %v766_v34, 0.0  ;;  %v4052_v36 = vpop.f32.mrb[3].mxu1 }
  0xe6   : > { %v771_v37 = vsel %vm609_vm0, %v770_v35, -inf }
  0xe7   : > { %772 = vmax.xlane.f32.xlu0 %v771_v37  ;;  %v928_v38 = vpop.f32.mrb[0].mxu0 }
  0xe8   : > { %v4062_v39 = vpop.f32.mrb[1].mxu0 }
  0xf7   : > { %v4081_v40 = vpop.f32.mrb[4].mxu1 }
  0xf8   : > { %v1167_v42 = vpop.f32.mrb[5].mxu1  ;;  %v1207_v43 = vadd.f32 %v4081_v40, %v928_v38 }
  0xf9   : > { %v1206_v44 = vadd.f32 %v1167_v42, %v928_v38 }
  0xfa   : > { %v1222_v45 = vadd.f32 %v3818_v41, %v1207_v43 }
  0xfb   : > { %v1221_v46 = vadd.f32 %v3818_v41, %v1206_v44  ;;  %v4084_v47 = vpop.f32.mrb[6].mxu1 }
  0xfc   : > { %v1209_v48 = vadd.f32 %v4084_v47, %v928_v38  ;;  %v1177_v49 = vpop.f32.mrb[7].mxu1  ;;  %v1230_v50 = vmax.f32 %v1222_v45, 0.0 }
  0xfd   : > { %v1229_v51 = vmax.f32 %v1221_v46, 0.0  ;;  %v1208_v52 = vadd.f32 %v1177_v49, %v928_v38 }
  0xfe   : > { %v1224_v53 = vadd.f32 %v3818_v41, %v1209_v48 }
  0xff   : > { %v1223_v54 = vadd.f32 %v3818_v41, %v1208_v52  ;;  %v4087_v55 = vpop.f32.mrb[8].mxu1  ;;  %4099 = vmatprep.mubr.msk.f32.mxu0 %vm1248_vm2, %v1229_v51 }
 0x100   : > { %v1232_v56 = vmax.f32 %v1224_v53, 0.0  ;;  %v1211_v57 = vadd.f32 %v4087_v55, %v928_v38  ;;  %v1187_v58 = vpop.f32.mrb[9].mxu1  ;;  %4100 = vmatmul.mubr.msk.f32.vlgmr.msra.gmra.mrb[2].mxu0 %vm1248_vm2, %v1230_v50 }
 0x101   : > { %v1231_v59 = vmax.f32 %v1223_v54, 0.0  ;;  %v1210_v60 = vadd.f32 %v1187_v58, %v928_v38 }
 0x102   : > { %v1226_v61 = vadd.f32 %v3818_v41, %v1211_v57 }
 0x103   : > { %v1225_v62 = vadd.f32 %v3818_v41, %v1210_v60  ;;  %v4090_v63 = vpop.f32.mrb[10].mxu1  ;;  %4102 = vmatprep.mubr.msk.f32.mxu0 %vm1248_vm2, %v1231_v59 }
 0x104   : > { %v1234_v0 = vmax.f32 %v1226_v61, 0.0  ;;  %v1213_v1 = vadd.f32 %v4090_v63, %v928_v38  ;;  %v1197_v3 = vpop.f32.mrb[11].mxu1  ;;  %4103 = vmatmul.mubr.msk.f32.gmra.mrb[4].mxu0 %vm1248_vm2, %v1232_v56 }
 0x105   : > { %v1233_v4 = vmax.f32 %v1225_v62, 0.0  ;;  %v1212_v5 = vadd.f32 %v1197_v3, %v928_v38 }
 0x106   : > { %v1228_v6 = vadd.f32 %v3818_v41, %v1213_v1  ;;  %v1419_v1 = vld [vmem:[%s5431_s26 + $0x8] sm:$0xff] }
 0x107   : > { %v1227_v7 = vadd.f32 %v3818_v41, %v1212_v5  ;;  %4105 = vmatprep.mubr.msk.f32.mxu0 %vm1248_vm2, %v1233_v4  ;;  %v784_v4 = vstv %s783_s21  ;;  %v1418_v5 = vld [vmem:[%s5431_s26] sm:$0xff]  ;;  %s584_s21 = scalar_lea.vmem %s5423_s11, %s5435_s24 }
 0x108   : > { %v1236_v8 = vmax.f32 %v1228_v6, 0.0  ;;  %4106 = vmatmul.mubr.msk.f32.gmra.mrb[6].mxu0 %vm1248_vm2, %v1234_v0  ;;  %vm4886_vm3 = vcmp.eq.s32.totalorder %v784_v4, 1 }
 0x109   : > { %v1235_v9 = vmax.f32 %v1227_v7, 0.0 }
 0x10b   : > { %4108 = vmatprep.mubr.msk.f32.mxu0 %vm1248_vm2, %v1235_v9 }
 0x10c   : > { %4109 = vmatmul.mubr.msk.f32.gmra.mrb[8].mxu0 %vm1248_vm2, %v1236_v8 }
 0x10d   : > { %4113 = vmatprep.mubr.msk.f32.mxu0 %vm4638_vm1, %v4637_v2 }
 0x170   : > { %v686_v10 = vpop.xlane.xlu0 %685 }
 0x171   : > { %v687_v11 = vsub.f32 %v683_v31, %v686_v10 }
 0x173   : > { %v688_v12 = vmul.f32 1.442695, %v687_v11 }
 0x174   : > { %v773_v13 = vpop.xlane.xlu0 %772 }
 0x175   : > { %4541 = vpow2.f32 %v688_v12  ;;  %v774_v14 = vsub.f32 %v770_v35, %v773_v13  ;;  %v1421_v13 = vld [vmem:[%s5431_s26 + $0x18] sm:$0xff] }
 0x177   : > { %v775_v15 = vmul.f32 1.442695, %v774_v14 }
 0x179   : > { %4543 = vpow2.f32 %v775_v15  ;;  %v1420_v15 = vld [vmem:[%s5431_s26 + $0x10] sm:$0xff] }
 0x17f   : > { %v4871_v16 = vpop.eup %4541 }
 0x180   : > { %v690_v17 = vsel %vm609_vm0, %v4871_v16, 0.0 }
 0x181   : > { %691 = vadd.xlane.f32.xlu1 %v690_v17 }
 0x183   : > { %v4875_v18 = vpop.eup %4543 }
 0x184   : > { %v777_v19 = vsel %vm609_vm0, %v4875_v18, 0.0 }
 0x185   : > { %778 = vadd.xlane.f32.xlu1 %v777_v19 }
 0x1d3   : > { %v4101_v21 = vpop.f32.mrb[2].mxu0 }
 0x1d4   : > { %v1345_v22 = vadd.f32 %v4101_v21, %v3819_v20  ;;  %v1339_v23 = vpop.f32.mrb[3].mxu0 }
 0x1d5   : > { %v1340_v24 = vadd.f32 %v3819_v20, %v1339_v23 }
 0x1d6   : > { %v1379_v25 = vsub.f32 0.0, %v1345_v22 }
 0x1d7   : > { %v1378_v26 = vsub.f32 0.0, %v1340_v24  ;;  %v4104_v27 = vpop.f32.mrb[4].mxu0 }
 0x1d8   : > { %v1388_v28 = vmul.f32 1.442695, %v1379_v25  ;;  %v1355_v29 = vadd.f32 %v4104_v27, %v3819_v20  ;;  %v1349_v30 = vpop.f32.mrb[5].mxu0  ;;  %v1423_v27 = vld [vmem:[%s5431_s26 + $0x28] sm:$0xff] }
 0x1d9   : > { %v1386_v31 = vmul.f32 1.442695, %v1378_v26  ;;  %v1350_v32 = vadd.f32 %v3819_v20, %v1349_v30  ;;  %v1422_v30 = vld [vmem:[%s5431_s26 + $0x20] sm:$0xff] }
 0x1da   : > { %4545 = vpow2.f32 %v1388_v28  ;;  %v1381_v33 = vsub.f32 0.0, %v1355_v29 }
 0x1db   : > { %4547 = vpow2.f32 %v1386_v31  ;;  %v1380_v34 = vsub.f32 0.0, %v1350_v32  ;;  %v4107_v35 = vpop.f32.mrb[6].mxu0 }
 0x1dc   : > { %v1392_v36 = vmul.f32 1.442695, %v1381_v33  ;;  %v1365_v37 = vadd.f32 %v4107_v35, %v3819_v20  ;;  %v1359_v38 = vpop.f32.mrb[7].mxu0 }
 0x1dd   : > { %v1390_v39 = vmul.f32 1.442695, %v1380_v34  ;;  %v1360_v40 = vadd.f32 %v3819_v20, %v1359_v38 }
 0x1de   : > { %4549 = vpow2.f32 %v1392_v36  ;;  %v1383_v41 = vsub.f32 0.0, %v1365_v37 }
 0x1df   : > { %4551 = vpow2.f32 %v1390_v39  ;;  %v1382_v42 = vsub.f32 0.0, %v1360_v40  ;;  %v4110_v43 = vpop.f32.mrb[8].mxu0  ;;  %v1425_v39 = vld [vmem:[%s5431_s26 + $0x38] sm:$0xff] }
 0x1e0   : > { %v1396_v44 = vmul.f32 1.442695, %v1383_v41  ;;  %v1375_v45 = vadd.f32 %v4110_v43, %v3819_v20  ;;  %v1369_v46 = vpop.f32.mrb[9].mxu0 }
 0x1e1   : > { %v1394_v47 = vmul.f32 1.442695, %v1382_v42  ;;  %v1370_v48 = vadd.f32 %v3819_v20, %v1369_v46  ;;  %v1424_v46 = vld [vmem:[%s5431_s26 + $0x30] sm:$0xff] }
 0x1e2   : > { %4553 = vpow2.f32 %v1396_v44  ;;  %v1385_v49 = vsub.f32 0.0, %v1375_v45 }
 0x1e3   : > { %4555 = vpow2.f32 %v1394_v47  ;;  %v1384_v50 = vsub.f32 0.0, %v1370_v48 }
 0x1e4   : > { %v4546_v51 = vpop.eup %4545  ;;  %v1400_v52 = vmul.f32 1.442695, %v1385_v49 }
 0x1e5   : > { %v4548_v53 = vpop.eup %4547  ;;  %v1403_v54 = vadd.f32 1.0, %v4546_v51  ;;  %v1398_v55 = vmul.f32 1.442695, %v1384_v50 }
 0x1e6   : > { %v1402_v56 = vadd.f32 1.0, %v4548_v53  ;;  %4557 = vpow2.f32 %v1400_v52 }
 0x1e7   : > { %4559 = vrcp.f32 %v1403_v54 }
 0x1e8   : > { %v4550_v57 = vpop.eup %4549  ;;  %4561 = vrcp.f32 %v1402_v56 }
 0x1e9   : > { %v4552_v58 = vpop.eup %4551  ;;  %v1405_v59 = vadd.f32 1.0, %v4550_v57  ;;  %4563 = vpow2.f32 %v1398_v55 }
 0x1ea   : > { %v1404_v60 = vadd.f32 1.0, %v4552_v58 }
 0x1eb   : > { %4565 = vrcp.f32 %v1405_v59 }
 0x1ec   : > { %v4554_v61 = vpop.eup %4553  ;;  %4567 = vrcp.f32 %v1404_v60 }
 0x1ed   : > { %v4556_v62 = vpop.eup %4555  ;;  %v1407_v63 = vadd.f32 1.0, %v4554_v61 }
 0x1ee   : > { %v1406_v0 = vadd.f32 1.0, %v4556_v62 }
 0x1ef   : > { %4569 = vrcp.f32 %v1407_v63 }
 0x1f0   : > { %v4558_v3 = vpop.eup %4557  ;;  %4571 = vrcp.f32 %v1406_v0 }
 0x1f1   : > { %v4560_v6 = vpop.eup %4559  ;;  %v1409_v7 = vadd.f32 1.0, %v4558_v3  ;;  %v606_v3 = vld [vmem:[%s5417_s5] sm:$0xff] }
 0x1f2   : > { %v4562_v8 = vpop.eup %4561  ;;  %v1427_v9 = vmul.f32 %v4560_v6, %v1419_v1 }
 0x1f3   : > { %v4564_v10 = vpop.eup %4563  ;;  %v1426_v12 = vmul.f32 %v4562_v8, %v1418_v5  ;;  %4573 = vrcp.f32 %v1409_v7  ;;  %v1470_v8 = vld [vmem:[%s581_s17 + $0x10] sm:$0xff] }
 0x1f4   : > { %v1435_v14 = vsub.f32 %v1419_v1, %v1427_v9  ;;  %v1408_v17 = vadd.f32 1.0, %v4564_v10  ;;  %v1471_v10 = vld [vmem:[%s581_s17 + $0x18] sm:$0xff] }
 0x1f5   : > { %v4566_v19 = vpop.eup %4565  ;;  %v1434_v20 = vsub.f32 %v1418_v5, %v1426_v12  ;;  %v4979_v11 = vpack.c.bf16 %v1471_v10, %v1470_v8 }
 0x1f6   : > { %v4568_v21 = vpop.eup %4567  ;;  %v1443_v22 = vsel %vm4886_vm3, %v1427_v9, %v1435_v14  ;;  %v1429_v23 = vmul.f32 %v4566_v19, %v1421_v13  ;;  %4575 = vrcp.f32 %v1408_v17  ;;  %v1475_v17 = vld [vmem:[%s581_s17 + $0x38] sm:$0xff] }
 0x1f7   : > { %v1452_v24 = vsel %vm1450_vm4, %v1443_v22, %v1419_v1  ;;  %v1442_v25 = vsel %vm4886_vm3, %v1426_v12, %v1434_v20  ;;  %v1428_v26 = vmul.f32 %v4568_v21, %v1420_v15  ;;  %v1472_v12 = vld [vmem:[%s581_s17 + $0x20] sm:$0xff] }
 0x1f8   : > { %1461 = vst.msk [vmem:[#allocation2 + $0x8] sm:$0xff] %vm1459_vm5, %v1452_v24  ;;  %v1451_v28 = vsel %vm1450_vm4, %v1442_v25, %v1418_v5  ;;  %v1437_v29 = vsub.f32 %v1421_v13, %v1429_v23  ;;  %v4993_v20 = vld [vmem:[%s581_s17 + $0x40] sm:$0x3f] }
 0x1f9   : > { %v4570_v31 = vpop.eup %4569  ;;  %1460 = vst.msk [vmem:[#allocation2] sm:$0xff] %vm1459_vm5, %v1451_v28  ;;  %v1436_v32 = vsub.f32 %v1420_v15, %v1428_v26 }
 0x1fa   : > { %v4572_v33 = vpop.eup %4571  ;;  %v1445_v34 = vsel %vm4886_vm3, %v1429_v23, %v1437_v29  ;;  %v1431_v35 = vmul.f32 %v4570_v31, %v1423_v27  ;;  %v5022_v31 = vld [vmem:[%s584_s21] ss:$0 sm:$0xff] }
 0x1fb   : > { %v1454_v36 = vsel %vm1450_vm4, %v1445_v34, %v1421_v13  ;;  %v1444_v37 = vsel %vm4886_vm3, %v1428_v26, %v1436_v32  ;;  %v1430_v38 = vmul.f32 %v4572_v33, %v1422_v30  ;;  %v1473_v13 = vld [vmem:[%s581_s17 + $0x28] sm:$0xff] }
 0x1fc   : > { %1463 = vst.msk [vmem:[#allocation2 + $0x18] sm:$0xff] %vm1459_vm5, %v1454_v36  ;;  %v1453_v40 = vsel %vm1450_vm4, %v1444_v37, %v1420_v15  ;;  %v1439_v41 = vsub.f32 %v1423_v27, %v1431_v35  ;;  %v4984_v14 = vpack.c.bf16 %v1473_v13, %v1472_v12  ;;  %v1474_v15 = vld [vmem:[%s581_s17 + $0x30] sm:$0xff] }
 0x1fd   : > { %v4574_v42 = vpop.eup %4573  ;;  %1462 = vst.msk [vmem:[#allocation2 + $0x10] sm:$0xff] %vm1459_vm5, %v1453_v40  ;;  %v1438_v43 = vsub.f32 %v1422_v30, %v1430_v38  ;;  %v4989_v19 = vpack.c.bf16 %v1475_v17, %v1474_v15 }
 0x1fe   : > { %v1447_v44 = vsel %vm4886_vm3, %v1431_v35, %v1439_v41  ;;  %v1433_v45 = vmul.f32 %v4574_v42, %v1425_v39 }
 0x1ff   : > { %v1456_v47 = vsel %vm1450_vm4, %v1447_v44, %v1423_v27  ;;  %v1446_v48 = vsel %vm4886_vm3, %v1430_v38, %v1438_v43 }
 0x200   : > { %v4576_v49 = vpop.eup %4575  ;;  %1465 = vst.msk [vmem:[#allocation2 + $0x28] sm:$0xff] %vm1459_vm5, %v1456_v47  ;;  %v1455_v50 = vsel %vm1450_vm4, %v1446_v48, %v1422_v30  ;;  %v1441_v51 = vsub.f32 %v1425_v39, %v1433_v45  ;;  %v4931_v52 = vld [vmem:[#allocation2] sm:$0xff] }
 0x201   : > { %1464 = vst.msk [vmem:[#allocation2 + $0x20] sm:$0xff] %vm1459_vm5, %v1455_v50  ;;  %v1432_v53 = vmul.f32 %v4576_v49, %v1424_v46  ;;  %4112 = vmatpush3.msk.msra.mxu0 %vm1459_vm5, %v4931_v52  ;;  %v1491_v25 = vsel %vm1459_vm5, %v4931_v52, 0.0  ;;  %v1478_v50 = vld [vmem:[%s589_s28] sm:$0xff] }
 0x202   : > { %v1449_v54 = vsel %vm4886_vm3, %v1433_v45, %v1441_v51  ;;  %4116 = vmatprep.subr.mxu0 %v4637_v2  ;;  %v1479_v51 = vld [vmem:[%s589_s28 + $0x8] sm:$0xff] }
 0x203   : > { %v1458_v55 = vsel %vm1450_vm4, %v1449_v54, %v1425_v39  ;;  %v1440_v56 = vsub.f32 %v1424_v46, %v1432_v53  ;;  %v5056_v54 = vpack.c.bf16 %v1479_v51, %v1478_v50 }
 0x204   : > { %1467 = vst.msk [vmem:[#allocation2 + $0x38] sm:$0xff] %vm1459_vm5, %v1458_v55  ;;  %v1481_v55 = vld [vmem:[%s589_s28 + $0x18] sm:$0xff] }
 0x205   : > { %v1448_v57 = vsel %vm4886_vm3, %v1432_v53, %v1440_v56  ;;  %v1480_v53 = vld [vmem:[%s589_s28 + $0x10] sm:$0xff] }
 0x206   : > { %v1457_v58 = vsel %vm1450_vm4, %v1448_v57, %v1424_v46  ;;  %v5058_v56 = vpack.c.bf16 %v1481_v55, %v1480_v53  ;;  %v1482_v57 = vld [vmem:[%s589_s28 + $0x20] sm:$0xff] }
 0x207   : > { %1466 = vst.msk [vmem:[#allocation2 + $0x30] sm:$0xff] %vm1459_vm5, %v1457_v58  ;;  %v1483_v58 = vld [vmem:[%s589_s28 + $0x28] sm:$0xff] }
 0x208   : > { %v4956_v7 = vld [vmem:[#allocation2 + $0x20] sm:$0xff] }
 0x209   : > { %v1492_v28 = vsel %vm1459_vm5, %v4956_v7, 0.0 }
 0x20e   : > { %v692_v59 = vpop.xlane.xlu1 %691 }
 0x20f   : > { %4577 = vrcp.f32 %v692_v59  ;;  %v5063_v59 = vpack.c.bf16 %v1483_v58, %v1482_v57 }
 0x212   : > { %v779_v60 = vpop.xlane.xlu1 %778 }
 0x213   : > { %4579 = vrcp.f32 %v779_v60  ;;  %v1484_v60 = vld [vmem:[%s589_s28 + $0x30] sm:$0xff] }
 0x219   : > { %v4578_v61 = vpop.eup %4577 }
 0x21a   : > { %v694_v62 = vmul.f32 %v4578_v61, %v4871_v16  ;;  %v1468_v16 = vld [vmem:[%s581_s17] sm:$0xff]  ;;  %v1485_v61 = vld [vmem:[%s589_s28 + $0x38] sm:$0xff] }
 0x21c   : > { %v695_v1 = vmul.f32 0.5, %v694_v62  ;;  %v5067_v62 = vpack.c.bf16 %v1485_v61, %v1484_v60 }
 0x21d   : > { %v4580_v63 = vpop.eup %4579 }
 0x21e   : > { %v781_v0 = vmul.f32 %v4580_v63, %v4875_v18  ;;  %v1469_v18 = vld [vmem:[%s581_s17 + $0x8] sm:$0xff]  ;;  %v5072_v63 = vld [vmem:[%s589_s28 + $0x40] sm:$0x3f]  ;;  %s592_s17 = scalar_lea.vmem %s5425_s13, %s5435_s24  ;;  %s600_s28 = scalar_lea.vmem %s5427_s15, %s5435_s24 }
 0x21f   : > { %v4977_v9 = vpack.c.bf16 %v1469_v18, %v1468_v16 }
 0x220   : > { %v782_v4 = vmul.f32 0.5, %v781_v0 }
 0x221   : > { %4379 = vmatprep.subr.bf16.mxu1 %v4977_v9 }
 0x222   : > { %v786_v5 = vsel %vm4886_vm3, %v695_v1, %v782_v4  ;;  %4381 = vmatpush3.bf16.msra.mxu1 %v4977_v9 }
 0x223   : > { %v4952_v6 = vadd.f32 %v786_v5, %v606_v3  ;;  %4383 = vmatprep.subr.bf16.mxu1 %v4979_v11 }
 0x225   : > { %4114 = vmatmul.mubr.msk.f32.vlgmr.msra.gmra.mrb[10].mxu0 %vm609_vm0, %v4952_v6 }
 0x226   : > { %4117 = vmatpush3.msk.msra.mxu0 %vm1459_vm5, %v4956_v7  ;;  %4118 = vmatprep.mubr.msk.f32.mxu0 %vm4638_vm1, %v4637_v2 }
 0x227   : > { %4142 = vmatprep.subr.mxu0 %v4637_v2  ;;  %4385 = vmatpush3.bf16.msra.mxu1 %v4979_v11 }
 0x228   : > { %4387 = vmatprep.subr.bf16.mxu1 %v4984_v14 }
 0x229   : > { %4119 = vmatmul.mubr.msk.f32.vlgmr.msra.gmra.mrb[12].mxu0 %vm609_vm0, %v4952_v6 }
 0x22a   : > { %4144 = vmatprep.mubr.msk.f32.mxu0 %vm4638_vm1, %v4637_v2 }
 0x22b   : > { %4389 = vmatpush3.bf16.msra.mxu1 %v4984_v14 }
 0x22c   : > { %4391 = vmatprep.subr.bf16.mxu1 %v4989_v19 }
 0x22f   : > { %4393 = vmatpush3.bf16.msra.mxu1 %v4989_v19 }
 0x230   : > { %4137 = vmatprep.subr.msk.mxu1 %vm1660_vm6, %v4993_v20 }
 0x233   : > { %4138 = vmatpush3.msk.msra.mxu1 %vm1660_vm6, %v4993_v20 }
 0x234   : > { %4147 = vmatprep.subr.mxu1 %v4637_v2 }
 0x2f8   : > { %v1562_v21 = vpop.f32.mrb[10].mxu0 }
 0x2f9   : > { %1638 = vrot.lane.b32.xlu0 %v1562_v21, %s4639_s18  ;;  %v4115_v22 = vpop.f32.mrb[11].mxu0 }
 0x2fc   : > { %v1632_v23 = vpop.f32.mrb[12].mxu0 }
 0x2fd   : > { %1640 = vrot.lane.b32.xlu1 %v1632_v23, %s4639_s18  ;;  %v4120_v24 = vpop.f32.mrb[13].mxu0 }
 0x36b   : > { %v5004_v26 = vpop.permute.xlu0 %1638 }
 0x36c   : > { %v1645_v27 = vsel %vm1644_vm7, %v1491_v25, %v5004_v26 }
 0x36d   : > { %4139 = vmatprep.mubr.msk.f32.mxu1 %vm1653_vm8, %v1645_v27 }
 0x36f   : > { %v5011_v29 = vpop.permute.xlu1 %1640 }
 0x370   : > { %v1646_v30 = vsel %vm1644_vm7, %v1492_v28, %v5011_v29 }
 0x371   : > { %4140 = vmatmul.mubr.msk.f32.vlgmr.msra.gmra.mrb[12].mxu1 %vm1653_vm8, %v1646_v30 }
 0x372   : > { %4149 = vmatprep.mubr.msk.f32.mxu1 %vm4638_vm1, %v4637_v2 }
 0x444   : > { %v4141_v32 = vpop.f32.mrb[12].mxu1 }
 0x445   : > { %v1736_v33 = vadd.f32 %v4141_v32, %v5022_v31  ;;  %v1730_v34 = vpop.f32.mrb[13].mxu1 }
 0x446   : > { %v1731_v35 = vadd.f32 %v5022_v31, %v1730_v34 }
 0x447   : > { %v1740_v36 = vsub.f32 0.0, %v1736_v33 }
 0x448   : > { %v1739_v37 = vsub.f32 0.0, %v1731_v35  ;;  %v5115_v35 = vld [vmem:[#allocation2 + $0x8] sm:$0xff] }
 0x449   : > { %v1743_v38 = vmul.f32 1.442695, %v1740_v36 }
 0x44a   : > { %v1741_v39 = vmul.f32 1.442695, %v1739_v37 }
 0x44b   : > { %4581 = vpow2.f32 %v1743_v38  ;;  %v5119_v38 = vld [vmem:[#allocation2 + $0x28] sm:$0xff] }
 0x44c   : > { %4583 = vpow2.f32 %v1741_v39 }
 0x455   : > { %v4582_v40 = vpop.eup %4581 }
 0x456   : > { %v4584_v41 = vpop.eup %4583  ;;  %v1746_v42 = vadd.f32 1.0, %v4582_v40 }
 0x457   : > { %v1745_v43 = vadd.f32 1.0, %v4584_v41 }
 0x459   : > { %4585 = vrcp.f32 %v1745_v43 }
 0x45a   : > { %4587 = vrcp.f32 %v1746_v42 }
 0x463   : > { %v5026_v44 = vpop.eup %4585 }
 0x464   : > { %v5029_v45 = vmul.f32 0.0, %v5026_v44  ;;  %v5031_v46 = vpop.eup %4587  ;;  %v2012_v27 = vsub.f32 1.0, %v5026_v44 }
 0x465   : > { %v5038_v47 = vmul.f32 0.0, %v5031_v46  ;;  %v2013_v25 = vsub.f32 1.0, %v5031_v46 }
 0x466   : > { %1899 = vrot.lane.b32.xlu0 %v5029_v45, %s4640_s22  ;;  %1752 = vrot.lane.b32.xlu1 %v5029_v45, %s4641_s25 }
 0x46a   : > { %1826 = vrot.lane.b32.xlu1 %v5038_v47, %s4641_s25 }
 0x46e   : > { %1901 = vrot.lane.b32.xlu1 %v5038_v47, %s4640_s22 }
 0x4d8   : > { %v1753_v48 = vpop.permute.xlu1 %1752  ;;  %v1900_v5 = vpop.permute.xlu0 %1899 }
 0x4d9   : > { %4143 = vmatpush3.msra.mxu0 %v1753_v48  ;;  %v1913_v16 = vsel %vm1459_vm5, %v4931_v52, %v1900_v5  ;;  %v5099_v52 = vld [vmem:[%s592_s17] ss:$0 sm:$0xff] }
 0x4da   : > { %4145 = vmatmul.mubr.msk.f32.vlgmr.msra.gmra.mrb[14].mxu0 %vm609_vm0, %v4952_v6  ;;  %4395 = vmatprep.subr.bf16.mxu0 %v5056_v54  ;;  %v1915_v8 = vsel %vm1644_vm7, %v1913_v16, %v5004_v26 }
 0x4db   : > { %4397 = vmatpush3.bf16.msra.mxu0 %v5056_v54 }
 0x4dc   : > { %v1827_v49 = vpop.permute.xlu1 %1826  ;;  %4399 = vmatprep.subr.bf16.mxu0 %v5058_v56 }
 0x4dd   : > { %4148 = vmatpush3.msra.mxu1 %v1827_v49 }
 0x4de   : > { %4150 = vmatmul.mubr.msk.f32.vlgmr.msra.gmra.mrb[14].mxu1 %vm609_vm0, %v4952_v6  ;;  %4173 = vmatprep.subr.mxu1 %v4637_v2 }
 0x4df   : > { %4175 = vmatprep.mubr.msk.f32.mxu1 %vm4638_vm1, %v4637_v2  ;;  %4401 = vmatpush3.bf16.msra.mxu0 %v5058_v56 }
 0x4e0   : > { %4403 = vmatprep.subr.bf16.mxu0 %v5063_v59  ;;  %v1902_v18 = vpop.permute.xlu1 %1901 }
 0x4e1   : > { %v1914_v12 = vsel %vm1459_vm5, %v4956_v7, %v1902_v18 }
 0x4e2   : > { %v1916_v15 = vsel %vm1644_vm7, %v1914_v12, %v5011_v29 }
 0x4e3   : > { %4405 = vmatpush3.bf16.msra.mxu0 %v5063_v59 }
 0x4e4   : > { %4407 = vmatprep.subr.bf16.mxu0 %v5067_v62 }
 0x4e7   : > { %4409 = vmatpush3.bf16.msra.mxu0 %v5067_v62 }
 0x4e8   : > { %4168 = vmatprep.subr.msk.mxu0 %vm1660_vm6, %v5072_v63 }
 0x4eb   : > { %4169 = vmatpush3.msk.msra.mxu0 %vm1660_vm6, %v5072_v63 }
 0x4ec   : > { %4204 = vmatprep.subr.mxu0 %v4637_v2 }
 0x5ad   : > { %v1821_v0 = vpop.f32.mrb[14].mxu0 }
 0x5ae   : > { %1907 = vrot.lane.b32.xlu0 %v1821_v0, %s4642_s29  ;;  %v4146_v1 = vpop.f32.mrb[15].mxu0 }
 0x5b1   : > { %v1895_v3 = vpop.f32.mrb[14].mxu1 }
 0x5b2   : > { %1909 = vrot.lane.b32.xlu1 %v1895_v3, %s4642_s29  ;;  %v4151_v4 = vpop.f32.mrb[15].mxu1 }
 0x620   : > { %v1908_v10 = vpop.permute.xlu0 %1907 }
 0x621   : > { %v1918_v13 = vsel %vm1917_vm9, %v1915_v8, %v1908_v10 }
 0x622   : > { %4170 = vmatprep.mubr.msk.f32.mxu0 %vm1653_vm8, %v1918_v13 }
 0x624   : > { %v1910_v17 = vpop.permute.xlu1 %1909 }
 0x625   : > { %v1919_v21 = vsel %vm1917_vm9, %v1916_v15, %v1910_v17 }
 0x626   : > { %4171 = vmatmul.mubr.msk.f32.vlgmr.msra.gmra.mrb[16].mxu0 %vm1653_vm8, %v1919_v21 }
 0x627   : > { %4206 = vmatprep.mubr.msk.f32.mxu0 %vm4638_vm1, %v4637_v2 }
 0x6f9   : > { %v4172_v7 = vpop.f32.mrb[16].mxu0 }
 0x6fa   : > { %v2007_v22 = vadd.f32 %v4172_v7, %v5099_v52  ;;  %v2001_v23 = vpop.f32.mrb[17].mxu0 }
 0x6fb   : > { %v2002_v24 = vadd.f32 %v5099_v52, %v2001_v23 }
 0x6fc   : > { %4589 = vtanh.f32 %v2007_v22 }
 0x6fd   : > { %4591 = vtanh.f32 %v2002_v24 }
 0x706   : > { %v4590_v26 = vpop.eup %4589 }
 0x707   : > { %v4592_v28 = vpop.eup %4591  ;;  %v2015_v29 = vmul.f32 %v4590_v26, %v2013_v25 }
 0x708   : > { %v2014_v30 = vmul.f32 %v4592_v28, %v2012_v27 }
 0x709   : > { %v5106_v32 = vadd.f32 %v2015_v29, %v5038_v47 }
 0x70a   : > { %v5109_v33 = vadd.f32 %v2014_v30, %v5029_v45 }
 0x70b   : > { %2026 = vrot.lane.b32.xlu1 %v5106_v32, %s4643_s19 }
 0x70c   : > { %2024 = vrot.lane.b32.xlu0 %v5109_v33, %s4643_s19 }
 0x77d   : > { %v2027_v34 = vpop.permute.xlu1 %2026 }
 0x77e   : > { %v2025_v36 = vpop.permute.xlu0 %2024  ;;  %v2031_v39 = vsel %vm1459_vm5, %v5119_v38, %v2027_v34 }
 0x77f   : > { %v2030_v37 = vsel %vm1459_vm5, %v5115_v35, %v2025_v36 }
 0x780   : > { %4174 = vmatpush3.msra.mxu1 %v2030_v37 }
 0x781   : > { %4176 = vmatmul.mubr.msk.f32.vlgmr.msra.gmra.mrb[16].mxu1 %vm609_vm0, %v4952_v6  ;;  %4178 = vmatprep.subr.mxu1 %v4637_v2 }
 0x782   : > { %4179 = vmatpush3.msra.mxu1 %v2031_v39  ;;  %4180 = vmatprep.mubr.msk.f32.mxu1 %vm4638_vm1, %v4637_v2 }
 0x783   : > { %4411 = vmatprep.subr.bf16.mxu1 %v4977_v9 }
 0x785   : > { %4181 = vmatmul.mubr.msk.f32.vlgmr.msra.gmra.mrb[18].mxu1 %vm609_vm0, %v4952_v6 }
 0x786   : > { %4413 = vmatpush3.bf16.msra.mxu1 %v4977_v9 }
 0x787   : > { %4415 = vmatprep.subr.bf16.mxu1 %v4979_v11 }
 0x78a   : > { %4417 = vmatpush3.bf16.msra.mxu1 %v4979_v11 }
 0x78b   : > { %4419 = vmatprep.subr.bf16.mxu1 %v4984_v14 }
 0x78e   : > { %4421 = vmatpush3.bf16.msra.mxu1 %v4984_v14 }
 0x78f   : > { %4423 = vmatprep.subr.bf16.mxu1 %v4989_v19 }
 0x792   : > { %4425 = vmatpush3.bf16.msra.mxu1 %v4989_v19 }
 0x793   : > { %4199 = vmatprep.subr.msk.mxu1 %vm1660_vm6, %v4993_v20 }
 0x796   : > { %4200 = vmatpush3.msk.msra.mxu1 %vm1660_vm6, %v4993_v20 }
 0x797   : > { %4235 = vmatprep.subr.mxu1 %v4637_v2 }
 0x854   : > { %v2098_v40 = vpop.f32.mrb[16].mxu1 }
 0x855   : > { %2174 = vrot.lane.b32.xlu0 %v2098_v40, %s4639_s18  ;;  %v4177_v41 = vpop.f32.mrb[17].mxu1 }
 0x858   : > { %v2168_v42 = vpop.f32.mrb[18].mxu1 }
 0x859   : > { %2273 = vrot.lane.b32.xlu0 %v5109_v33, %s4644_s20  ;;  %2176 = vrot.lane.b32.xlu1 %v2168_v42, %s4639_s18  ;;  %v4182_v43 = vpop.f32.mrb[19].mxu1 }
 0x85d   : > { %2275 = vrot.lane.b32.xlu1 %v5106_v32, %s4644_s20 }
 0x8c7   : > { %v2175_v44 = vpop.permute.xlu0 %2174 }
 0x8c8   : > { %v2180_v45 = vsel %vm1644_vm7, %v2030_v37, %v2175_v44 }
 0x8c9   : > { %4201 = vmatprep.mubr.msk.f32.mxu1 %vm1653_vm8, %v2180_v45 }
 0x8cb   : > { %v5151_v46 = vpop.permute.xlu1 %2176  ;;  %v2274_v16 = vpop.permute.xlu0 %2273 }
 0x8cc   : > { %v2181_v47 = vsel %vm1644_vm7, %v2031_v39, %v5151_v46 }
 0x8cd   : > { %4202 = vmatmul.mubr.msk.f32.vlgmr.msra.gmra.mrb[20].mxu1 %vm1653_vm8, %v2181_v47 }
 0x8ce   : > { %4237 = vmatprep.mubr.msk.f32.mxu1 %vm4638_vm1, %v4637_v2 }
 0x8cf   : > { %v2276_v4 = vpop.permute.xlu1 %2275 }
 0x9a0   : > { %v4203_v48 = vpop.f32.mrb[20].mxu1 }
 0x9a1   : > { %v2260_v49 = vadd.f32 %v4203_v48, %v5022_v31  ;;  %v2254_v50 = vpop.f32.mrb[21].mxu1 }
 0x9a2   : > { %v2255_v51 = vadd.f32 %v5022_v31, %v2254_v50 }
 0x9a3   : > { %v2264_v53 = vsub.f32 0.0, %v2260_v49  ;;  %v5211_v49 = vld [vmem:[#allocation2 + $0x10] sm:$0xff] }
 0x9a4   : > { %v2263_v55 = vsub.f32 0.0, %v2255_v51  ;;  %v5215_v51 = vld [vmem:[#allocation2 + $0x30] sm:$0xff] }
 0x9a5   : > { %v2267_v57 = vmul.f32 1.442695, %v2264_v53 }
 0x9a6   : > { %v2265_v58 = vmul.f32 1.442695, %v2263_v55 }
 0x9a7   : > { %4593 = vpow2.f32 %v2267_v57 }
 0x9a8   : > { %4595 = vpow2.f32 %v2265_v58 }
 0x9b1   : > { %v4594_v60 = vpop.eup %4593 }
 0x9b2   : > { %v4596_v61 = vpop.eup %4595  ;;  %v2270_v0 = vadd.f32 1.0, %v4594_v60 }
 0x9b3   : > { %v2269_v1 = vadd.f32 1.0, %v4596_v61 }
 0x9b4   : > { %4597 = vrcp.f32 %v2270_v0 }
 0x9b5   : > { %4599 = vrcp.f32 %v2269_v1 }
 0x9be   : > { %v4598_v3 = vpop.eup %4597 }
 0x9bf   : > { %v4600_v5 = vpop.eup %4599  ;;  %v2280_v18 = vmul.f32 %v4598_v3, %v2276_v4  ;;  %v2533_v42 = vmul.f32 %v4598_v3, %v5106_v32 }
 0x9c0   : > { %v2279_v8 = vmul.f32 %v4600_v5, %v2274_v16  ;;  %v2534_v40 = vsub.f32 1.0, %v4600_v5 }
 0x9c1   : > { %2356 = vrot.lane.b32.xlu1 %v2280_v18, %s4641_s25 }
 0x9c2   : > { %2282 = vrot.lane.b32.xlu0 %v2279_v8, %s4641_s25 }
 0x9c5   : > { %2431 = vrot.lane.b32.xlu1 %v2280_v18, %s4640_s22 }
 0x9c6   : > { %2429 = vrot.lane.b32.xlu0 %v2279_v8, %s4640_s22 }
 0xa33   : > { %v2357_v12 = vpop.permute.xlu1 %2356 }
 0xa34   : > { %v2283_v10 = vpop.permute.xlu0 %2282 }
 0xa35   : > { %4205 = vmatpush3.msra.mxu0 %v2283_v10 }
 0xa36   : > { %4207 = vmatmul.mubr.msk.f32.vlgmr.msra.gmra.mrb[18].mxu0 %vm609_vm0, %v4952_v6  ;;  %4209 = vmatprep.subr.mxu0 %v4637_v2 }
 0xa37   : > { %4210 = vmatpush3.msra.mxu0 %v2357_v12  ;;  %4211 = vmatprep.mubr.msk.f32.mxu0 %vm4638_vm1, %v4637_v2  ;;  %v2432_v23 = vpop.permute.xlu1 %2431 }
 0xa38   : > { %4427 = vmatprep.subr.bf16.mxu0 %v5056_v54  ;;  %v2430_v7 = vpop.permute.xlu0 %2429  ;;  %v2444_v26 = vsel %vm1459_vm5, %v5119_v38, %v2432_v23  ;;  %v2535_v38 = vsub.f32 1.0, %v4598_v3 }
 0xa39   : > { %v2443_v22 = vsel %vm1459_vm5, %v5115_v35, %v2430_v7  ;;  %v2446_v28 = vsel %vm1644_vm7, %v2444_v26, %v5151_v46 }
 0xa3a   : > { %4212 = vmatmul.mubr.msk.f32.vlgmr.msra.gmra.mrb[20].mxu0 %vm609_vm0, %v4952_v6  ;;  %v2445_v24 = vsel %vm1644_vm7, %v2443_v22, %v2175_v44  ;;  %v2532_v44 = vmul.f32 %v4600_v5, %v5109_v33 }
 0xa3b   : > { %4429 = vmatpush3.bf16.msra.mxu0 %v5056_v54 }
 0xa3c   : > { %4431 = vmatprep.subr.bf16.mxu0 %v5058_v56 }
 0xa3f   : > { %4433 = vmatpush3.bf16.msra.mxu0 %v5058_v56 }
 0xa40   : > { %4435 = vmatprep.subr.bf16.mxu0 %v5063_v59 }
 0xa43   : > { %4437 = vmatpush3.bf16.msra.mxu0 %v5063_v59 }
 0xa44   : > { %4439 = vmatprep.subr.bf16.mxu0 %v5067_v62 }
 0xa47   : > { %4441 = vmatpush3.bf16.msra.mxu0 %v5067_v62 }
 0xa48   : > { %4230 = vmatprep.subr.msk.mxu0 %vm1660_vm6, %v5072_v63 }
 0xa4b   : > { %4231 = vmatpush3.msk.msra.mxu0 %vm1660_vm6, %v5072_v63 }
 0xa4c   : > { %4266 = vmatprep.subr.mxu0 %v4637_v2 }
 0xb09   : > { %v2351_v13 = vpop.f32.mrb[18].mxu0 }
 0xb0a   : > { %2437 = vrot.lane.b32.xlu0 %v2351_v13, %s4642_s29  ;;  %v4208_v15 = vpop.f32.mrb[19].mxu0 }
 0xb0d   : > { %v2425_v17 = vpop.f32.mrb[20].mxu0 }
 0xb0e   : > { %2439 = vrot.lane.b32.xlu1 %v2425_v17, %s4642_s29  ;;  %v4213_v21 = vpop.f32.mrb[21].mxu0 }
 0xb7c   : > { %v2438_v25 = vpop.permute.xlu0 %2437 }
 0xb7d   : > { %v2447_v27 = vsel %vm1917_vm9, %v2445_v24, %v2438_v25 }
 0xb7e   : > { %4232 = vmatprep.mubr.msk.f32.mxu0 %vm1653_vm8, %v2447_v27 }
 0xb80   : > { %v2440_v29 = vpop.permute.xlu1 %2439 }
 0xb81   : > { %v2448_v30 = vsel %vm1917_vm9, %v2446_v28, %v2440_v29 }
 0xb82   : > { %4233 = vmatmul.mubr.msk.f32.vlgmr.msra.gmra.mrb[22].mxu0 %vm1653_vm8, %v2448_v30 }
 0xb83   : > { %4268 = vmatprep.mubr.msk.f32.mxu0 %vm4638_vm1, %v4637_v2 }
 0xc55   : > { %v4234_v34 = vpop.f32.mrb[22].mxu0 }
 0xc56   : > { %v2527_v35 = vadd.f32 %v4234_v34, %v5099_v52  ;;  %v2521_v36 = vpop.f32.mrb[23].mxu0 }
 0xc57   : > { %v2522_v37 = vadd.f32 %v5099_v52, %v2521_v36 }
 0xc58   : > { %4601 = vtanh.f32 %v2527_v35 }
 0xc59   : > { %4603 = vtanh.f32 %v2522_v37 }
 0xc62   : > { %v4602_v39 = vpop.eup %4601 }
 0xc63   : > { %v4604_v41 = vpop.eup %4603  ;;  %v2537_v43 = vmul.f32 %v4602_v39, %v2535_v38 }
 0xc64   : > { %v2536_v45 = vmul.f32 %v4604_v41, %v2534_v40 }
 0xc65   : > { %v5203_v46 = vadd.f32 %v2537_v43, %v2533_v42 }
 0xc66   : > { %v5205_v47 = vadd.f32 %v2536_v45, %v2532_v44 }
 0xc67   : > { %2548 = vrot.lane.b32.xlu1 %v5203_v46, %s4643_s19 }
 0xc68   : > { %2546 = vrot.lane.b32.xlu0 %v5205_v47, %s4643_s19 }
 0xcd9   : > { %v2549_v48 = vpop.permute.xlu1 %2548 }
 0xcda   : > { %v2547_v50 = vpop.permute.xlu0 %2546  ;;  %v2553_v33 = vsel %vm1459_vm5, %v5215_v51, %v2549_v48 }
 0xcdb   : > { %v2552_v32 = vsel %vm1459_vm5, %v5211_v49, %v2547_v50 }
 0xcdc   : > { %4236 = vmatpush3.msra.mxu1 %v2552_v32 }
 0xcdd   : > { %4238 = vmatmul.mubr.msk.f32.vlgmr.msra.gmra.mrb[22].mxu1 %vm609_vm0, %v4952_v6  ;;  %4240 = vmatprep.subr.mxu1 %v4637_v2 }
 0xcde   : > { %4241 = vmatpush3.msra.mxu1 %v2553_v33  ;;  %4242 = vmatprep.mubr.msk.f32.mxu1 %vm4638_vm1, %v4637_v2 }
 0xcdf   : > { %4443 = vmatprep.subr.bf16.mxu1 %v4977_v9 }
 0xce1   : > { %4243 = vmatmul.mubr.msk.f32.vlgmr.msra.gmra.mrb[24].mxu1 %vm609_vm0, %v4952_v6 }
 0xce2   : > { %4445 = vmatpush3.bf16.msra.mxu1 %v4977_v9 }
 0xce3   : > { %4447 = vmatprep.subr.bf16.mxu1 %v4979_v11 }
 0xce6   : > { %4449 = vmatpush3.bf16.msra.mxu1 %v4979_v11 }
 0xce7   : > { %4451 = vmatprep.subr.bf16.mxu1 %v4984_v14 }
 0xcea   : > { %4453 = vmatpush3.bf16.msra.mxu1 %v4984_v14 }
 0xceb   : > { %4455 = vmatprep.subr.bf16.mxu1 %v4989_v19 }
 0xcee   : > { %4457 = vmatpush3.bf16.msra.mxu1 %v4989_v19 }
 0xcef   : > { %4261 = vmatprep.subr.msk.mxu1 %vm1660_vm6, %v4993_v20 }
 0xcf2   : > { %4262 = vmatpush3.msk.msra.mxu1 %vm1660_vm6, %v4993_v20 }
 0xcf3   : > { %4297 = vmatprep.subr.mxu1 %v4637_v2 }
 0xdb0   : > { %v2620_v53 = vpop.f32.mrb[22].mxu1 }
 0xdb1   : > { %2696 = vrot.lane.b32.xlu0 %v2620_v53, %s4639_s18  ;;  %v4239_v55 = vpop.f32.mrb[23].mxu1 }
 0xdb4   : > { %v2690_v57 = vpop.f32.mrb[24].mxu1 }
 0xdb5   : > { %2795 = vrot.lane.b32.xlu0 %v5205_v47, %s4644_s20  ;;  %2698 = vrot.lane.b32.xlu1 %v2690_v57, %s4639_s18  ;;  %v4244_v58 = vpop.f32.mrb[25].mxu1 }
 0xdb9   : > { %2797 = vrot.lane.b32.xlu1 %v5203_v46, %s4644_s20 }
 0xe23   : > { %v2697_v60 = vpop.permute.xlu0 %2696 }
 0xe24   : > { %v2702_v61 = vsel %vm1644_vm7, %v2552_v32, %v2697_v60 }
 0xe25   : > { %4263 = vmatprep.mubr.msk.f32.mxu1 %vm1653_vm8, %v2702_v61 }
 0xe27   : > { %v5247_v0 = vpop.permute.xlu1 %2698  ;;  %v2796_v24 = vpop.permute.xlu0 %2795 }
 0xe28   : > { %v2703_v1 = vsel %vm1644_vm7, %v2553_v33, %v5247_v0 }
 0xe29   : > { %4264 = vmatmul.mubr.msk.f32.vlgmr.msra.gmra.mrb[26].mxu1 %vm1653_vm8, %v2703_v1 }
 0xe2a   : > { %4299 = vmatprep.mubr.msk.f32.mxu1 %vm4638_vm1, %v4637_v2 }
 0xe2b   : > { %v2798_v22 = vpop.permute.xlu1 %2797 }
 0xefc   : > { %v4265_v3 = vpop.f32.mrb[26].mxu1 }
 0xefd   : > { %v2782_v4 = vadd.f32 %v4265_v3, %v5022_v31  ;;  %v2776_v5 = vpop.f32.mrb[27].mxu1 }
 0xefe   : > { %v2777_v16 = vadd.f32 %v5022_v31, %v2776_v5 }
 0xeff   : > { %v2786_v18 = vsub.f32 0.0, %v2782_v4  ;;  %v5307_v4 = vld [vmem:[#allocation2 + $0x18] sm:$0xff] }
 0xf00   : > { %v2785_v8 = vsub.f32 0.0, %v2777_v16  ;;  %v5311_v16 = vld [vmem:[#allocation2 + $0x38] sm:$0xff] }
 0xf01   : > { %v2789_v10 = vmul.f32 1.442695, %v2786_v18 }
 0xf02   : > { %v2787_v12 = vmul.f32 1.442695, %v2785_v8 }
 0xf03   : > { %4605 = vpow2.f32 %v2789_v10 }
 0xf04   : > { %4607 = vpow2.f32 %v2787_v12 }
 0xf0d   : > { %v4606_v13 = vpop.eup %4605 }
 0xf0e   : > { %v4608_v15 = vpop.eup %4607  ;;  %v2792_v17 = vadd.f32 1.0, %v4606_v13 }
 0xf0f   : > { %v2791_v21 = vadd.f32 1.0, %v4608_v15 }
 0xf10   : > { %4609 = vrcp.f32 %v2792_v17 }
 0xf11   : > { %4611 = vrcp.f32 %v2791_v21 }
 0xf1a   : > { %v4610_v7 = vpop.eup %4609 }
 0xf1b   : > { %v4612_v23 = vpop.eup %4611  ;;  %v2802_v25 = vmul.f32 %v4610_v7, %v2798_v22  ;;  %v3055_v57 = vmul.f32 %v4610_v7, %v5203_v46 }
 0xf1c   : > { %v2801_v26 = vmul.f32 %v4612_v23, %v2796_v24  ;;  %v3056_v53 = vsub.f32 1.0, %v4612_v23 }
 0xf1d   : > { %2878 = vrot.lane.b32.xlu1 %v2802_v25, %s4641_s25 }
 0xf1e   : > { %2804 = vrot.lane.b32.xlu0 %v2801_v26, %s4641_s25 }
 0xf21   : > { %2953 = vrot.lane.b32.xlu1 %v2802_v25, %s4640_s22 }
 0xf22   : > { %2951 = vrot.lane.b32.xlu0 %v2801_v26, %s4640_s22 }
 0xf8f   : > { %v2879_v28 = vpop.permute.xlu1 %2878 }
 0xf90   : > { %v2805_v27 = vpop.permute.xlu0 %2804 }
 0xf91   : > { %4267 = vmatpush3.msra.mxu0 %v2805_v27 }
 0xf92   : > { %4269 = vmatmul.mubr.msk.f32.vlgmr.msra.gmra.mrb[24].mxu0 %vm609_vm0, %v4952_v6  ;;  %4271 = vmatprep.subr.mxu0 %v4637_v2 }
 0xf93   : > { %4272 = vmatpush3.msra.mxu0 %v2879_v28  ;;  %4273 = vmatprep.mubr.msk.f32.mxu0 %vm4638_vm1, %v4637_v2  ;;  %v2954_v38 = vpop.permute.xlu1 %2953 }
 0xf94   : > { %4459 = vmatprep.subr.bf16.mxu0 %v5056_v54  ;;  %v2952_v36 = vpop.permute.xlu0 %2951  ;;  %v2966_v41 = vsel %vm1459_vm5, %v5215_v51, %v2954_v38  ;;  %v3057_v51 = vsub.f32 1.0, %v4610_v7 }
 0xf95   : > { %v2965_v37 = vsel %vm1459_vm5, %v5211_v49, %v2952_v36  ;;  %v2968_v43 = vsel %vm1644_vm7, %v2966_v41, %v5247_v0 }
 0xf96   : > { %4274 = vmatmul.mubr.msk.f32.vlgmr.msra.gmra.mrb[26].mxu0 %vm609_vm0, %v4952_v6  ;;  %v2967_v39 = vsel %vm1644_vm7, %v2965_v37, %v2697_v60  ;;  %v3054_v60 = vmul.f32 %v4612_v23, %v5205_v47 }
 0xf97   : > { %4461 = vmatpush3.bf16.msra.mxu0 %v5056_v54 }
 0xf98   : > { %4463 = vmatprep.subr.bf16.mxu0 %v5058_v56 }
 0xf9b   : > { %4465 = vmatpush3.bf16.msra.mxu0 %v5058_v56 }
 0xf9c   : > { %4467 = vmatprep.subr.bf16.mxu0 %v5063_v59 }
 0xf9f   : > { %4469 = vmatpush3.bf16.msra.mxu0 %v5063_v59 }
 0xfa0   : > { %4471 = vmatprep.subr.bf16.mxu0 %v5067_v62 }
 0xfa3   : > { %4473 = vmatpush3.bf16.msra.mxu0 %v5067_v62 }
 0xfa4   : > { %4292 = vmatprep.subr.msk.mxu0 %vm1660_vm6, %v5072_v63 }
 0xfa7   : > { %4293 = vmatpush3.msk.msra.mxu0 %vm1660_vm6, %v5072_v63 }
 0xfa8   : > { %4328 = vmatprep.subr.mxu0 %v4637_v2 }
0x1065   : > { %v2873_v29 = vpop.f32.mrb[24].mxu0 }
0x1066   : > { %2959 = vrot.lane.b32.xlu0 %v2873_v29, %s4642_s29  ;;  %v4270_v30 = vpop.f32.mrb[25].mxu0 }
0x1069   : > { %v2947_v34 = vpop.f32.mrb[26].mxu0 }
0x106a   : > { %2961 = vrot.lane.b32.xlu1 %v2947_v34, %s4642_s29  ;;  %v4275_v35 = vpop.f32.mrb[27].mxu0 }
0x10d8   : > { %v2960_v40 = vpop.permute.xlu0 %2959 }
0x10d9   : > { %v2969_v42 = vsel %vm1917_vm9, %v2967_v39, %v2960_v40 }
0x10da   : > { %4294 = vmatprep.mubr.msk.f32.mxu0 %vm1653_vm8, %v2969_v42 }
0x10dc   : > { %v2962_v44 = vpop.permute.xlu1 %2961 }
0x10dd   : > { %v2970_v45 = vsel %vm1917_vm9, %v2968_v43, %v2962_v44 }
0x10de   : > { %4295 = vmatmul.mubr.msk.f32.vlgmr.msra.gmra.mrb[28].mxu0 %vm1653_vm8, %v2970_v45 }
0x10df   : > { %4330 = vmatprep.mubr.msk.f32.mxu0 %vm4638_vm1, %v4637_v2 }
0x11b1   : > { %v4296_v48 = vpop.f32.mrb[28].mxu0 }
0x11b2   : > { %v3049_v49 = vadd.f32 %v4296_v48, %v5099_v52  ;;  %v3043_v50 = vpop.f32.mrb[29].mxu0 }
0x11b3   : > { %v3044_v32 = vadd.f32 %v5099_v52, %v3043_v50 }
0x11b4   : > { %4613 = vtanh.f32 %v3049_v49 }
0x11b5   : > { %4615 = vtanh.f32 %v3044_v32 }
0x11be   : > { %v4614_v33 = vpop.eup %4613 }
0x11bf   : > { %v4616_v55 = vpop.eup %4615  ;;  %v3059_v58 = vmul.f32 %v4614_v33, %v3057_v51 }
0x11c0   : > { %v3058_v61 = vmul.f32 %v4616_v55, %v3056_v53 }
0x11c1   : > { %v5299_v0 = vadd.f32 %v3059_v58, %v3055_v57 }
0x11c2   : > { %v5301_v1 = vadd.f32 %v3058_v61, %v3054_v60 }
0x11c3   : > { %3070 = vrot.lane.b32.xlu1 %v5299_v0, %s4643_s19 }
0x11c4   : > { %3068 = vrot.lane.b32.xlu0 %v5301_v1, %s4643_s19 }
0x1235   : > { %v3071_v3 = vpop.permute.xlu1 %3070 }
0x1236   : > { %v3069_v5 = vpop.permute.xlu0 %3068  ;;  %v3075_v47 = vsel %vm1459_vm5, %v5311_v16, %v3071_v3 }
0x1237   : > { %v3074_v46 = vsel %vm1459_vm5, %v5307_v4, %v3069_v5 }
0x1238   : > { %4298 = vmatpush3.msra.mxu1 %v3074_v46 }
0x1239   : > { %4300 = vmatmul.mubr.msk.f32.vlgmr.msra.gmra.mrb[28].mxu1 %vm609_vm0, %v4952_v6  ;;  %4302 = vmatprep.subr.mxu1 %v4637_v2 }
0x123a   : > { %4303 = vmatpush3.msra.mxu1 %v3075_v47  ;;  %4304 = vmatprep.mubr.msk.f32.mxu1 %vm4638_vm1, %v4637_v2 }
0x123b   : > { %4475 = vmatprep.subr.bf16.mxu1 %v4977_v9 }
0x123d   : > { %4305 = vmatmul.mubr.msk.f32.vlgmr.msra.gmra.mrb[30].mxu1 %vm609_vm0, %v4952_v6 }
0x123e   : > { %4477 = vmatpush3.bf16.msra.mxu1 %v4977_v9 }
0x123f   : > { %4479 = vmatprep.subr.bf16.mxu1 %v4979_v11 }
0x1242   : > { %4481 = vmatpush3.bf16.msra.mxu1 %v4979_v11 }
0x1243   : > { %4483 = vmatprep.subr.bf16.mxu1 %v4984_v14 }
0x1246   : > { %4485 = vmatpush3.bf16.msra.mxu1 %v4984_v14 }
0x1247   : > { %4487 = vmatprep.subr.bf16.mxu1 %v4989_v19 }
0x124a   : > { %4489 = vmatpush3.bf16.msra.mxu1 %v4989_v19 }
0x124b   : > { %4323 = vmatprep.subr.msk.mxu1 %vm1660_vm6, %v4993_v20 }
0x124e   : > { %4324 = vmatpush3.msk.msra.mxu1 %vm1660_vm6, %v4993_v20 }
0x130c   : > { %v3142_v18 = vpop.f32.mrb[28].mxu1 }
0x130d   : > { %3218 = vrot.lane.b32.xlu0 %v3142_v18, %s4639_s18  ;;  %v4301_v9 = vpop.f32.mrb[29].mxu1 }
0x1310   : > { %v3212_v8 = vpop.f32.mrb[30].mxu1 }
0x1311   : > { %3317 = vrot.lane.b32.xlu0 %v5301_v1, %s4644_s20  ;;  %3220 = vrot.lane.b32.xlu1 %v3212_v8, %s4639_s18  ;;  %v4306_v11 = vpop.f32.mrb[31].mxu1  ;;  %s3877_s18 = sshll.u32 %s5435_s24, 5 }
0x1315   : > { %3319 = vrot.lane.b32.xlu1 %v5299_v0, %s4644_s20 }
0x137f   : > { %v3219_v14 = vpop.permute.xlu0 %3218 }
0x1380   : > { %v3224_v19 = vsel %vm1644_vm7, %v3074_v46, %v3219_v14 }
0x1381   : > { %4325 = vmatprep.mubr.msk.f32.mxu1 %vm1653_vm8, %v3224_v19 }
0x1383   : > { %v3221_v20 = vpop.permute.xlu1 %3220  ;;  %v3318_v34 = vpop.permute.xlu0 %3317 }
0x1384   : > { %v3225_v10 = vsel %vm1644_vm7, %v3075_v47, %v3221_v20 }
0x1385   : > { %4326 = vmatmul.mubr.msk.f32.vlgmr.msra.gmra.mrb[32].mxu1 %vm1653_vm8, %v3225_v10 }
0x1387   : > { %v3320_v29 = vpop.permute.xlu1 %3319 }
0x1458   : > { %v4327_v12 = vpop.f32.mrb[32].mxu1 }
0x1459   : > { %v3304_v13 = vadd.f32 %v4327_v12, %v5022_v31  ;;  %v3298_v15 = vpop.f32.mrb[33].mxu1 }
0x145a   : > { %v3299_v17 = vadd.f32 %v5022_v31, %v3298_v15 }
0x145b   : > { %v3308_v21 = vsub.f32 0.0, %v3304_v13 }
0x145c   : > { %v3307_v7 = vsub.f32 0.0, %v3299_v17 }
0x145d   : > { %v3311_v22 = vmul.f32 1.442695, %v3308_v21 }
0x145e   : > { %v3309_v23 = vmul.f32 1.442695, %v3307_v7 }
0x145f   : > { %4617 = vpow2.f32 %v3311_v22 }
0x1460   : > { %4619 = vpow2.f32 %v3309_v23 }
0x1469   : > { %v4618_v24 = vpop.eup %4617 }
0x146a   : > { %v4620_v25 = vpop.eup %4619  ;;  %v3314_v26 = vadd.f32 1.0, %v4618_v24 }
0x146b   : > { %v3313_v27 = vadd.f32 1.0, %v4620_v25 }
0x146c   : > { %4621 = vrcp.f32 %v3314_v26 }
0x146d   : > { %4623 = vrcp.f32 %v3313_v27 }
0x1476   : > { %v5346_v28 = vpop.eup %4621 }
0x1477   : > { %v5348_v30 = vpop.eup %4623  ;;  %v3324_v31 = vmul.f32 %v5346_v28, %v3320_v29  ;;  %v3579_v58 = vsub.f32 1.0, %v5346_v28  ;;  %v3577_v5 = vmul.f32 %v5346_v28, %v5299_v0 }
0x1478   : > { %v3323_v35 = vmul.f32 %v5348_v30, %v3318_v34  ;;  %v3578_v61 = vsub.f32 1.0, %v5348_v30  ;;  %v3576_v46 = vmul.f32 %v5348_v30, %v5301_v1 }
0x1479   : > { %3400 = vrot.lane.b32.xlu1 %v3324_v31, %s4641_s25 }
0x147a   : > { %3326 = vrot.lane.b32.xlu0 %v3323_v35, %s4641_s25  ;;  %s597_s25 = scalar_lea.vmem %s5426_s14, %s3877_s18 }
0x147b   : > { %v3584_v45 = vld [vmem:[%s597_s25] sm:$0xff]  ;;  %v3585_v48 = vld [vmem:[%s597_s25 + $0x8] sm:$0xff]  ;;  %v3586_v50 = vld [vmem:[%s597_s25 + $0x10] sm:$0xff] }
0x147c   : > { %v4506_v49 = vpack.c.bf16 %v3585_v48, %v3584_v45  ;;  %v3587_v32 = vld [vmem:[%s597_s25 + $0x18] sm:$0xff] }
0x147d   : > { %3475 = vrot.lane.b32.xlu1 %v3324_v31, %s4640_s22  ;;  %v4510_v51 = vpack.c.bf16 %v3587_v32, %v3586_v50 }
0x147e   : > { %3473 = vrot.lane.b32.xlu0 %v3323_v35, %s4640_s22  ;;  %4507 = vmatprep.subr.bf16.mxu1 %v4506_v49 }
0x147f   : > { %4509 = vmatpush3.bf16.msra.mxu1 %v4506_v49 }
0x1480   : > { %4511 = vmatprep.subr.bf16.mxu1 %v4510_v51 }
0x1483   : > { %4513 = vmatpush3.bf16.msra.mxu1 %v4510_v51 }
0x14eb   : > { %v3401_v37 = vpop.permute.xlu1 %3400 }
0x14ec   : > { %v3327_v36 = vpop.permute.xlu0 %3326 }
0x14ed   : > { %4329 = vmatpush3.msra.mxu0 %v3327_v36 }
0x14ee   : > { %4331 = vmatmul.mubr.msk.f32.vlgmr.msra.gmra.mrb[30].mxu0 %vm609_vm0, %v4952_v6  ;;  %4333 = vmatprep.subr.mxu0 %v4637_v2 }
0x14ef   : > { %4334 = vmatpush3.msra.mxu0 %v3401_v37  ;;  %4335 = vmatprep.mubr.msk.f32.mxu0 %vm4638_vm1, %v4637_v2 }
0x14f0   : > { %4491 = vmatprep.subr.bf16.mxu0 %v5056_v54 }
0x14f2   : > { %4336 = vmatmul.mubr.msk.f32.vlgmr.msra.gmra.mrb[32].mxu0 %vm609_vm0, %v4952_v6 }
0x14f3   : > { %4493 = vmatpush3.bf16.msra.mxu0 %v5056_v54 }
0x14f4   : > { %4495 = vmatprep.subr.bf16.mxu0 %v5058_v56 }
0x14f7   : > { %4497 = vmatpush3.bf16.msra.mxu0 %v5058_v56 }
0x14f8   : > { %4499 = vmatprep.subr.bf16.mxu0 %v5063_v59 }
0x14fb   : > { %4501 = vmatpush3.bf16.msra.mxu0 %v5063_v59  ;;  %v3474_v59 = vpop.permute.xlu0 %3473 }
0x14fc   : > { %4503 = vmatprep.subr.bf16.mxu0 %v5067_v62  ;;  %v3487_v38 = vsel %vm1459_vm5, %v5307_v4, %v3474_v59 }
0x14fd   : > { %v3489_v39 = vsel %vm1644_vm7, %v3487_v38, %v3219_v14 }
0x14ff   : > { %4505 = vmatpush3.bf16.msra.mxu0 %v5067_v62  ;;  %v3476_v62 = vpop.permute.xlu1 %3475 }
0x1500   : > { %4354 = vmatprep.subr.msk.mxu0 %vm1660_vm6, %v5072_v63 }
0x1503   : > { %4355 = vmatpush3.msk.msra.mxu0 %vm1660_vm6, %v5072_v63  ;;  %v3488_v63 = vsel %vm1459_vm5, %v5311_v16, %v3476_v62 }
0x1504   : > { %v3490_v42 = vsel %vm1644_vm7, %v3488_v63, %v3221_v20 }
0x15c1   : > { %v3395_v2 = vpop.f32.mrb[30].mxu0 }
0x15c2   : > { %3481 = vrot.lane.b32.xlu0 %v3395_v2, %s4642_s29  ;;  %v4332_v6 = vpop.f32.mrb[31].mxu0 }
0x15c5   : > { %v3469_v54 = vpop.f32.mrb[32].mxu0 }
0x15c6   : > { %3483 = vrot.lane.b32.xlu1 %v3469_v54, %s4642_s29  ;;  %v4337_v56 = vpop.f32.mrb[33].mxu0  ;;  %s3878_s29 = sshll.u32 %s5435_s24, 4 }
0x15c7   : > { %s605_s17 = scalar_lea.vmem %s5428_s16, %s3878_s29 }
0x1634   : > { %v3482_v40 = vpop.permute.xlu0 %3481 }
0x1635   : > { %v3491_v41 = vsel %vm1917_vm9, %v3489_v39, %v3482_v40 }
0x1636   : > { %4356 = vmatprep.mubr.msk.f32.mxu0 %vm1653_vm8, %v3491_v41 }
0x1638   : > { %v3484_v43 = vpop.permute.xlu1 %3483 }
0x1639   : > { %v3492_v44 = vsel %vm1917_vm9, %v3490_v42, %v3484_v43 }
0x163a   : > { %4357 = vmatmul.mubr.msk.f32.vlgmr.msra.gmra.mrb[34].mxu0 %vm1653_vm8, %v3492_v44 }
0x170d   : > { %v4358_v33 = vpop.f32.mrb[34].mxu0 }
0x170e   : > { %v3571_v53 = vadd.f32 %v4358_v33, %v5099_v52  ;;  %v3565_v55 = vpop.f32.mrb[35].mxu0 }
0x170f   : > { %v3566_v57 = vadd.f32 %v5099_v52, %v3565_v55  ;;  %v3872_v52 = vld [vmem:[%s600_s28] ss:$0 sm:$0xff] }
0x1710   : > { %4625 = vtanh.f32 %v3571_v53 }
0x1711   : > { %4627 = vtanh.f32 %v3566_v57 }
0x171a   : > { %v4626_v60 = vpop.eup %4625 }
0x171b   : > { %v4628_v3 = vpop.eup %4627  ;;  %v3581_v4 = vmul.f32 %v4626_v60, %v3579_v58 }
0x171c   : > { %v3580_v16 = vmul.f32 %v4628_v3, %v3578_v61 }
0x171d   : > { %v3583_v47 = vadd.f32 %v3581_v4, %v3577_v5 }
0x171e   : > { %v3582_v18 = vadd.f32 %v3580_v16, %v3576_v46 }
0x1720   : > { %4367 = vmatprep.mubr.msk.f32.mxu1 %vm1248_vm2, %v3582_v18 }
0x1721   : > { %4368 = vmatmul.mubr.msk.f32.vlgmr.msra.gmra.mrb[34].mxu1 %vm1248_vm2, %v3583_v47 }
0x17f4   : > { %v4369_v0 = vpop.f32.mrb[34].mxu1 }
0x17f5   : > { %v3673_v1 = vadd.f32 %v4369_v0, %v3872_v52  ;;  %v3667_v9 = vpop.f32.mrb[35].mxu1 }
0x17f6   : > { %v3668_v8 = vadd.f32 %v3872_v52, %v3667_v9 }
0x17f7   : > { %3678 = vst.msk [vmem:[%s605_s17 + $0x8] sm:$0xff] %vm3676_vm10, %v3673_v1 }
0x17f8   : > { %3677 = vst.msk [vmem:[%s605_s17] sm:$0xff] %vm3676_vm10, %v3668_v8 }
0x17f9 PF: > { %s28_s23 = sadd.s32 1, %s4635_s23  }
0x17fa   : > { %p25_p5 = scmp.ge.s32.totalorder %s28_s23, 4  }
0x17fc   :  { %27 = sbr.rel (!%p25_p5) target bundleno = 3 (0x3), region = 136 }

</bundles_post_ra>
